<compile_context>
chip_gen: v7x
topology: tpu7x:2x2x1
jax: 0.10.0
libtpu: 0.0.40
codegen_flags: <defaults>
</compile_context>

<pallas_src>
import functools

import numpy as np
import jax
import jax.numpy as jnp
from jax.experimental import pallas as pl
from jax.experimental.pallas import tpu as pltpu

# keep the pure-JAX reference at f32 matmul accuracy so it matches the kernel
jax.config.update("jax_default_matmul_precision", "highest")

F32 = jnp.float32
VMEM = pl.BlockSpec(memory_space=pltpu.MemorySpace.VMEM)

_ENC_NAMES = ("w1", "b1", "wih", "bih", "whh", "bhh", "wmv", "bmv")
_DEC_NAMES = ("w1", "b1", "w2", "b2", "w3", "b3")
_AG_NAMES = ("w1o", "w1z", "b1", "wih", "bih", "whh", "bhh", "w2", "b2")


# ----------------------------------------------------------------------------
# host-side: pack every parameter into one [R, 128] slab (single DMA)
# ----------------------------------------------------------------------------
def pack_params(params):
    entries = []

    def add(prefix, p, names):
        for n in names:
            entries.append((f"{prefix}.{n}", np.asarray(p[n], np.float32)))

    add("pe", params["proxy_encoder"], _ENC_NAMES)
    add("pd", params["proxy_decoder"], _DEC_NAMES)
    add("ag", params["agent"], _AG_NAMES)
    add("te", params["team_encoder"], _ENC_NAMES)
    add("td", params["team_decoder"], _DEC_NAMES)

    width = 128 * int(np.ceil(max(a.shape[1] for _, a in entries) / 128))
    layout, blocks, row = {}, [], 0
    for name, a in entries:
        layout[name] = (row, a.shape[0], a.shape[1])
        nr = ((a.shape[0] + 7) // 8) * 8          # sublane (8-row) aligned
        blk = np.zeros((nr, width), np.float32)
        blk[: a.shape[0], : a.shape[1]] = a
        blocks.append(blk)
        row += nr
    slab = jnp.asarray(np.concatenate(blocks, axis=0))
    return slab, layout


# ----------------------------------------------------------------------------
# in-kernel helpers (traced inside the fused kernel bodies)
# ----------------------------------------------------------------------------
def _carve(slab_ref, layout, name):
    r, nr, nc = layout[name]
    return slab_ref[r:r + nr, 0:nc]


def _linear(x, w, b):
    return jnp.dot(x, w, preferred_element_type=jnp.float32) + b


def _gru(x, h, wih, bih, whh, bhh):
    """PyTorch nn.GRUCell semantics; gate order along the 3H axis: [r, z, n]."""
    H = h.shape[-1]
    gi = jnp.dot(x, wih, preferred_element_type=jnp.float32) + bih
    gh = jnp.dot(h, whh, preferred_element_type=jnp.float32) + bhh
    r = jax.nn.sigmoid(gi[:, 0:H] + gh[:, 0:H])
    z = jax.nn.sigmoid(gi[:, H:2 * H] + gh[:, H:2 * H])
    n = jnp.tanh(gi[:, 2 * H:3 * H] + r * gh[:, 2 * H:3 * H])
    return (1.0 - z) * n + z * h


def _encoder(x, h, w, pref, z_dim):
    """Encoder.forward with the mean/var heads merged into one [H, 2Z] matmul."""
    a = jnp.maximum(_linear(x, w(pref + ".w1"), w(pref + ".b1")), 0.0)
    h_new = _gru(a, h, w(pref + ".wih"), w(pref + ".bih"),
                 w(pref + ".whh"), w(pref + ".bhh"))
    mv = _linear(h_new, w(pref + ".wmv"), w(pref + ".bmv"))
    return mv[:, 0:z_dim], mv[:, z_dim:2 * z_dim], h_new


def _decoder(x, w, pref):
    h = jnp.maximum(_linear(x, w(pref + ".w1"), w(pref + ".b1")), 0.0)
    h = jnp.maximum(_linear(h, w(pref + ".w2"), w(pref + ".b2")), 0.0)
    return _linear(h, w(pref + ".w3"), w(pref + ".b3"))


def _step_compute(obs, state, h_team, h_proxy, h_agent, eps_p, eps_t, w,
                  *, z_dim, n_agents, var_floor, test_mode, train_mode):
    sqrt_vf = float(np.sqrt(var_floor))

    # ---- proxy encoder + fused reparameterized sample ----
    mean_p, var_p, h_proxy_new = _encoder(obs, h_proxy, w, "pe", z_dim)
    if test_mode:
        z = mean_p
    else:
        # sqrt(clamp(exp(v), vf)) == max(exp(0.5*v), sqrt(vf))
        z = mean_p + jnp.maximum(jnp.exp(0.5 * var_p), sqrt_vf) * eps_p

    # ---- proxy decoder (z is detached in torch; forward value identical) ----
    theta = _decoder(z, w, "pd")

    # ---- agent head: fc1(cat([obs, theta])) == obs@W1o + theta@W1z + b1 ----
    a = jnp.maximum(
        jnp.dot(obs, w("ag.w1o"), preferred_element_type=jnp.float32)
        + jnp.dot(theta, w("ag.w1z"), preferred_element_type=jnp.float32)
        + w("ag.b1"), 0.0)
    h_agent_new = _gru(a, h_agent, w("ag.wih"), w("ag.bih"),
                       w("ag.whh"), w("ag.bhh"))
    q = _linear(h_agent_new, w("ag.w2"), w("ag.b2"))

    if not train_mode:
        return q, h_proxy_new, h_agent_new

    # ---- team encoder / sample / decoder + MI (KL) loss ----
    mean_t, var_t, h_team_new = _encoder(state, h_team, w, "te", z_dim)
    z_team = mean_t + jnp.maximum(jnp.exp(0.5 * var_t), sqrt_vf) * eps_t
    mixer = _decoder(z_team, w, "td")

    vp = jnp.maximum(jnp.exp(var_p), var_floor)
    vt = jnp.maximum(jnp.exp(var_t), var_floor)
    N, bs = mean_p.shape[0], mean_t.shape[0]
    # in-kernel one-hot selector: sel[r, c] = 1 iff r // n_agents == c
    rows = jax.lax.broadcasted_iota(jnp.int32, (N, bs), 0)
    cols = jax.lax.broadcasted_iota(jnp.int32, (N, bs), 1)
    lo = cols * n_agents
    sel = jnp.logical_and(rows >= lo, rows < lo + n_agents).astype(jnp.float32)
    mt_rep = jnp.dot(sel, mean_t, preferred_element_type=jnp.float32)
    vt_rep = jnp.dot(sel, vt, preferred_element_type=jnp.float32)
    kl = (0.5 * jnp.log(vt_rep / vp)
          + (vp + (mean_p - mt_rep) ** 2) / (2.0 * vt_rep) - 0.5)
    mi = jnp.sum(kl, keepdims=True) * (1.0 / bs)          # (1, 1)
    return q, mixer, mi, h_team_new, h_proxy_new, h_agent_new


# ----------------------------------------------------------------------------
# kernels
# ----------------------------------------------------------------------------
def _odits_train_kernel(obs_ref, state_ref, h_team_ref, h_proxy_ref,
                        h_agent_ref, eps_p_ref, eps_t_ref, slab_ref,
                        q_ref, mixer_ref, h_team_out, h_proxy_out, h_agent_out,
                        mi_ref, *, layout, z_dim, n_agents, var_floor,
                        test_mode):
    w = functools.partial(_carve, slab_ref, layout)
    q, mixer, mi, ht, hp, ha = _step_compute(
        obs_ref[...], state_ref[...], h_team_ref[...], h_proxy_ref[...],
        h_agent_ref[...], eps_p_ref[...], eps_t_ref[...], w,
        z_dim=z_dim, n_agents=n_agents, var_floor=var_floor,
        test_mode=test_mode, train_mode=True)
    q_ref[...] = q
    mixer_ref[...] = mixer
    h_team_out[...] = ht
    h_proxy_out[...] = hp
    h_agent_out[...] = ha
    mi_ref[...] = mi


def _odits_eval_kernel(obs_ref, h_proxy_ref, h_agent_ref, eps_p_ref, slab_ref,
                       q_ref, h_proxy_out, h_agent_out,
                       *, layout, z_dim, n_agents, var_floor, test_mode):
    w = functools.partial(_carve, slab_ref, layout)
    q, hp, ha = _step_compute(
        obs_ref[...], None, None, h_proxy_ref[...], h_agent_ref[...],
        eps_p_ref[...], None, w, z_dim=z_dim, n_agents=n_agents,
        var_floor=var_floor, test_mode=test_mode, train_mode=False)
    q_ref[...] = q
    h_proxy_out[...] = hp
    h_agent_out[...] = ha


def _odits_rollout_kernel(obs_ref, state_ref, eps_p_ref, eps_t_ref,
                          h_team0_ref, h_proxy0_ref, h_agent0_ref, slab_ref,
                          q_ref, mixer_ref, h_team_out, h_proxy_out,
                          h_agent_out, mi_ref,
                          *, layout, z_dim, n_agents, var_floor, test_mode):
    t = pl.program_id(0)

    @pl.when(t == 0)
    def _init():
        # hidden state is carried in the grid-resident output blocks
        h_team_out[...] = h_team0_ref[...]
        h_proxy_out[...] = h_proxy0_ref[...]
        h_agent_out[...] = h_agent0_ref[...]
        mi_ref[...] = jnp.zeros_like(mi_ref)

    w = functools.partial(_carve, slab_ref, layout)
    q, mixer, mi, ht, hp, ha = _step_compute(
        obs_ref[0], state_ref[0], h_team_out[...], h_proxy_out[...],
        h_agent_out[...], eps_p_ref[0], eps_t_ref[0], w,
        z_dim=z_dim, n_agents=n_agents, var_floor=var_floor,
        test_mode=test_mode, train_mode=True)
    q_ref[0] = q
    mixer_ref[0] = mixer
    h_team_out[...] = ht
    h_proxy_out[...] = hp
    h_agent_out[...] = ha
    mi_ref[...] = mi_ref[...] + mi        # mi summed over the rollout


# ----------------------------------------------------------------------------
# wrappers
# ----------------------------------------------------------------------------
def odits_forward(packed, obs, state, hidden, eps_proxy, eps_team, cfg,
                  test_mode=False, train_mode=True):
    """Single-step forward, semantics of ODITSAgent.forward."""
    slab, layout = packed
    h_team, h_proxy, h_agent = hidden
    N = obs.shape[0]
    H = h_agent.shape[1]
    Z = int(cfg["z_dim"])
    A = layout["ag.w2"][2]
    vf = float(cfg["var_floor"])
    n_agents = int(cfg["n_agents"])

    if train_mode:
        bs, Ds = state.shape
        kern = functools.partial(
            _odits_train_kernel, layout=layout, z_dim=Z, n_agents=n_agents,
            var_floor=vf, test_mode=bool(test_mode))
        q, mixer, ht, hp, ha, mi = pl.pallas_call(
            kern,
            out_shape=(jax.ShapeDtypeStruct((N, A), F32),
                       jax.ShapeDtypeStruct((bs, Ds), F32),
                       jax.ShapeDtypeStruct((bs, H), F32),
                       jax.ShapeDtypeStruct((N, H), F32),
                       jax.ShapeDtypeStruct((N, H), F32),
                       jax.ShapeDtypeStruct((1, 1), F32)),
            in_specs=[VMEM] * 8,
            out_specs=(VMEM,) * 6,
        )(obs, state, h_team, h_proxy, h_agent, eps_proxy, eps_team, slab)
        out = {"q": q, "mixer_input": mixer, "losses": {"mi_loss": mi[0, 0]}}
        return out, [ht, hp, ha]

    # eval path: team branch statically elided (no dead compute / dead DMAs)
    kern = functools.partial(
        _odits_eval_kernel, layout=layout, z_dim=Z, n_agents=n_agents,
        var_floor=vf, test_mode=bool(test_mode))
    q, hp, ha = pl.pallas_call(
        kern,
        out_shape=(jax.ShapeDtypeStruct((N, A), F32),
                   jax.ShapeDtypeStruct((N, H), F32),
                   jax.ShapeDtypeStruct((N, H), F32)),
        in_specs=[VMEM] * 5,
        out_specs=(VMEM,) * 3,
    )(obs, h_proxy, h_agent, eps_proxy, slab)
    return {"q": q}, [h_team, hp, ha]


def odits_rollout(packed, obs_seq, state_seq, hidden0, eps_p_seq, eps_t_seq,
                  cfg, test_mode=False):
    """T-step rollout in one pallas_call (weights & hidden resident in VMEM).

    Returns per-step q / mixer_input, the mi_loss SUMMED over the T steps, and
    the final hidden states.  Equivalent to calling the module forward T times.
    """
    slab, layout = packed
    h_team0, h_proxy0, h_agent0 = hidden0
    T, N, Dobs = obs_seq.shape
    _, bs, Ds = state_seq.shape
    H = h_agent0.shape[1]
    Z = int(cfg["z_dim"])
    A = layout["ag.w2"][2]

    kern = functools.partial(
        _odits_rollout_kernel, layout=layout, z_dim=Z,
        n_agents=int(cfg["n_agents"]), var_floor=float(cfg["var_floor"]),
        test_mode=bool(test_mode))

    grid_spec = pltpu.PrefetchScalarGridSpec(
        num_scalar_prefetch=0,
        grid=(T,),
        in_specs=[
            pl.BlockSpec((1, N, Dobs), lambda t: (t, 0, 0)),
            pl.BlockSpec((1, bs, Ds), lambda t: (t, 0, 0)),
            pl.BlockSpec((1, N, Z), lambda t: (t, 0, 0)),
            pl.BlockSpec((1, bs, Z), lambda t: (t, 0, 0)),
            pl.BlockSpec((bs, H), lambda t: (0, 0)),       # DMA'd once
            pl.BlockSpec((N, H), lambda t: (0, 0)),
            pl.BlockSpec((N, H), lambda t: (0, 0)),
            pl.BlockSpec(slab.shape, lambda t: (0, 0)),    # weights resident
        ],
        out_specs=(
            pl.BlockSpec((1, N, A), lambda t: (t, 0, 0)),
            pl.BlockSpec((1, bs, Ds), lambda t: (t, 0, 0)),
            pl.BlockSpec((bs, H), lambda t: (0, 0)),       # resident carries
            pl.BlockSpec((N, H), lambda t: (0, 0)),
            pl.BlockSpec((N, H), lambda t: (0, 0)),
            pl.BlockSpec((1, 1), lambda t: (0, 0)),
        ),
    )

    q_seq, mixer_seq, hT, hP, hA, mi_sum = pl.pallas_call(
        kern,
        out_shape=(jax.ShapeDtypeStruct((T, N, A), F32),
                   jax.ShapeDtypeStruct((T, bs, Ds), F32),
                   jax.ShapeDtypeStruct((bs, H), F32),
                   jax.ShapeDtypeStruct((N, H), F32),
                   jax.ShapeDtypeStruct((N, H), F32),
                   jax.ShapeDtypeStruct((1, 1), F32)),
        grid_spec=grid_spec,
        compiler_params=pltpu.CompilerParams(
            dimension_semantics=("arbitrary",)),
    )(obs_seq, state_seq, eps_p_seq, eps_t_seq, h_team0, h_proxy0, h_agent0,
      slab)
    return q_seq, mixer_seq, mi_sum[0, 0], [hT, hP, hA]


# ----------------------------------------------------------------------------
# parameter construction (PyTorch-style uniform fan-in init)
# ----------------------------------------------------------------------------
def _lin(key, d_in, d_out):
    k1, k2 = jax.random.split(key)
    bound = 1.0 / np.sqrt(d_in)
    w = jax.random.uniform(k1, (d_in, d_out), F32, -bound, bound)
    b = jax.random.uniform(k2, (1, d_out), F32, -bound, bound)
    return w, b


def _gru_params(key, d_in, hidden):
    k1, k2, k3, k4 = jax.random.split(key, 4)
    bound = 1.0 / np.sqrt(hidden)
    wih = jax.random.uniform(k1, (d_in, 3 * hidden), F32, -bound, bound)
    whh = jax.random.uniform(k2, (hidden, 3 * hidden), F32, -bound, bound)
    bih = jax.random.uniform(k3, (1, 3 * hidden), F32, -bound, bound)
    bhh = jax.random.uniform(k4, (1, 3 * hidden), F32, -bound, bound)
    return wih, bih, whh, bhh


def make_encoder_params(key, d_in, hidden, d_out):
    ks = jax.random.split(key, 4)
    w1, b1 = _lin(ks[0], d_in, hidden)
    wih, bih, whh, bhh = _gru_params(ks[1], hidden, hidden)
    wm, bm = _lin(ks[2], hidden, d_out)
    wv, bv = _lin(ks[3], hidden, d_out)
    wmv = jnp.concatenate([wm, wv], axis=1)     # merged mean|var head
    bmv = jnp.concatenate([bm, bv], axis=1)
    return dict(w1=w1, b1=b1, wih=wih, bih=bih, whh=whh, bhh=bhh,
                wm=wm, bm=bm, wv=wv, bv=bv, wmv=wmv, bmv=bmv)


def make_decoder_params(key, d_in, hidden, d_out):
    ks = jax.random.split(key, 3)
    w1, b1 = _lin(ks[0], d_in, hidden)
    w2, b2 = _lin(ks[1], hidden, hidden)
    w3, b3 = _lin(ks[2], hidden, d_out)
    return dict(w1=w1, b1=b1, w2=w2, b2=b2, w3=w3, b3=b3)


def make_agent_params(key, d_obs, z_dim, hidden, n_actions):
    ks = jax.random.split(key, 3)
    w1, b1 = _lin(ks[0], d_obs + z_dim, hidden)
    wih, bih, whh, bhh = _gru_params(ks[1], hidden, hidden)
    w2, b2 = _lin(ks[2], hidden, n_actions)
    return dict(w1=w1, w1o=w1[:d_obs], w1z=w1[d_obs:], b1=b1,
                wih=wih, bih=bih, whh=whh, bhh=bhh, w2=w2, b2=b2)


# ----------------------------------------------------------------------------
# pure-JAX reference (mirrors the PyTorch module exactly) for validation
# ----------------------------------------------------------------------------
def _ref_gru(x, h, p):
    H = h.shape[-1]
    gi = x @ p["wih"] + p["bih"]
    gh = h @ p["whh"] + p["bhh"]
    r = jax.nn.sigmoid(gi[:, :H] + gh[:, :H])
    zg = jax.nn.sigmoid(gi[:, H:2 * H] + gh[:, H:2 * H])
    n = jnp.tanh(gi[:, 2 * H:] + r * gh[:, 2 * H:])
    return (1.0 - zg) * n + zg * h


def _ref_encoder(x, h, p):
    x = jax.nn.relu(x @ p["w1"] + p["b1"])
    h_new = _ref_gru(x, h, p)
    return h_new @ p["wm"] + p["bm"], h_new @ p["wv"] + p["bv"], h_new


def _ref_decoder(x, p):
    h = jax.nn.relu(x @ p["w1"] + p["b1"])
    h = jax.nn.relu(h @ p["w2"] + p["b2"])
    return h @ p["w3"] + p["b3"]


def _ref_forward(params, obs, state, hidden, eps_p, eps_t, cfg, test_mode=False):
    vf = cfg["var_floor"]
    mean_p, var_p, h_proxy = _ref_encoder(obs, hidden[1], params["proxy_encoder"])
    if test_mode:
        z = mean_p
    else:
        z = mean_p + jnp.sqrt(jnp.maximum(jnp.exp(var_p), vf)) * eps_p
    theta = _ref_decoder(z, params["proxy_decoder"])
    pa = params["agent"]
    x = jax.nn.relu(jnp.concatenate([obs, theta], axis=-1) @ pa["w1"] + pa["b1"])
    h_agent = _ref_gru(x, hidden[2], pa)
    q = h_agent @ pa["w2"] + pa["b2"]
    mean_t, var_t, h_team = _ref_encoder(state, hidden[0], params["team_encoder"])
    z_team = mean_t + jnp.sqrt(jnp.maximum(jnp.exp(var_t), vf)) * eps_t
    mixer_input = _ref_decoder(z_team, params["team_decoder"])
    bs, n_agents = state.shape[0], cfg["n_agents"]
    vp = jnp.maximum(jnp.exp(var_p), vf).reshape(bs, n_agents, -1)
    mp = mean_p.reshape(bs, n_agents, -1)
    vt = jnp.maximum(jnp.exp(var_t), vf)
    mi = 0.0
    for i in range(n_agents):
        kl = (0.5 * jnp.log(vt / vp[:, i])
              + (vp[:, i] + (mp[:, i] - mean_t) ** 2) / (2.0 * vt) - 0.5)
        mi += kl.sum(-1).mean()
    return q, mixer_input, mi, h_team, h_proxy, h_agent


# ----------------------------------------------------------------------------
if __name__ == "__main__":
    cfg = dict(bs=2, n_agents=3, input_shape=16, state_shape=24,
               rnn_hidden_dim=32, z_dim=8, n_actions=5, var_floor=0.002)
    N = cfg["bs"] * cfg["n_agents"]

    root = jax.random.PRNGKey(0)
    kp = jax.random.split(root, 10)
    params = {
        "team_encoder": make_encoder_params(kp[0], cfg["state_shape"],
                                            cfg["rnn_hidden_dim"], cfg["z_dim"]),
        "team_decoder": make_decoder_params(kp[1], cfg["z_dim"],
                                            cfg["rnn_hidden_dim"],
                                            cfg["state_shape"]),
        "proxy_encoder": make_encoder_params(kp[2], cfg["input_shape"],
                                             cfg["rnn_hidden_dim"], cfg["z_dim"]),
        "proxy_decoder": make_decoder_params(kp[3], cfg["z_dim"],
                                             cfg["rnn_hidden_dim"], cfg["z_dim"]),
        "agent": make_agent_params(kp[4], cfg["input_shape"], cfg["z_dim"],
                                   cfg["rnn_hidden_dim"], cfg["n_actions"]),
    }
    packed = pack_params(params)       # one [R,128] slab + static layout dict

    obs = jax.random.normal(kp[5], (N, cfg["input_shape"]), F32)
    state = jax.random.normal(kp[6], (cfg["bs"], cfg["state_shape"]), F32)
    ke1, ke2 = jax.random.split(kp[7])
    eps_proxy = jax.random.normal(ke1, (N, cfg["z_dim"]), F32)
    eps_team = jax.random.normal(ke2, (cfg["bs"], cfg["z_dim"]), F32)

    hidden = (jnp.zeros((cfg["bs"], cfg["rnn_hidden_dim"]), F32),
              jnp.zeros((N, cfg["rnn_hidden_dim"]), F32),
              jnp.zeros((N, cfg["rnn_hidden_dim"]), F32))

    tol = dict(rtol=1e-3, atol=1e-3)

    # ---- 1. single-step, train_mode=True ----
    out, new_hidden = odits_forward(packed, obs, state, hidden, eps_proxy,
                                    eps_team, cfg, test_mode=False,
                                    train_mode=True)
    jax.block_until_ready(out["q"])
    q_r, mix_r, mi_r, ht_r, hp_r, ha_r = _ref_forward(
        params, obs, state, hidden, eps_proxy, eps_team, cfg)
    np.testing.assert_allclose(np.asarray(out["q"]), np.asarray(q_r), **tol)
    np.testing.assert_allclose(np.asarray(out["mixer_input"]),
                               np.asarray(mix_r), **tol)
    np.testing.assert_allclose(np.asarray(out["losses"]["mi_loss"]),
                               np.asarray(mi_r), **tol)
    np.testing.assert_allclose(np.asarray(new_hidden[0]), np.asarray(ht_r), **tol)
    np.testing.assert_allclose(np.asarray(new_hidden[1]), np.asarray(hp_r), **tol)
    np.testing.assert_allclose(np.asarray(new_hidden[2]), np.asarray(ha_r), **tol)

    # ---- 2. eval path (train_mode=False, test_mode=True): team branch elided ----
    out_e, hid_e = odits_forward(packed, obs, None, hidden, eps_proxy, None,
                                 cfg, test_mode=True, train_mode=False)
    jax.block_until_ready(out_e["q"])
    q_e, _, _, _, hp_e, ha_e = _ref_forward(params, obs, state, hidden,
                                            eps_proxy, eps_team, cfg,
                                            test_mode=True)
    np.testing.assert_allclose(np.asarray(out_e["q"]), np.asarray(q_e), **tol)
    np.testing.assert_allclose(np.asarray(hid_e[1]), np.asarray(hp_e), **tol)
    np.testing.assert_allclose(np.asarray(hid_e[2]), np.asarray(ha_e), **tol)

    # ---- 3. T-step rollout: one pallas_call, weights/hidden resident ----
    T = 4
    kr = jax.random.split(kp[8], 4)
    obs_seq = jax.random.normal(kr[0], (T, N, cfg["input_shape"]), F32)
    state_seq = jax.random.normal(kr[1], (T, cfg["bs"], cfg["state_shape"]), F32)
    eps_p_seq = jax.random.normal(kr[2], (T, N, cfg["z_dim"]), F32)
    eps_t_seq = jax.random.normal(kr[3], (T, cfg["bs"], cfg["z_dim"]), F32)

    q_seq, mix_seq, mi_sum, hid_T = odits_rollout(
        packed, obs_seq, state_seq, hidden, eps_p_seq, eps_t_seq, cfg)
    jax.block_until_ready(q_seq)

    hid = hidden
    mi_tot = 0.0
    q_list, mix_list = [], []
    for t in range(T):
        q_r, mix_r, mi_r, ht_r, hp_r, ha_r = _ref_forward(
            params, obs_seq[t], state_seq[t], hid, eps_p_seq[t], eps_t_seq[t],
            cfg)
        hid = (ht_r, hp_r, ha_r)
        mi_tot = mi_tot + mi_r
        q_list.append(q_r)
        mix_list.append(mix_r)
    tol2 = dict(rtol=2e-3, atol=2e-3)
    np.testing.assert_allclose(np.asarray(q_seq),
                               np.asarray(jnp.stack(q_list)), **tol2)
    np.testing.assert_allclose(np.asarray(mix_seq),
                               np.asarray(jnp.stack(mix_list)), **tol2)
    np.testing.assert_allclose(np.asarray(mi_sum), np.asarray(mi_tot), **tol2)
    np.testing.assert_allclose(np.asarray(hid_T[0]), np.asarray(hid[0]), **tol2)
    np.testing.assert_allclose(np.asarray(hid_T[1]), np.asarray(hid[1]), **tol2)
    np.testing.assert_allclose(np.asarray(hid_T[2]), np.asarray(hid[2]), **tol2)

    print("KERNEL_OK")
</pallas_src>

<mosaic_0001>
module attributes {stable_mosaic.version = 11 : i64} {
  func.func @_odits_train_kernel(%arg0: memref<6x16xf32, #tpu.memory_space<vmem>>, %arg1: memref<2x24xf32, #tpu.memory_space<vmem>>, %arg2: memref<2x32xf32, #tpu.memory_space<vmem>>, %arg3: memref<6x32xf32, #tpu.memory_space<vmem>>, %arg4: memref<6x32xf32, #tpu.memory_space<vmem>>, %arg5: memref<6x8xf32, #tpu.memory_space<vmem>>, %arg6: memref<2x8xf32, #tpu.memory_space<vmem>>, %arg7: memref<640x128xf32, #tpu.memory_space<vmem>>, %arg8: memref<6x5xf32, #tpu.memory_space<vmem>>, %arg9: memref<2x24xf32, #tpu.memory_space<vmem>>, %arg10: memref<2x32xf32, #tpu.memory_space<vmem>>, %arg11: memref<6x32xf32, #tpu.memory_space<vmem>>, %arg12: memref<6x32xf32, #tpu.memory_space<vmem>>, %arg13: memref<1x1xf32, #tpu.memory_space<vmem>>) attributes {dimension_semantics = [], scalar_prefetch = 0 : i64, scratch_operands = 0 : i64, tpu.core_type = #tpu.core_type<tc>} {
    %c0 = arith.constant 0 : index
    %c0_0 = arith.constant 0 : index
    %0 = vector.load %arg0[%c0, %c0_0] : memref<6x16xf32, #tpu.memory_space<vmem>>, vector<6x16xf32>
    %c0_1 = arith.constant 0 : index
    %c0_2 = arith.constant 0 : index
    %1 = vector.load %arg1[%c0_1, %c0_2] : memref<2x24xf32, #tpu.memory_space<vmem>>, vector<2x24xf32>
    %c0_3 = arith.constant 0 : index
    %c0_4 = arith.constant 0 : index
    %2 = vector.load %arg2[%c0_3, %c0_4] : memref<2x32xf32, #tpu.memory_space<vmem>>, vector<2x32xf32>
    %c0_5 = arith.constant 0 : index
    %c0_6 = arith.constant 0 : index
    %3 = vector.load %arg3[%c0_5, %c0_6] : memref<6x32xf32, #tpu.memory_space<vmem>>, vector<6x32xf32>
    %c0_7 = arith.constant 0 : index
    %c0_8 = arith.constant 0 : index
    %4 = vector.load %arg4[%c0_7, %c0_8] : memref<6x32xf32, #tpu.memory_space<vmem>>, vector<6x32xf32>
    %c0_9 = arith.constant 0 : index
    %c0_10 = arith.constant 0 : index
    %5 = vector.load %arg5[%c0_9, %c0_10] : memref<6x8xf32, #tpu.memory_space<vmem>>, vector<6x8xf32>
    %c0_11 = arith.constant 0 : index
    %c0_12 = arith.constant 0 : index
    %6 = vector.load %arg6[%c0_11, %c0_12] : memref<2x8xf32, #tpu.memory_space<vmem>>, vector<2x8xf32>
    %c0_13 = arith.constant 0 : index
    %c0_14 = arith.constant 0 : index
    %7 = vector.load %arg7[%c0_13, %c0_14] : memref<640x128xf32, #tpu.memory_space<vmem>>, vector<16x32xf32>
    %c16 = arith.constant 16 : index
    %c0_15 = arith.constant 0 : index
    %8 = vector.load %arg7[%c16, %c0_15] : memref<640x128xf32, #tpu.memory_space<vmem>>, vector<1x32xf32>
    %cst = arith.constant dense<0.000000e+00> : vector<6x32xf32>
    %9 = tpu.matmul %0, %7, %cst {dimension_numbers = #tpu.dot_dimension_numbers<[1], [0], [0], [1], [0, 0, 1, 1], [], []>, precision = #tpu.contract_precision<fp32>} : vector<6x16xf32>, vector<16x32xf32>, vector<6x32xf32> -> vector<6x32xf32>
    %10 = vector.broadcast %8 : vector<1x32xf32> to vector<6x32xf32>
    %11 = arith.addf %9, %10 : vector<6x32xf32>
    %cst_16 = arith.constant 0.000000e+00 : f32
    %12 = vector.broadcast %cst_16 : f32 to vector<6x32xf32>
    %13 = arith.maximumf %11, %12 : vector<6x32xf32>
    %c24 = arith.constant 24 : index
    %c0_17 = arith.constant 0 : index
    %14 = vector.load %arg7[%c24, %c0_17] : memref<640x128xf32, #tpu.memory_space<vmem>>, vector<32x96xf32>
    %c56 = arith.constant 56 : index
    %c0_18 = arith.constant 0 : index
    %15 = vector.load %arg7[%c56, %c0_18] : memref<640x128xf32, #tpu.memory_space<vmem>>, vector<1x96xf32>
    %c64 = arith.constant 64 : index
    %c0_19 = arith.constant 0 : index
    %16 = vector.load %arg7[%c64, %c0_19] : memref<640x128xf32, #tpu.memory_space<vmem>>, vector<32x96xf32>
    %c96 = arith.constant 96 : index
    %c0_20 = arith.constant 0 : index
    %17 = vector.load %arg7[%c96, %c0_20] : memref<640x128xf32, #tpu.memory_space<vmem>>, vector<1x96xf32>
    %cst_21 = arith.constant dense<0.000000e+00> : vector<6x96xf32>
    %18 = tpu.matmul %13, %14, %cst_21 {dimension_numbers = #tpu.dot_dimension_numbers<[1], [0], [0], [1], [0, 0, 1, 1], [], []>, precision = #tpu.contract_precision<fp32>} : vector<6x32xf32>, vector<32x96xf32>, vector<6x96xf32> -> vector<6x96xf32>
    %19 = vector.broadcast %15 : vector<1x96xf32> to vector<6x96xf32>
    %20 = arith.addf %18, %19 : vector<6x96xf32>
    %cst_22 = arith.constant dense<0.000000e+00> : vector<6x96xf32>
    %21 = tpu.matmul %3, %16, %cst_22 {dimension_numbers = #tpu.dot_dimension_numbers<[1], [0], [0], [1], [0, 0, 1, 1], [], []>, precision = #tpu.contract_precision<fp32>} : vector<6x32xf32>, vector<32x96xf32>, vector<6x96xf32> -> vector<6x96xf32>
    %22 = vector.broadcast %17 : vector<1x96xf32> to vector<6x96xf32>
    %23 = arith.addf %21, %22 : vector<6x96xf32>
    %24 = vector.extract_strided_slice %20 {offsets = [0, 0], sizes = [6, 32], strides = [1, 1]} : vector<6x96xf32> to vector<6x32xf32>
    %25 = vector.extract_strided_slice %23 {offsets = [0, 0], sizes = [6, 32], strides = [1, 1]} : vector<6x96xf32> to vector<6x32xf32>
    %26 = arith.addf %24, %25 : vector<6x32xf32>
    %27 = arith.negf %26 : vector<6x32xf32>
    %28 = math.exp %27 : vector<6x32xf32>
    %cst_23 = arith.constant 1.000000e+00 : f32
    %29 = vector.broadcast %cst_23 : f32 to vector<6x32xf32>
    %30 = arith.addf %29, %28 : vector<6x32xf32>
    %31 = arith.divf %29, %30 : vector<6x32xf32>
    %32 = vector.extract_strided_slice %20 {offsets = [0, 32], sizes = [6, 32], strides = [1, 1]} : vector<6x96xf32> to vector<6x32xf32>
    %33 = vector.extract_strided_slice %23 {offsets = [0, 32], sizes = [6, 32], strides = [1, 1]} : vector<6x96xf32> to vector<6x32xf32>
    %34 = arith.addf %32, %33 : vector<6x32xf32>
    %35 = arith.negf %34 : vector<6x32xf32>
    %36 = math.exp %35 : vector<6x32xf32>
    %cst_24 = arith.constant 1.000000e+00 : f32
    %37 = vector.broadcast %cst_24 : f32 to vector<6x32xf32>
    %38 = arith.addf %37, %36 : vector<6x32xf32>
    %39 = arith.divf %37, %38 : vector<6x32xf32>
    %40 = vector.extract_strided_slice %20 {offsets = [0, 64], sizes = [6, 32], strides = [1, 1]} : vector<6x96xf32> to vector<6x32xf32>
    %41 = vector.extract_strided_slice %23 {offsets = [0, 64], sizes = [6, 32], strides = [1, 1]} : vector<6x96xf32> to vector<6x32xf32>
    %42 = arith.mulf %31, %41 : vector<6x32xf32>
    %43 = arith.addf %40, %42 : vector<6x32xf32>
    %44 = math.tanh %43 : vector<6x32xf32>
    %cst_25 = arith.constant 1.000000e+00 : f32
    %45 = vector.broadcast %cst_25 : f32 to vector<6x32xf32>
    %46 = arith.subf %45, %39 : vector<6x32xf32>
    %47 = arith.mulf %46, %44 : vector<6x32xf32>
    %48 = arith.mulf %39, %3 : vector<6x32xf32>
    %49 = arith.addf %47, %48 : vector<6x32xf32>
    %c104 = arith.constant 104 : index
    %c0_26 = arith.constant 0 : index
    %50 = vector.load %arg7[%c104, %c0_26] : memref<640x128xf32, #tpu.memory_space<vmem>>, vector<32x16xf32>
    %c136 = arith.constant 136 : index
    %c0_27 = arith.constant 0 : index
    %51 = vector.load %arg7[%c136, %c0_27] : memref<640x128xf32, #tpu.memory_space<vmem>>, vector<1x16xf32>
    %cst_28 = arith.constant dense<0.000000e+00> : vector<6x16xf32>
    %52 = tpu.matmul %49, %50, %cst_28 {dimension_numbers = #tpu.dot_dimension_numbers<[1], [0], [0], [1], [0, 0, 1, 1], [], []>, precision = #tpu.contract_precision<fp32>} : vector<6x32xf32>, vector<32x16xf32>, vector<6x16xf32> -> vector<6x16xf32>
    %53 = vector.broadcast %51 : vector<1x16xf32> to vector<6x16xf32>
    %54 = arith.addf %52, %53 : vector<6x16xf32>
    %55 = vector.extract_strided_slice %54 {offsets = [0, 0], sizes = [6, 8], strides = [1, 1]} : vector<6x16xf32> to vector<6x8xf32>
    %56 = vector.extract_strided_slice %54 {offsets = [0, 8], sizes = [6, 8], strides = [1, 1]} : vector<6x16xf32> to vector<6x8xf32>
    %cst_29 = arith.constant 5.000000e-01 : f32
    %57 = vector.broadcast %cst_29 : f32 to vector<6x8xf32>
    %58 = arith.mulf %57, %56 : vector<6x8xf32>
    %59 = math.exp %58 : vector<6x8xf32>
    %cst_30 = arith.constant 0.0447213612 : f32
    %60 = vector.broadcast %cst_30 : f32 to vector<6x8xf32>
    %61 = arith.maximumf %59, %60 : vector<6x8xf32>
    %62 = arith.mulf %61, %5 : vector<6x8xf32>
    %63 = arith.addf %55, %62 : vector<6x8xf32>
    %c144 = arith.constant 144 : index
    %c0_31 = arith.constant 0 : index
    %64 = vector.load %arg7[%c144, %c0_31] : memref<640x128xf32, #tpu.memory_space<vmem>>, vector<8x32xf32>
    %c152 = arith.constant 152 : index
    %c0_32 = arith.constant 0 : index
    %65 = vector.load %arg7[%c152, %c0_32] : memref<640x128xf32, #tpu.memory_space<vmem>>, vector<1x32xf32>
    %cst_33 = arith.constant dense<0.000000e+00> : vector<6x32xf32>
    %66 = tpu.matmul %63, %64, %cst_33 {dimension_numbers = #tpu.dot_dimension_numbers<[1], [0], [0], [1], [0, 0, 1, 1], [], []>, precision = #tpu.contract_precision<fp32>} : vector<6x8xf32>, vector<8x32xf32>, vector<6x32xf32> -> vector<6x32xf32>
    %67 = vector.broadcast %65 : vector<1x32xf32> to vector<6x32xf32>
    %68 = arith.addf %66, %67 : vector<6x32xf32>
    %cst_34 = arith.constant 0.000000e+00 : f32
    %69 = vector.broadcast %cst_34 : f32 to vector<6x32xf32>
    %70 = arith.maximumf %68, %69 : vector<6x32xf32>
    %c160 = arith.constant 160 : index
    %c0_35 = arith.constant 0 : index
    %71 = vector.load %arg7[%c160, %c0_35] : memref<640x128xf32, #tpu.memory_space<vmem>>, vector<32x32xf32>
    %c192 = arith.constant 192 : index
    %c0_36 = arith.constant 0 : index
    %72 = vector.load %arg7[%c192, %c0_36] : memref<640x128xf32, #tpu.memory_space<vmem>>, vector<1x32xf32>
    %cst_37 = arith.constant dense<0.000000e+00> : vector<6x32xf32>
    %73 = tpu.matmul %70, %71, %cst_37 {dimension_numbers = #tpu.dot_dimension_numbers<[1], [0], [0], [1], [0, 0, 1, 1], [], []>, precision = #tpu.contract_precision<fp32>} : vector<6x32xf32>, vector<32x32xf32>, vector<6x32xf32> -> vector<6x32xf32>
    %74 = vector.broadcast %72 : vector<1x32xf32> to vector<6x32xf32>
    %75 = arith.addf %73, %74 : vector<6x32xf32>
    %cst_38 = arith.constant 0.000000e+00 : f32
    %76 = vector.broadcast %cst_38 : f32 to vector<6x32xf32>
    %77 = arith.maximumf %75, %76 : vector<6x32xf32>
    %c200 = arith.constant 200 : index
    %c0_39 = arith.constant 0 : index
    %78 = vector.load %arg7[%c200, %c0_39] : memref<640x128xf32, #tpu.memory_space<vmem>>, vector<32x8xf32>
    %c232 = arith.constant 232 : index
    %c0_40 = arith.constant 0 : index
    %79 = vector.load %arg7[%c232, %c0_40] : memref<640x128xf32, #tpu.memory_space<vmem>>, vector<1x8xf32>
    %cst_41 = arith.constant dense<0.000000e+00> : vector<6x8xf32>
    %80 = tpu.matmul %77, %78, %cst_41 {dimension_numbers = #tpu.dot_dimension_numbers<[1], [0], [0], [1], [0, 0, 1, 1], [], []>, precision = #tpu.contract_precision<fp32>} : vector<6x32xf32>, vector<32x8xf32>, vector<6x8xf32> -> vector<6x8xf32>
    %81 = vector.broadcast %79 : vector<1x8xf32> to vector<6x8xf32>
    %82 = arith.addf %80, %81 : vector<6x8xf32>
    %c240 = arith.constant 240 : index
    %c0_42 = arith.constant 0 : index
    %83 = vector.load %arg7[%c240, %c0_42] : memref<640x128xf32, #tpu.memory_space<vmem>>, vector<16x32xf32>
    %cst_43 = arith.constant dense<0.000000e+00> : vector<6x32xf32>
    %84 = tpu.matmul %0, %83, %cst_43 {dimension_numbers = #tpu.dot_dimension_numbers<[1], [0], [0], [1], [0, 0, 1, 1], [], []>, precision = #tpu.contract_precision<fp32>} : vector<6x16xf32>, vector<16x32xf32>, vector<6x32xf32> -> vector<6x32xf32>
    %c256 = arith.constant 256 : index
    %c0_44 = arith.constant 0 : index
    %85 = vector.load %arg7[%c256, %c0_44] : memref<640x128xf32, #tpu.memory_space<vmem>>, vector<8x32xf32>
    %cst_45 = arith.constant dense<0.000000e+00> : vector<6x32xf32>
    %86 = tpu.matmul %82, %85, %cst_45 {dimension_numbers = #tpu.dot_dimension_numbers<[1], [0], [0], [1], [0, 0, 1, 1], [], []>, precision = #tpu.contract_precision<fp32>} : vector<6x8xf32>, vector<8x32xf32>, vector<6x32xf32> -> vector<6x32xf32>
    %87 = arith.addf %84, %86 : vector<6x32xf32>
    %c264 = arith.constant 264 : index
    %c0_46 = arith.constant 0 : index
    %88 = vector.load %arg7[%c264, %c0_46] : memref<640x128xf32, #tpu.memory_space<vmem>>, vector<1x32xf32>
    %89 = vector.broadcast %88 : vector<1x32xf32> to vector<6x32xf32>
    %90 = arith.addf %87, %89 : vector<6x32xf32>
    %cst_47 = arith.constant 0.000000e+00 : f32
    %91 = vector.broadcast %cst_47 : f32 to vector<6x32xf32>
    %92 = arith.maximumf %90, %91 : vector<6x32xf32>
    %c272 = arith.constant 272 : index
    %c0_48 = arith.constant 0 : index
    %93 = vector.load %arg7[%c272, %c0_48] : memref<640x128xf32, #tpu.memory_space<vmem>>, vector<32x96xf32>
    %c304 = arith.constant 304 : index
    %c0_49 = arith.constant 0 : index
    %94 = vector.load %arg7[%c304, %c0_49] : memref<640x128xf32, #tpu.memory_space<vmem>>, vector<1x96xf32>
    %c312 = arith.constant 312 : index
    %c0_50 = arith.constant 0 : index
    %95 = vector.load %arg7[%c312, %c0_50] : memref<640x128xf32, #tpu.memory_space<vmem>>, vector<32x96xf32>
    %c344 = arith.constant 344 : index
    %c0_51 = arith.constant 0 : index
    %96 = vector.load %arg7[%c344, %c0_51] : memref<640x128xf32, #tpu.memory_space<vmem>>, vector<1x96xf32>
    %cst_52 = arith.constant dense<0.000000e+00> : vector<6x96xf32>
    %97 = tpu.matmul %92, %93, %cst_52 {dimension_numbers = #tpu.dot_dimension_numbers<[1], [0], [0], [1], [0, 0, 1, 1], [], []>, precision = #tpu.contract_precision<fp32>} : vector<6x32xf32>, vector<32x96xf32>, vector<6x96xf32> -> vector<6x96xf32>
    %98 = vector.broadcast %94 : vector<1x96xf32> to vector<6x96xf32>
    %99 = arith.addf %97, %98 : vector<6x96xf32>
    %cst_53 = arith.constant dense<0.000000e+00> : vector<6x96xf32>
    %100 = tpu.matmul %4, %95, %cst_53 {dimension_numbers = #tpu.dot_dimension_numbers<[1], [0], [0], [1], [0, 0, 1, 1], [], []>, precision = #tpu.contract_precision<fp32>} : vector<6x32xf32>, vector<32x96xf32>, vector<6x96xf32> -> vector<6x96xf32>
    %101 = vector.broadcast %96 : vector<1x96xf32> to vector<6x96xf32>
    %102 = arith.addf %100, %101 : vector<6x96xf32>
    %103 = vector.extract_strided_slice %99 {offsets = [0, 0], sizes = [6, 32], strides = [1, 1]} : vector<6x96xf32> to vector<6x32xf32>
    %104 = vector.extract_strided_slice %102 {offsets = [0, 0], sizes = [6, 32], strides = [1, 1]} : vector<6x96xf32> to vector<6x32xf32>
    %105 = arith.addf %103, %104 : vector<6x32xf32>
    %106 = arith.negf %105 : vector<6x32xf32>
    %107 = math.exp %106 : vector<6x32xf32>
    %cst_54 = arith.constant 1.000000e+00 : f32
    %108 = vector.broadcast %cst_54 : f32 to vector<6x32xf32>
    %109 = arith.addf %108, %107 : vector<6x32xf32>
    %110 = arith.divf %108, %109 : vector<6x32xf32>
    %111 = vector.extract_strided_slice %99 {offsets = [0, 32], sizes = [6, 32], strides = [1, 1]} : vector<6x96xf32> to vector<6x32xf32>
    %112 = vector.extract_strided_slice %102 {offsets = [0, 32], sizes = [6, 32], strides = [1, 1]} : vector<6x96xf32> to vector<6x32xf32>
    %113 = arith.addf %111, %112 : vector<6x32xf32>
    %114 = arith.negf %113 : vector<6x32xf32>
    %115 = math.exp %114 : vector<6x32xf32>
    %cst_55 = arith.constant 1.000000e+00 : f32
    %116 = vector.broadcast %cst_55 : f32 to vector<6x32xf32>
    %117 = arith.addf %116, %115 : vector<6x32xf32>
    %118 = arith.divf %116, %117 : vector<6x32xf32>
    %119 = vector.extract_strided_slice %99 {offsets = [0, 64], sizes = [6, 32], strides = [1, 1]} : vector<6x96xf32> to vector<6x32xf32>
    %120 = vector.extract_strided_slice %102 {offsets = [0, 64], sizes = [6, 32], strides = [1, 1]} : vector<6x96xf32> to vector<6x32xf32>
    %121 = arith.mulf %110, %120 : vector<6x32xf32>
    %122 = arith.addf %119, %121 : vector<6x32xf32>
    %123 = math.tanh %122 : vector<6x32xf32>
    %cst_56 = arith.constant 1.000000e+00 : f32
    %124 = vector.broadcast %cst_56 : f32 to vector<6x32xf32>
    %125 = arith.subf %124, %118 : vector<6x32xf32>
    %126 = arith.mulf %125, %123 : vector<6x32xf32>
    %127 = arith.mulf %118, %4 : vector<6x32xf32>
    %128 = arith.addf %126, %127 : vector<6x32xf32>
    %c352 = arith.constant 352 : index
    %c0_57 = arith.constant 0 : index
    %129 = vector.load %arg7[%c352, %c0_57] : memref<640x128xf32, #tpu.memory_space<vmem>>, vector<32x5xf32>
    %c384 = arith.constant 384 : index
    %c0_58 = arith.constant 0 : index
    %130 = vector.load %arg7[%c384, %c0_58] : memref<640x128xf32, #tpu.memory_space<vmem>>, vector<1x5xf32>
    %cst_59 = arith.constant dense<0.000000e+00> : vector<6x5xf32>
    %131 = tpu.matmul %128, %129, %cst_59 {dimension_numbers = #tpu.dot_dimension_numbers<[1], [0], [0], [1], [0, 0, 1, 1], [], []>, precision = #tpu.contract_precision<fp32>} : vector<6x32xf32>, vector<32x5xf32>, vector<6x5xf32> -> vector<6x5xf32>
    %132 = vector.broadcast %130 : vector<1x5xf32> to vector<6x5xf32>
    %133 = arith.addf %131, %132 : vector<6x5xf32>
    %c392 = arith.constant 392 : index
    %c0_60 = arith.constant 0 : index
    %134 = vector.load %arg7[%c392, %c0_60] : memref<640x128xf32, #tpu.memory_space<vmem>>, vector<24x32xf32>
    %c416 = arith.constant 416 : index
    %c0_61 = arith.constant 0 : index
    %135 = vector.load %arg7[%c416, %c0_61] : memref<640x128xf32, #tpu.memory_space<vmem>>, vector<1x32xf32>
    %cst_62 = arith.constant dense<0.000000e+00> : vector<2x32xf32>
    %136 = tpu.matmul %1, %134, %cst_62 {dimension_numbers = #tpu.dot_dimension_numbers<[1], [0], [0], [1], [0, 0, 1, 1], [], []>, precision = #tpu.contract_precision<fp32>} : vector<2x24xf32>, vector<24x32xf32>, vector<2x32xf32> -> vector<2x32xf32>
    %137 = vector.broadcast %135 : vector<1x32xf32> to vector<2x32xf32>
    %138 = arith.addf %136, %137 : vector<2x32xf32>
    %cst_63 = arith.constant 0.000000e+00 : f32
    %139 = vector.broadcast %cst_63 : f32 to vector<2x32xf32>
    %140 = arith.maximumf %138, %139 : vector<2x32xf32>
    %c424 = arith.constant 424 : index
    %c0_64 = arith.constant 0 : index
    %141 = vector.load %arg7[%c424, %c0_64] : memref<640x128xf32, #tpu.memory_space<vmem>>, vector<32x96xf32>
    %c456 = arith.constant 456 : index
    %c0_65 = arith.constant 0 : index
    %142 = vector.load %arg7[%c456, %c0_65] : memref<640x128xf32, #tpu.memory_space<vmem>>, vector<1x96xf32>
    %c464 = arith.constant 464 : index
    %c0_66 = arith.constant 0 : index
    %143 = vector.load %arg7[%c464, %c0_66] : memref<640x128xf32, #tpu.memory_space<vmem>>, vector<32x96xf32>
    %c496 = arith.constant 496 : index
    %c0_67 = arith.constant 0 : index
    %144 = vector.load %arg7[%c496, %c0_67] : memref<640x128xf32, #tpu.memory_space<vmem>>, vector<1x96xf32>
    %cst_68 = arith.constant dense<0.000000e+00> : vector<2x96xf32>
    %145 = tpu.matmul %140, %141, %cst_68 {dimension_numbers = #tpu.dot_dimension_numbers<[1], [0], [0], [1], [0, 0, 1, 1], [], []>, precision = #tpu.contract_precision<fp32>} : vector<2x32xf32>, vector<32x96xf32>, vector<2x96xf32> -> vector<2x96xf32>
    %146 = vector.broadcast %142 : vector<1x96xf32> to vector<2x96xf32>
    %147 = arith.addf %145, %146 : vector<2x96xf32>
    %cst_69 = arith.constant dense<0.000000e+00> : vector<2x96xf32>
    %148 = tpu.matmul %2, %143, %cst_69 {dimension_numbers = #tpu.dot_dimension_numbers<[1], [0], [0], [1], [0, 0, 1, 1], [], []>, precision = #tpu.contract_precision<fp32>} : vector<2x32xf32>, vector<32x96xf32>, vector<2x96xf32> -> vector<2x96xf32>
    %149 = vector.broadcast %144 : vector<1x96xf32> to vector<2x96xf32>
    %150 = arith.addf %148, %149 : vector<2x96xf32>
    %151 = vector.extract_strided_slice %147 {offsets = [0, 0], sizes = [2, 32], strides = [1, 1]} : vector<2x96xf32> to vector<2x32xf32>
    %152 = vector.extract_strided_slice %150 {offsets = [0, 0], sizes = [2, 32], strides = [1, 1]} : vector<2x96xf32> to vector<2x32xf32>
    %153 = arith.addf %151, %152 : vector<2x32xf32>
    %154 = arith.negf %153 : vector<2x32xf32>
    %155 = math.exp %154 : vector<2x32xf32>
    %cst_70 = arith.constant 1.000000e+00 : f32
    %156 = vector.broadcast %cst_70 : f32 to vector<2x32xf32>
    %157 = arith.addf %156, %155 : vector<2x32xf32>
    %158 = arith.divf %156, %157 : vector<2x32xf32>
    %159 = vector.extract_strided_slice %147 {offsets = [0, 32], sizes = [2, 32], strides = [1, 1]} : vector<2x96xf32> to vector<2x32xf32>
    %160 = vector.extract_strided_slice %150 {offsets = [0, 32], sizes = [2, 32], strides = [1, 1]} : vector<2x96xf32> to vector<2x32xf32>
    %161 = arith.addf %159, %160 : vector<2x32xf32>
    %162 = arith.negf %161 : vector<2x32xf32>
    %163 = math.exp %162 : vector<2x32xf32>
    %cst_71 = arith.constant 1.000000e+00 : f32
    %164 = vector.broadcast %cst_71 : f32 to vector<2x32xf32>
    %165 = arith.addf %164, %163 : vector<2x32xf32>
    %166 = arith.divf %164, %165 : vector<2x32xf32>
    %167 = vector.extract_strided_slice %147 {offsets = [0, 64], sizes = [2, 32], strides = [1, 1]} : vector<2x96xf32> to vector<2x32xf32>
    %168 = vector.extract_strided_slice %150 {offsets = [0, 64], sizes = [2, 32], strides = [1, 1]} : vector<2x96xf32> to vector<2x32xf32>
    %169 = arith.mulf %158, %168 : vector<2x32xf32>
    %170 = arith.addf %167, %169 : vector<2x32xf32>
    %171 = math.tanh %170 : vector<2x32xf32>
    %cst_72 = arith.constant 1.000000e+00 : f32
    %172 = vector.broadcast %cst_72 : f32 to vector<2x32xf32>
    %173 = arith.subf %172, %166 : vector<2x32xf32>
    %174 = arith.mulf %173, %171 : vector<2x32xf32>
    %175 = arith.mulf %166, %2 : vector<2x32xf32>
    %176 = arith.addf %174, %175 : vector<2x32xf32>
    %c504 = arith.constant 504 : index
    %c0_73 = arith.constant 0 : index
    %177 = vector.load %arg7[%c504, %c0_73] : memref<640x128xf32, #tpu.memory_space<vmem>>, vector<32x16xf32>
    %c536 = arith.constant 536 : index
    %c0_74 = arith.constant 0 : index
    %178 = vector.load %arg7[%c536, %c0_74] : memref<640x128xf32, #tpu.memory_space<vmem>>, vector<1x16xf32>
    %cst_75 = arith.constant dense<0.000000e+00> : vector<2x16xf32>
    %179 = tpu.matmul %176, %177, %cst_75 {dimension_numbers = #tpu.dot_dimension_numbers<[1], [0], [0], [1], [0, 0, 1, 1], [], []>, precision = #tpu.contract_precision<fp32>} : vector<2x32xf32>, vector<32x16xf32>, vector<2x16xf32> -> vector<2x16xf32>
    %180 = vector.broadcast %178 : vector<1x16xf32> to vector<2x16xf32>
    %181 = arith.addf %179, %180 : vector<2x16xf32>
    %182 = vector.extract_strided_slice %181 {offsets = [0, 0], sizes = [2, 8], strides = [1, 1]} : vector<2x16xf32> to vector<2x8xf32>
    %183 = vector.extract_strided_slice %181 {offsets = [0, 8], sizes = [2, 8], strides = [1, 1]} : vector<2x16xf32> to vector<2x8xf32>
    %cst_76 = arith.constant 5.000000e-01 : f32
    %184 = vector.broadcast %cst_76 : f32 to vector<2x8xf32>
    %185 = arith.mulf %184, %183 : vector<2x8xf32>
    %186 = math.exp %185 : vector<2x8xf32>
    %cst_77 = arith.constant 0.0447213612 : f32
    %187 = vector.broadcast %cst_77 : f32 to vector<2x8xf32>
    %188 = arith.maximumf %186, %187 : vector<2x8xf32>
    %189 = arith.mulf %188, %6 : vector<2x8xf32>
    %190 = arith.addf %182, %189 : vector<2x8xf32>
    %c544 = arith.constant 544 : index
    %c0_78 = arith.constant 0 : index
    %191 = vector.load %arg7[%c544, %c0_78] : memref<640x128xf32, #tpu.memory_space<vmem>>, vector<8x32xf32>
    %c552 = arith.constant 552 : index
    %c0_79 = arith.constant 0 : index
    %192 = vector.load %arg7[%c552, %c0_79] : memref<640x128xf32, #tpu.memory_space<vmem>>, vector<1x32xf32>
    %cst_80 = arith.constant dense<0.000000e+00> : vector<2x32xf32>
    %193 = tpu.matmul %190, %191, %cst_80 {dimension_numbers = #tpu.dot_dimension_numbers<[1], [0], [0], [1], [0, 0, 1, 1], [], []>, precision = #tpu.contract_precision<fp32>} : vector<2x8xf32>, vector<8x32xf32>, vector<2x32xf32> -> vector<2x32xf32>
    %194 = vector.broadcast %192 : vector<1x32xf32> to vector<2x32xf32>
    %195 = arith.addf %193, %194 : vector<2x32xf32>
    %cst_81 = arith.constant 0.000000e+00 : f32
    %196 = vector.broadcast %cst_81 : f32 to vector<2x32xf32>
    %197 = arith.maximumf %195, %196 : vector<2x32xf32>
    %c560 = arith.constant 560 : index
    %c0_82 = arith.constant 0 : index
    %198 = vector.load %arg7[%c560, %c0_82] : memref<640x128xf32, #tpu.memory_space<vmem>>, vector<32x32xf32>
    %c592 = arith.constant 592 : index
    %c0_83 = arith.constant 0 : index
    %199 = vector.load %arg7[%c592, %c0_83] : memref<640x128xf32, #tpu.memory_space<vmem>>, vector<1x32xf32>
    %cst_84 = arith.constant dense<0.000000e+00> : vector<2x32xf32>
    %200 = tpu.matmul %197, %198, %cst_84 {dimension_numbers = #tpu.dot_dimension_numbers<[1], [0], [0], [1], [0, 0, 1, 1], [], []>, precision = #tpu.contract_precision<fp32>} : vector<2x32xf32>, vector<32x32xf32>, vector<2x32xf32> -> vector<2x32xf32>
    %201 = vector.broadcast %199 : vector<1x32xf32> to vector<2x32xf32>
    %202 = arith.addf %200, %201 : vector<2x32xf32>
    %cst_85 = arith.constant 0.000000e+00 : f32
    %203 = vector.broadcast %cst_85 : f32 to vector<2x32xf32>
    %204 = arith.maximumf %202, %203 : vector<2x32xf32>
    %c600 = arith.constant 600 : index
    %c0_86 = arith.constant 0 : index
    %205 = vector.load %arg7[%c600, %c0_86] : memref<640x128xf32, #tpu.memory_space<vmem>>, vector<32x24xf32>
    %c632 = arith.constant 632 : index
    %c0_87 = arith.constant 0 : index
    %206 = vector.load %arg7[%c632, %c0_87] : memref<640x128xf32, #tpu.memory_space<vmem>>, vector<1x24xf32>
    %cst_88 = arith.constant dense<0.000000e+00> : vector<2x24xf32>
    %207 = tpu.matmul %204, %205, %cst_88 {dimension_numbers = #tpu.dot_dimension_numbers<[1], [0], [0], [1], [0, 0, 1, 1], [], []>, precision = #tpu.contract_precision<fp32>} : vector<2x32xf32>, vector<32x24xf32>, vector<2x24xf32> -> vector<2x24xf32>
    %208 = vector.broadcast %206 : vector<1x24xf32> to vector<2x24xf32>
    %209 = arith.addf %207, %208 : vector<2x24xf32>
    %210 = math.exp %56 : vector<6x8xf32>
    %cst_89 = arith.constant 2.000000e-03 : f32
    %211 = vector.broadcast %cst_89 : f32 to vector<6x8xf32>
    %212 = arith.maximumf %210, %211 : vector<6x8xf32>
    %213 = math.exp %183 : vector<2x8xf32>
    %cst_90 = arith.constant 2.000000e-03 : f32
    %214 = vector.broadcast %cst_90 : f32 to vector<2x8xf32>
    %215 = arith.maximumf %213, %214 : vector<2x8xf32>
    %216 = tpu.iota {dimensions = array<i32: 0>} : vector<6x2xi32>
    %217 = tpu.iota {dimensions = array<i32: 1>} : vector<6x2xi32>
    %c3_i32 = arith.constant 3 : i32
    %218 = vector.broadcast %c3_i32 : i32 to vector<6x2xi32>
    %219 = arith.muli %217, %218 : vector<6x2xi32>
    %220 = arith.cmpi sge, %216, %219 : vector<6x2xi32>
    %c3_i32_91 = arith.constant 3 : i32
    %221 = vector.broadcast %c3_i32_91 : i32 to vector<6x2xi32>
    %222 = arith.addi %219, %221 : vector<6x2xi32>
    %223 = arith.cmpi slt, %216, %222 : vector<6x2xi32>
    %224 = arith.andi %220, %223 : vector<6x2xi1>
    %225 = arith.extui %224 : vector<6x2xi1> to vector<6x2xi32>
    %226 = arith.sitofp %225 : vector<6x2xi32> to vector<6x2xf32>
    %cst_92 = arith.constant dense<0.000000e+00> : vector<6x8xf32>
    %227 = tpu.matmul %226, %182, %cst_92 {dimension_numbers = #tpu.dot_dimension_numbers<[1], [0], [0], [1], [0, 0, 1, 1], [], []>, precision = #tpu.contract_precision<fp32>} : vector<6x2xf32>, vector<2x8xf32>, vector<6x8xf32> -> vector<6x8xf32>
    %cst_93 = arith.constant dense<0.000000e+00> : vector<6x8xf32>
    %228 = tpu.matmul %226, %215, %cst_93 {dimension_numbers = #tpu.dot_dimension_numbers<[1], [0], [0], [1], [0, 0, 1, 1], [], []>, precision = #tpu.contract_precision<fp32>} : vector<6x2xf32>, vector<2x8xf32>, vector<6x8xf32> -> vector<6x8xf32>
    %229 = arith.divf %228, %212 : vector<6x8xf32>
    %230 = math.log %229 : vector<6x8xf32>
    %cst_94 = arith.constant 5.000000e-01 : f32
    %231 = vector.broadcast %cst_94 : f32 to vector<6x8xf32>
    %232 = arith.mulf %231, %230 : vector<6x8xf32>
    %233 = arith.subf %55, %227 : vector<6x8xf32>
    %234 = arith.mulf %233, %233 : vector<6x8xf32>
    %235 = arith.addf %212, %234 : vector<6x8xf32>
    %cst_95 = arith.constant 2.000000e+00 : f32
    %236 = vector.broadcast %cst_95 : f32 to vector<6x8xf32>
    %237 = arith.mulf %236, %228 : vector<6x8xf32>
    %238 = arith.divf %235, %237 : vector<6x8xf32>
    %239 = arith.addf %232, %238 : vector<6x8xf32>
    %cst_96 = arith.constant 5.000000e-01 : f32
    %240 = vector.broadcast %cst_96 : f32 to vector<6x8xf32>
    %241 = arith.subf %239, %240 : vector<6x8xf32>
    %242 = vector.shape_cast %241 : vector<6x8xf32> to vector<1x6x8xf32>
    %cst_97 = arith.constant dense<0.000000e+00> : vector<1xf32>
    %243 = vector.multi_reduction <add>, %242, %cst_97 [1, 2] : vector<1x6x8xf32> to vector<1xf32>
    %244 = vector.shape_cast %243 : vector<1xf32> to vector<1x1x1xf32>
    %245 = vector.extract %244[0, 0, 0] : f32 from vector<1x1x1xf32>
    %246 = vector.broadcast %245 : f32 to vector<1x1xf32>
    %cst_98 = arith.constant 5.000000e-01 : f32
    %247 = vector.broadcast %cst_98 : f32 to vector<1x1xf32>
    %248 = arith.mulf %246, %247 : vector<1x1xf32>
    %c0_99 = arith.constant 0 : index
    %c0_100 = arith.constant 0 : index
    %249 = vector.load %arg8[%c0_99, %c0_100] : memref<6x5xf32, #tpu.memory_space<vmem>>, vector<6x5xf32>
    tpu.vector_store %arg8[%c0_99, %c0_100], %133 {strides = array<i32>} : memref<6x5xf32, #tpu.memory_space<vmem>>, vector<6x5xf32>,
    %c0_101 = arith.constant 0 : index
    %c0_102 = arith.constant 0 : index
    %250 = vector.load %arg9[%c0_101, %c0_102] : memref<2x24xf32, #tpu.memory_space<vmem>>, vector<2x24xf32>
    tpu.vector_store %arg9[%c0_101, %c0_102], %209 {strides = array<i32>} : memref<2x24xf32, #tpu.memory_space<vmem>>, vector<2x24xf32>,
    %c0_103 = arith.constant 0 : index
    %c0_104 = arith.constant 0 : index
    %251 = vector.load %arg10[%c0_103, %c0_104] : memref<2x32xf32, #tpu.memory_space<vmem>>, vector<2x32xf32>
    tpu.vector_store %arg10[%c0_103, %c0_104], %176 {strides = array<i32>} : memref<2x32xf32, #tpu.memory_space<vmem>>, vector<2x32xf32>,
    %c0_105 = arith.constant 0 : index
    %c0_106 = arith.constant 0 : index
    %252 = vector.load %arg11[%c0_105, %c0_106] : memref<6x32xf32, #tpu.memory_space<vmem>>, vector<6x32xf32>
    tpu.vector_store %arg11[%c0_105, %c0_106], %49 {strides = array<i32>} : memref<6x32xf32, #tpu.memory_space<vmem>>, vector<6x32xf32>,
    %c0_107 = arith.constant 0 : index
    %c0_108 = arith.constant 0 : index
    %253 = vector.load %arg12[%c0_107, %c0_108] : memref<6x32xf32, #tpu.memory_space<vmem>>, vector<6x32xf32>
    tpu.vector_store %arg12[%c0_107, %c0_108], %128 {strides = array<i32>} : memref<6x32xf32, #tpu.memory_space<vmem>>, vector<6x32xf32>,
    %c0_109 = arith.constant 0 : index
    %c0_110 = arith.constant 0 : index
    %254 = vector.load %arg13[%c0_109, %c0_110] : memref<1x1xf32, #tpu.memory_space<vmem>>, vector<1x1xf32>
    tpu.vector_store %arg13[%c0_109, %c0_110], %248 {strides = array<i32>} : memref<1x1xf32, #tpu.memory_space<vmem>>, vector<1x1xf32>,
    return
  }
}

</mosaic_0001>

<bundles_post_ra>
// kernel: tpu_custom_call.1
= control target key start
LH: loop header
LB: loop body
LE: loop exit
PB: predicated region body
PF: predicated region fallthrough
CT: control target
= control target key end

     0   :  { %19 = vsyncpa [#allocation3], 0  ;;  %s14312_s0 = inlined_call_operand.hbm [shape: f32[6,16], index: 0, kind: input, shape index: {}]   ;;  %s14313_s1 = inlined_call_operand.vmem [shape: f32[2,24], index: 1, kind: input, shape index: {}]   ;;  %s14314_s2 = inlined_call_operand.hbm [shape: f32[2,32], index: 2, kind: input, shape index: {}]   ;;  %s14315_s3 = inlined_call_operand.vmem [shape: f32[6,32], index: 3, kind: input, shape index: {}]   ;;  %s14316_s4 = inlined_call_operand.hbm [shape: f32[6,32], index: 4, kind: input, shape index: {}]   ;;  %s14317_s5 = inlined_call_operand.vmem [shape: f32[6,8], index: 5, kind: input, shape index: {}]   ;;  %s14318_s6 = inlined_call_operand.vmem [shape: f32[2,8], index: 6, kind: input, shape index: {}]   ;;  %s14319_s7 = inlined_call_operand.hbm [shape: f32[640,128], index: 7, kind: input, shape index: {}]   ;;  %s14320_s8 = inlined_call_operand.hbm [shape: f32[6,5], index: 8, kind: output, shape index: {0}]   ;;  %s14321_s9 = inlined_call_operand.hbm [shape: f32[2,24], index: 9, kind: output, shape index: {1}]   ;;  %s14322_s10 = inlined_call_operand.hbm [shape: f32[2,32], index: 10, kind: output, shape index: {2}]   ;;  %s14323_s11 = inlined_call_operand.hbm [shape: f32[6,32], index: 11, kind: output, shape index: {3}]   ;;  %s14324_s12 = inlined_call_operand.hbm [shape: f32[6,32], index: 12, kind: output, shape index: {4}]   ;;  %s14325_s13 = inlined_call_operand.hbm [shape: f32[1,1], index: 13, kind: output, shape index: {5}]  }
   0x1   :  { %20 = vsyncpa [#allocation6], 0 }
   0x2   :  { %21 = vsyncpa [#allocation9], 0 }
   0x3   :  { %22 = vsyncpa [#allocation4], 0 }
   0x4   :  { %23 = vsyncpa [#allocation12], 0 }
   0x5   :  { %24 = vsyncpa [#allocation15], 0 }
   0x6   :  { %25 = vsyncpa [#allocation18], 0  ;;  %s13230_s25 = smov [#allocation5]   ;;  %s13231_s27 = smov [#allocation2]  }
   0x7   :  { %s44_s26 = sshll.u32 %s13230_s25, 4  ;;  %s32_s28 = sshll.u32 %s13231_s27, 4  ;;  %s45_s26 = int_to_ptr.vmem [resolvable:$true] %s44_s26  ;;  %s33_s28 = int_to_ptr.vmem [resolvable:$true] %s32_s28 }
   0x8   :  { %s12996_s14 = scalar_lea.hbm %s14314_s2, 32 }
   0x9   :  { %p12997_p0 = scmp.ne.s32.totalorder %s14314_s2, %s12996_s14  ;;  %p13000_p1 = scmp.lt.u32.totalorder %s12996_s14, %s14314_s2 }
   0xb   :  { %p13002_p2 = pnand %p13000_p1, %p12997_p0 }
   0xd   :  { %13005 = shalt.err (!%p13002_p2)
}
   0xe   :  { %s13006_s19 = scalar_lea.vmem %s45_s26, 32  ;;  %p13011_p4 = scmp.lt.s32.totalorder %s45_s26, %s45_s26 }
   0xf   :  { %p13007_p3 = scmp.ne.s32.totalorder %s45_s26, %s13006_s19  ;;  %p13012_p5 = scmp.lt.s32.totalorder %s13006_s19, %s13006_s19 }
  0x11   :  { %p13013_p6 = por %p13012_p5, %p13011_p4 }
  0x13   :  { %p13014_p7 = pnand %p13013_p6, %p13007_p3 }
  0x15   :  { %13017 = shalt.err (!%p13014_p7)
}
  0x16   :  { %47 = dma.hbm_to_vmem [thread:$0]  %s14314_s2, 32, %s45_s26, [#allocation6]  }
  0x17   :  { %s13018_s24 = scalar_lea.hbm %s14312_s0, 128 }
  0x18   :  { %p13019_p8 = scmp.ne.s32.totalorder %s14312_s0, %s13018_s24  ;;  %p13022_p9 = scmp.lt.u32.totalorder %s13018_s24, %s14312_s0 }
  0x1a   :  { %p13024_p10 = pnand %p13022_p9, %p13019_p8 }
  0x1c   :  { %13027 = shalt.err (!%p13024_p10)
}
  0x1d   :  { %s13028_s14 = scalar_lea.vmem %s33_s28, 128  ;;  %p13033_p12 = scmp.lt.s32.totalorder %s33_s28, %s33_s28 }
  0x1e   :  { %p13029_p11 = scmp.ne.s32.totalorder %s33_s28, %s13028_s14  ;;  %p13034_p13 = scmp.lt.s32.totalorder %s13028_s14, %s13028_s14 }
  0x20   :  { %p13035_p0 = por %p13034_p13, %p13033_p12 }
  0x22   :  { %p13036_p1 = pnand %p13035_p0, %p13029_p11 }
  0x24   :  { %13039 = shalt.err (!%p13036_p1)
}
  0x25   :  { %35 = dma.hbm_to_vmem [thread:$0]  %s14312_s0, 128, %s33_s28, [#allocation3]  }
  0x26   :  { %s13232_s15 = smov [#allocation7]   ;;  %s13233_s17 = smov [#allocation8]  }
  0x27   :  { %s56_s16 = sshll.u32 %s13232_s15, 4  ;;  %s69_s18 = sshll.u32 %s13233_s17, 4  ;;  %s57_s16 = int_to_ptr.vmem [resolvable:$true] %s56_s16  ;;  %s13343_s18 = int_to_ptr.vmem [resolvable:$true] %s69_s18 }
  0x28   :  { %s13040_s21 = scalar_lea.hbm %s14316_s4, 128 }
  0x29   :  { %p13041_p2 = scmp.ne.s32.totalorder %s14316_s4, %s13040_s21  ;;  %p13044_p3 = scmp.lt.u32.totalorder %s13040_s21, %s14316_s4 }
  0x2b   :  { %p13046_p4 = pnand %p13044_p3, %p13041_p2 }
  0x2d   :  { %13049 = shalt.err (!%p13046_p4)
}
  0x2e   :  { %s13050_s0 = scalar_lea.vmem %s57_s16, 128  ;;  %p13055_p6 = scmp.lt.s32.totalorder %s57_s16, %s57_s16 }
  0x2f   :  { %p13051_p5 = scmp.ne.s32.totalorder %s57_s16, %s13050_s0  ;;  %p13056_p7 = scmp.lt.s32.totalorder %s13050_s0, %s13050_s0 }
  0x31   :  { %p13057_p8 = por %p13056_p7, %p13055_p6 }
  0x33   :  { %p13058_p9 = pnand %p13057_p8, %p13051_p5 }
  0x35   :  { %13061 = shalt.err (!%p13058_p9)
}
  0x36   :  { %59 = dma.hbm_to_vmem [thread:$0]  %s14316_s4, 128, %s57_s16, [#allocation6]  }
  0x37   :  { %s13062_s14 = scalar_lea.hbm %s14319_s7, 10240 }
  0x38   :  { %p13063_p10 = scmp.ne.s32.totalorder %s14319_s7, %s13062_s14  ;;  %p13066_p11 = scmp.lt.u32.totalorder %s13062_s14, %s14319_s7 }
  0x3a   :  { %p13068_p12 = pnand %p13066_p11, %p13063_p10 }
  0x3c   :  { %13071 = shalt.err (!%p13068_p12)
}
  0x3d   :  { %s13072_s19 = scalar_lea.vmem %s13343_s18, 10240  ;;  %p13077_p0 = scmp.lt.s32.totalorder %s13343_s18, %s13343_s18 }
  0x3e   :  { %p13073_p13 = scmp.ne.s32.totalorder %s13343_s18, %s13072_s19  ;;  %p13078_p1 = scmp.lt.s32.totalorder %s13072_s19, %s13072_s19 }
  0x40   :  { %p13079_p2 = por %p13078_p1, %p13077_p0 }
  0x42   :  { %p13080_p3 = pnand %p13079_p2, %p13073_p13 }
  0x44   :  { %13083 = shalt.err (!%p13080_p3)
}
  0x45   :  { %s13234_s4 = smov 128   ;;  %s13235_s16 = smov 8  }
  0x46   :  { %75 = dma.hbm_to_vmem [thread:$0]  %s14319_s7, 10240, %s13343_s18, [#allocation9], %s13234_s4, %s13234_s4, %s13235_s16  }
  0x47   :  { %13216 = dma.done.wait [#allocation3], 128  }
  0x48   :  { %13217 = vsyncadd [#allocation3], 4294967168 }
  0x49   :  { %13218 = dma.done.wait [#allocation6], 160  }
  0x4a   :  { %13219 = vsyncadd [#allocation6], 4294967136 }
  0x4b   :  { %13220 = dma.done.wait [#allocation9], 10240  }
  0x4c   :  { %13221 = vsyncadd [#allocation9], 4294957056  ;;  %v13236_v0 = vmov 0.0|0.0   ;;  %vm13237_vm0 = vmmov 0   ;;  %v13238_v1 = vmov 0.0   ;;  %vm102_vm1 = vcmask 130048  }
  0x4d   :  { %12215 = vmatprep.subr.bf16.mxu0 %v13236_v0  ;;  %11073 = vmatprep.mubr.msk.f32.mxu0 %vm13237_vm0, %v13238_v1  ;;  %v95_v2 = vld [vmem:[#allocation8] sm:$0xff]  ;;  %v96_v3 = vld [vmem:[#allocation8 + $0x8] sm:$0xff]  ;;  %vm580_vm2 = vcmask 261120   ;;  %v573_v31 = vld [vmem:[#allocation8 + $0x50] sm:$0xff]  ;;  %s13240_s22 = smov 96   ;;  %s13241_s23 = smov 32  }
  0x4e   :  { %12233 = vmatprep.subr.bf16.mxu1 %v13236_v0  ;;  %11119 = vmatprep.mubr.msk.f32.mxu1 %vm13237_vm0, %v13238_v1  ;;  %v88_v4 = vld [vmem:[#allocation2] sm:$0x3f]  ;;  %v107_v5 = vand.u32 4294901760, %v95_v2  ;;  %v110_v6 = vand.u32 4294901760, %v96_v3  ;;  %v571_v25 = vld [vmem:[#allocation8 + $0x40] sm:$0xff]  ;;  %v574_v32 = vld [vmem:[#allocation8 + $0x58] sm:$0xff] }
  0x4f   :  { %v104_v7 = vsel %vm102_vm1, %v88_v4, 0  ;;  %v572_v26 = vld [vmem:[#allocation8 + $0x48] sm:$0xff]  ;;  %v1077_v28 = vand.u32 4294901760, %v571_v25  ;;  %v1083_v36 = vand.u32 4294901760, %v573_v31  ;;  %v1086_v37 = vand.u32 4294901760, %v574_v32  ;;  %s13244_s30 = smov [#allocation14]  }
  0x50   :  { %v13381_v8 = vand.u32 4294901760, %v104_v7  ;;  %v12216_v9 = vpack.c.bf16 %v110_v6, %v107_v5  ;;  %v185_v10 = vsub.f32 %v95_v2, %v107_v5  ;;  %v192_v11 = vsub.f32 %v96_v3, %v110_v6  ;;  %v13409_v27 = vld [vmem:[%s14315_s3] sm:$0x3f]  ;;  %v566_v2 = vld [vmem:[#allocation8 + $0x18] sm:$0xff]  ;;  %v567_v3 = vld [vmem:[#allocation8 + $0x20] sm:$0xff]  ;;  %s13239_s3 = smov 64  }
  0x51   :  { %v1080_v29 = vand.u32 4294901760, %v572_v26  ;;  %v1074_v30 = vsel %vm580_vm2, %v13409_v27, 0  ;;  %v1157_v34 = vsub.f32 %v571_v25, %v1077_v28  ;;  %v1171_v39 = vsub.f32 %v573_v31, %v1083_v36  ;;  %s10481_s14 = sshll.u32 %s13244_s30, 4  ;;  %s10482_s14 = int_to_ptr.vmem [resolvable:$true] %s10481_s14 }
  0x52   :  { %v13384_v12 = vsub.f32 %v104_v7, %v13381_v8  ;;  %12217 = vmatpush3.bf16.msra.mxu0 %v12216_v9  ;;  %v186_v13 = vand.u32 4294901760, %v185_v10  ;;  %v193_v14 = vand.u32 4294901760, %v192_v11  ;;  %v12222_v23 = vpack.c.bf16 %v192_v11, %v185_v10 }
  0x53   :  { %12218 = vmatprep.subr.bf16.mxu0 %v13236_v0  ;;  %v13417_v33 = vand.u32 4294901760, %v1074_v30  ;;  %v1164_v35 = vsub.f32 %v572_v26, %v1080_v29  ;;  %v1178_v40 = vsub.f32 %v574_v32, %v1086_v37  ;;  %v1158_v41 = vand.u32 4294901760, %v1157_v34 }
  0x54   :  { %v13387_v15 = vand.u32 4294901760, %v13384_v12  ;;  %v187_v16 = vsub.f32 %v185_v10, %v186_v13  ;;  %v194_v17 = vsub.f32 %v192_v11, %v193_v14  ;;  %v12228_v24 = vpack.c.bf16 %v193_v14, %v186_v13  ;;  %v568_v10 = vld [vmem:[#allocation8 + $0x28] sm:$0xff]  ;;  %v569_v11 = vld [vmem:[#allocation8 + $0x30] sm:$0xff] }
  0x55   :  { %v1146_v38 = vsub.f32 %v1074_v30, %v13417_v33  ;;  %v1165_v42 = vand.u32 4294901760, %v1164_v35  ;;  %v12270_v43 = vpack.c.bf16 %v1080_v29, %v1077_v28  ;;  %v1159_v45 = vsub.f32 %v1157_v34, %v1158_v41 }
  0x56   :  { %v176_v18 = vsub.f32 %v13384_v12, %v13387_v15  ;;  %v188_v19 = vand.u32 4294901760, %v187_v16  ;;  %v195_v20 = vand.u32 4294901760, %v194_v17  ;;  %v1172_v47 = vand.u32 4294901760, %v1171_v39 }
  0x57   :  { %v1147_v44 = vand.u32 4294901760, %v1146_v38  ;;  %v1166_v46 = vsub.f32 %v1164_v35, %v1165_v42  ;;  %v1179_v48 = vand.u32 4294901760, %v1178_v40  ;;  %v12273_v49 = vpack.c.bf16 %v1086_v37, %v1083_v36 }
  0x58   :  { %v13392_v21 = vand.u32 4294901760, %v176_v18  ;;  %v12219_v22 = vpack.c.bf16 %v195_v20, %v188_v19  ;;  %v1160_v51 = vand.u32 4294901760, %v1159_v45  ;;  %v1173_v53 = vsub.f32 %v1171_v39, %v1172_v47 }
  0x59   :  { %v1148_v50 = vsub.f32 %v1146_v38, %v1147_v44  ;;  %v1167_v52 = vand.u32 4294901760, %v1166_v46  ;;  %v1180_v54 = vsub.f32 %v1178_v40, %v1179_v48  ;;  %v12282_v60 = vpack.c.bf16 %v1164_v35, %v1157_v34 }
  0x5a   :  { %11074 = vmatmul.mubr.f32.vlgmr.msra.gmra.mrb[0].mxu0 %v13392_v21  ;;  %v1174_v57 = vand.u32 4294901760, %v1173_v53  ;;  %v12285_v61 = vpack.c.bf16 %v1178_v40, %v1171_v39  ;;  %v12294_v62 = vpack.c.bf16 %v1165_v42, %v1158_v41  ;;  %v12297_v63 = vpack.c.bf16 %v1179_v48, %v1172_v47  ;;  %v10530_v39 = vld [vmem:[#allocation8 + $0x10] ss:$0 sm:$0xff] }
  0x5b   :  { %12220 = vmatpush3.bf16.msra.mxu0 %v12219_v22  ;;  %11080 = vmatprep.mubr.msk.f32.mxu0 %vm13237_vm0, %v13238_v1  ;;  %v1149_v55 = vand.u32 4294901760, %v1148_v50  ;;  %v12276_v56 = vpack.c.bf16 %v1167_v52, %v1160_v51  ;;  %v1181_v58 = vand.u32 4294901760, %v1180_v54  ;;  %v585_v4 = vand.u32 4294901760, %v566_v2  ;;  %v10532_v50 = vld [vmem:[#allocation8 + $0x60] ss:$0 sm:$0xff] }
  0x5c   :  { %12221 = vmatprep.subr.bf16.mxu0 %v13236_v0  ;;  %v588_v5 = vand.u32 4294901760, %v567_v3  ;;  %v591_v13 = vand.u32 4294901760, %v568_v10  ;;  %v594_v14 = vand.u32 4294901760, %v569_v11  ;;  %v10531_v54 = vld [vmem:[#allocation8 + $0x38] ss:$0 sm:$0xff]  ;;  %vm10439_vm3 = vcmask 259072  }
  0x5d   :  { %v12279_v59 = vpack.c.bf16 %v1181_v58, %v1174_v57  ;;  %v665_v7 = vsub.f32 %v566_v2, %v585_v4  ;;  %vm2109_vm4 = vcmask 64512   ;;  %vm6003_vm5 = vcmask 195584  }
  0x5e   :  { %v13454_v6 = vpack.c.bf16 %v588_v5, %v585_v4  ;;  %v13458_v18 = vpack.c.bf16 %v594_v14, %v591_v13  ;;  %v679_v19 = vsub.f32 %v568_v10, %v591_v13  ;;  %v686_v20 = vsub.f32 %v569_v11, %v594_v14 }
  0x5f   :  { %v666_v16 = vand.u32 4294901760, %v665_v7  ;;  %vm10431_vm6 = vcmask 37888   ;;  %vm10436_vm7 = vcmask 254976   ;;  %vm9488_vm11 = vcmask 1041408  }
  0x60   :  { %12235 = vmatpush3.bf16.msra.mxu1 %v13454_v6  ;;  %v680_v25 = vand.u32 4294901760, %v679_v19  ;;  %v687_v26 = vand.u32 4294901760, %v686_v20  ;;  %v12249_v36 = vpack.c.bf16 %v686_v20, %v679_v19  ;;  %vm9484_vm12 = vcmask 15360  }
  0x61   :  { %12236 = vmatprep.subr.bf16.mxu1 %v13236_v0  ;;  %v667_v22 = vsub.f32 %v665_v7, %v666_v16  ;;  %vm10433_vm13 = vcmask 189440   ;;  %vm10418_vm14 = vcmask 62464  }
  0x62   :  { %11081 = vmatmul.mubr.f32.vlgmr.msra.gmra.mrb[0].mxu0 %v13381_v8  ;;  %v681_v29 = vsub.f32 %v679_v19, %v680_v25  ;;  %v688_v30 = vsub.f32 %v686_v20, %v687_v26 }
  0x63   :  { %12223 = vmatpush3.bf16.msra.mxu0 %v12222_v23  ;;  %11087 = vmatprep.mubr.msk.f32.mxu0 %vm13237_vm0, %v13238_v1 }
  0x64   :  { %12224 = vmatprep.subr.bf16.mxu0 %v13236_v0  ;;  %12238 = vmatpush3.bf16.msra.mxu1 %v13458_v18  ;;  %v682_v32 = vand.u32 4294901760, %v681_v29 }
  0x65   :  { %12239 = vmatprep.subr.bf16.mxu1 %v13236_v0 }
  0x6a   :  { %11088 = vmatmul.mubr.f32.vlgmr.msra.gmra.mrb[0].mxu0 %v13384_v12 }
  0x6b   :  { %12226 = vmatpush3.bf16.msra.mxu0 %v12216_v9  ;;  %11094 = vmatprep.mubr.msk.f32.mxu0 %vm13237_vm0, %v13238_v1 }
  0x6c   :  { %12227 = vmatprep.subr.bf16.mxu0 %v13236_v0 }
  0x72   :  { %11095 = vmatmul.mubr.f32.vlgmr.msra.gmra.mrb[0].mxu0 %v13387_v15 }
  0x73   :  { %12229 = vmatpush3.bf16.msra.mxu0 %v12228_v24  ;;  %11101 = vmatprep.mubr.msk.f32.mxu0 %vm13237_vm0, %v13238_v1  ;;  %v668_v24 = vand.u32 4294901760, %v667_v22 }
  0x74   :  { %12230 = vmatprep.subr.bf16.mxu0 %v13236_v0 }
  0x7a   :  { %11102 = vmatmul.mubr.f32.vlgmr.msra.gmra.mrb[0].mxu0 %v13381_v8 }
  0x7b   :  { %12232 = vmatpush3.bf16.msra.mxu0 %v12216_v9  ;;  %11108 = vmatprep.mubr.msk.f32.mxu0 %vm13237_vm0, %v13238_v1  ;;  %v672_v9 = vsub.f32 %v567_v3, %v588_v5 }
  0x7c   :  { %12269 = vmatprep.subr.bf16.mxu0 %v13236_v0 }
  0x7d   :  { %v673_v17 = vand.u32 4294901760, %v672_v9  ;;  %v12246_v35 = vpack.c.bf16 %v672_v9, %v665_v7  ;;  %v1591_v7 = vld [vmem:[#allocation8 + $0x70] sm:$0xff] }
  0x7e   :  { %v1608_v10 = vand.u32 4294901760, %v1591_v7 }
  0x7f   :  { %v674_v23 = vsub.f32 %v672_v9, %v673_v17  ;;  %v12258_v37 = vpack.c.bf16 %v673_v17, %v666_v16  ;;  %v1592_v16 = vld [vmem:[#allocation8 + $0x78] sm:$0xff]  ;;  %v1593_v17 = vld [vmem:[#allocation8 + $0x80] sm:$0xff] }
  0x80   :  { %v1692_v14 = vsub.f32 %v1591_v7, %v1608_v10  ;;  %v1611_v19 = vand.u32 4294901760, %v1592_v16  ;;  %v1614_v20 = vand.u32 4294901760, %v1593_v17 }
  0x81   :  { %v675_v28 = vand.u32 4294901760, %v674_v23 }
  0x82   :  { %11109 = vmatmul.mubr.f32.vlgmr.msra.gmra.mrb[0].mxu0 %v13381_v8  ;;  %v1693_v23 = vand.u32 4294901760, %v1692_v14 }
  0x83   :  { %12271 = vmatpush3.bf16.msra.mxu0 %v12270_v43  ;;  %11185 = vmatprep.mubr.msk.f32.mxu0 %vm13237_vm0, %v13238_v1  ;;  %v12240_v31 = vpack.c.bf16 %v675_v28, %v668_v24  ;;  %v1699_v24 = vsub.f32 %v1592_v16, %v1611_v19 }
  0x84   :  { %12272 = vmatprep.subr.bf16.mxu0 %v13236_v0  ;;  %v1694_v29 = vsub.f32 %v1692_v14, %v1693_v23 }
  0x87   :  { %12274 = vmatpush3.bf16.msra.mxu0 %v12273_v49 }
  0x88   :  { %12275 = vmatprep.subr.bf16.mxu0 %v13236_v0 }
  0x8a   :  { %11186 = vmatmul.mubr.f32.vlgmr.msra.gmra.mrb[2].mxu0 %v1149_v55 }
  0x8b   :  { %12277 = vmatpush3.bf16.msra.mxu0 %v12276_v56  ;;  %11196 = vmatprep.mubr.msk.f32.mxu0 %vm13237_vm0, %v13238_v1 }
  0x8c   :  { %12278 = vmatprep.subr.bf16.mxu0 %v13236_v0 }
  0x8f   :  { %12280 = vmatpush3.bf16.msra.mxu0 %v12279_v59 }
  0x90   :  { %12281 = vmatprep.subr.bf16.mxu0 %v13236_v0 }
  0x92   :  { %11197 = vmatmul.mubr.f32.vlgmr.msra.gmra.mrb[2].mxu0 %v13417_v33 }
  0x93   :  { %12283 = vmatpush3.bf16.msra.mxu0 %v12282_v60  ;;  %11207 = vmatprep.mubr.msk.f32.mxu0 %vm13237_vm0, %v13238_v1 }
  0x94   :  { %12284 = vmatprep.subr.bf16.mxu0 %v13236_v0 }
  0x97   :  { %12286 = vmatpush3.bf16.msra.mxu0 %v12285_v61 }
  0x98   :  { %12287 = vmatprep.subr.bf16.mxu0 %v13236_v0 }
  0x9a   :  { %11208 = vmatmul.mubr.f32.vlgmr.msra.gmra.mrb[2].mxu0 %v1146_v38  ;;  %v12261_v38 = vpack.c.bf16 %v687_v26, %v680_v25  ;;  %v1706_v25 = vsub.f32 %v1593_v17, %v1614_v20 }
  0x9b   :  { %12289 = vmatpush3.bf16.msra.mxu0 %v12270_v43  ;;  %11218 = vmatprep.mubr.msk.f32.mxu0 %vm13237_vm0, %v13238_v1 }
  0x9c   :  { %12290 = vmatprep.subr.bf16.mxu0 %v13236_v0 }
  0x9f   :  { %12292 = vmatpush3.bf16.msra.mxu0 %v12273_v49 }
  0xa0   :  { %12293 = vmatprep.subr.bf16.mxu0 %v13236_v0 }
  0xa2   :  { %11219 = vmatmul.mubr.f32.vlgmr.msra.gmra.mrb[2].mxu0 %v1147_v44 }
  0xa3   :  { %12295 = vmatpush3.bf16.msra.mxu0 %v12294_v62  ;;  %11229 = vmatprep.mubr.msk.f32.mxu0 %vm13237_vm0, %v13238_v1 }
  0xa4   :  { %12296 = vmatprep.subr.bf16.mxu0 %v13236_v0 }
  0xa7   :  { %12298 = vmatpush3.bf16.msra.mxu0 %v12297_v63 }
  0xa8   :  { %12299 = vmatprep.subr.bf16.mxu0 %v13236_v0 }
  0xaa   :  { %11230 = vmatmul.mubr.f32.vlgmr.msra.gmra.mrb[2].mxu0 %v13417_v33 }
  0xab   :  { %12301 = vmatpush3.bf16.msra.mxu0 %v12270_v43  ;;  %11240 = vmatprep.mubr.msk.f32.mxu0 %vm13237_vm0, %v13238_v1 }
  0xac   :  { %12302 = vmatprep.subr.bf16.mxu0 %v13236_v0 }
  0xaf   :  { %12304 = vmatpush3.bf16.msra.mxu0 %v12273_v49 }
  0xb0   :  { %11309 = vmatprep.subr.mxu0 %v13238_v1 }
  0xb2   :  { %11241 = vmatmul.mubr.f32.vlgmr.msra.gmra.mrb[2].mxu0 %v13417_v33  ;;  %v689_v33 = vand.u32 4294901760, %v688_v30 }
  0xb3   :  { %11311 = vmatprep.mubr.msk.f32.mxu0 %vm13237_vm0, %v13238_v1 }
  0xb4   :  { %v12243_v34 = vpack.c.bf16 %v689_v33, %v682_v32  ;;  %v1700_v32 = vand.u32 4294901760, %v1699_v24  ;;  %v1707_v33 = vand.u32 4294901760, %v1706_v25 }
 0x155   :  { %v561_v40 = vpop.f32.mrb[0].mxu0 }
 0x156   :  { %v12737_v41 = vadd.f32 %v10530_v39, %v561_v40  ;;  %v11110_v42 = vpop.f32.mrb[1].mxu0 }
 0x158   :  { %v565_v43 = vmax.f32 %v12737_v41, 0.0 }
 0x15a   :  { %v582_v44 = vsel %vm580_vm2, %v565_v43, 0 }
 0x15b   :  { %v653_v45 = vand.u32 4294901760, %v582_v44 }
 0x15d   :  { %v654_v46 = vsub.f32 %v582_v44, %v653_v45 }
 0x15f   :  { %v655_v47 = vand.u32 4294901760, %v654_v46 }
 0x161   :  { %v656_v48 = vsub.f32 %v654_v46, %v655_v47 }
 0x163   :  { %v657_v49 = vand.u32 4294901760, %v656_v48  ;;  %v93_v48 = vld [vmem:[%s14317_s5] sm:$0x3f]  ;;  %s13242_s5 = smov 120  }
 0x165   :  { %11120 = vmatmul.mubr.f32.vlgmr.msra.gmra.mrb[0].mxu1 %v657_v49 }
 0x166   :  { %12241 = vmatpush3.bf16.msra.mxu1 %v12240_v31  ;;  %11130 = vmatprep.mubr.msk.f32.mxu1 %vm13237_vm0, %v13238_v1 }
 0x167   :  { %12242 = vmatprep.subr.bf16.mxu1 %v13236_v0 }
 0x16a   :  { %12244 = vmatpush3.bf16.msra.mxu1 %v12243_v34 }
 0x16b   :  { %12245 = vmatprep.subr.bf16.mxu1 %v13236_v0 }
 0x16d   :  { %11131 = vmatmul.mubr.f32.vlgmr.msra.gmra.mrb[0].mxu1 %v653_v45 }
 0x16e   :  { %12247 = vmatpush3.bf16.msra.mxu1 %v12246_v35  ;;  %11141 = vmatprep.mubr.msk.f32.mxu1 %vm13237_vm0, %v13238_v1 }
 0x16f   :  { %12248 = vmatprep.subr.bf16.mxu1 %v13236_v0 }
 0x172   :  { %12250 = vmatpush3.bf16.msra.mxu1 %v12249_v36  ;;  %v1695_v36 = vand.u32 4294901760, %v1694_v29  ;;  %v2562_v29 = vld [vmem:[#allocation8 + $0xb0] sm:$0xff] }
 0x173   :  { %12251 = vmatprep.subr.bf16.mxu1 %v13236_v0 }
 0x175   :  { %11142 = vmatmul.mubr.f32.vlgmr.msra.gmra.mrb[0].mxu1 %v654_v46 }
 0x176   :  { %12253 = vmatpush3.bf16.msra.mxu1 %v13454_v6  ;;  %11152 = vmatprep.mubr.msk.f32.mxu1 %vm13237_vm0, %v13238_v1 }
 0x177   :  { %12254 = vmatprep.subr.bf16.mxu1 %v13236_v0 }
 0x17a   :  { %12256 = vmatpush3.bf16.msra.mxu1 %v13458_v18 }
 0x17b   :  { %12257 = vmatprep.subr.bf16.mxu1 %v13236_v0 }
 0x17d   :  { %11153 = vmatmul.mubr.f32.vlgmr.msra.gmra.mrb[0].mxu1 %v655_v47  ;;  %v12333_v47 = vpack.c.bf16 %v1707_v33, %v1700_v32 }
 0x17e   :  { %12259 = vmatpush3.bf16.msra.mxu1 %v12258_v37  ;;  %11163 = vmatprep.mubr.msk.f32.mxu1 %vm13237_vm0, %v13238_v1  ;;  %v1701_v37 = vsub.f32 %v1699_v24, %v1700_v32 }
 0x17f   :  { %12260 = vmatprep.subr.bf16.mxu1 %v13236_v0 }
 0x180   :  { %v1702_v41 = vand.u32 4294901760, %v1701_v37 }
 0x182   :  { %12262 = vmatpush3.bf16.msra.mxu1 %v12261_v38  ;;  %v1708_v38 = vsub.f32 %v1706_v25, %v1707_v33 }
 0x183   :  { %12263 = vmatprep.subr.bf16.mxu1 %v13236_v0 }
 0x184   :  { %v1709_v42 = vand.u32 4294901760, %v1708_v38 }
 0x185   :  { %11164 = vmatmul.mubr.f32.vlgmr.msra.gmra.mrb[0].mxu1 %v653_v45  ;;  %v1557_v51 = vpop.f32.mrb[2].mxu0 }
 0x186   :  { %12265 = vmatpush3.bf16.msra.mxu1 %v13454_v6  ;;  %11174 = vmatprep.mubr.msk.f32.mxu1 %vm13237_vm0, %v13238_v1  ;;  %v12739_v52 = vadd.f32 %v10532_v50, %v1557_v51  ;;  %v11242_v53 = vpop.f32.mrb[3].mxu0  ;;  %v1590_v6 = vld [vmem:[#allocation8 + $0x68] sm:$0xff]  ;;  %v12315_v43 = vpack.c.bf16 %v1709_v42, %v1702_v41 }
 0x187   :  { %12266 = vmatprep.subr.bf16.mxu1 %v13236_v0  ;;  %v1605_v9 = vand.u32 4294901760, %v1590_v6 }
 0x188   :  { %1569 = vrot.lane.b32.xlu0 %v12739_v52, %s13239_s3 }
 0x189   :  { %v13494_v11 = vpack.c.bf16 %v1608_v10, %v1605_v9  ;;  %v1685_v13 = vsub.f32 %v1590_v6, %v1605_v9 }
 0x18a   :  { %12268 = vmatpush3.bf16.msra.mxu1 %v13458_v18 }
 0x18b   :  { %12305 = vmatprep.subr.bf16.mxu1 %v13236_v0  ;;  %v1686_v22 = vand.u32 4294901760, %v1685_v13  ;;  %v12318_v44 = vpack.c.bf16 %v1692_v14, %v1685_v13 }
 0x18d   :  { %11175 = vmatmul.mubr.f32.vlgmr.msra.gmra.mrb[0].mxu1 %v653_v45  ;;  %v1687_v26 = vsub.f32 %v1685_v13, %v1686_v22  ;;  %v12321_v45 = vpack.c.bf16 %v1706_v25, %v1699_v24  ;;  %v12330_v46 = vpack.c.bf16 %v1693_v23, %v1686_v22  ;;  %v2560_v22 = vld [vmem:[#allocation8 + $0xa0] sm:$0xff]  ;;  %v2561_v23 = vld [vmem:[#allocation8 + $0xa8] sm:$0xff] }
 0x18e   :  { %11251 = vmatprep.mubr.msk.f32.mxu1 %vm13237_vm0, %v13238_v1  ;;  %12307 = vmatpush3.bf16.msra.mxu1 %v13494_v11  ;;  %v2576_v24 = vand.u32 4294901760, %v2561_v23 }
 0x18f   :  { %12308 = vmatprep.subr.bf16.mxu1 %v13236_v0  ;;  %v1688_v31 = vand.u32 4294901760, %v1687_v26 }
 0x191   :  { %v12312_v40 = vpack.c.bf16 %v1695_v36, %v1688_v31  ;;  %v2579_v31 = vand.u32 4294901760, %v2562_v29 }
 0x193   :  { %v2667_v36 = vsub.f32 %v2562_v29, %v2579_v31 }
 0x195   :  { %v2668_v41 = vand.u32 4294901760, %v2667_v36 }
 0x1fa   :  { %v1570_v63 = vpop.permute.xlu0 %1569 }
 0x260   :  { %v1065_v55 = vpop.f32.mrb[0].mxu1 }
 0x261   :  { %v12738_v56 = vadd.f32 %v10531_v54, %v1065_v55  ;;  %v11176_v57 = vpop.f32.mrb[1].mxu1 }
 0x263   :  { %v1561_v58 = vadd.f32 %v12739_v52, %v12738_v56 }
 0x265   :  { %v10533_v59 = vmul.f32 -1.442695, %v1561_v58 }
 0x267   :  { %12964 = vpow2.f32 %v10533_v59 }
 0x271   :  { %v12965_v60 = vpop.eup %12964 }
 0x272   :  { %v1565_v61 = vadd.f32 1.0, %v12965_v60 }
 0x274   :  { %12966 = vrcp.f32 %v1565_v61 }
 0x27e   :  { %v12967_v62 = vpop.eup %12966 }
 0x27f   :  { %v1572_v2 = vmul.f32 %v12967_v62, %v1570_v63  ;;  %v1579_v28 = vsub.f32 1.0, %v12967_v62 }
 0x281   :  { %1574 = vrot.lane.b32.xlu0 %v1572_v2, %s13239_s3 }
 0x2f3   :  { %v1575_v3 = vpop.permute.xlu0 %1574 }
 0x2f4   :  { %v1577_v4 = vadd.f32 %v12738_v56, %v1575_v3  ;;  %v10534_v56 = vld [vmem:[#allocation8 + $0x88] ss:$0 sm:$0xff] }
 0x2f6   :  { %12968 = vtanh.f32 %v1577_v4 }
 0x300   :  { %v12969_v5 = vpop.eup %12968 }
 0x301   :  { %1581 = vrot.lane.b32.xlu1 %v12969_v5, %s13240_s22 }
 0x305   :  { %1585 = vrot.lane.b32.xlu1 %v13409_v27, %s13241_s23  ;;  %v13498_v27 = vpack.c.bf16 %v1614_v20, %v1611_v19 }
 0x307   :  { %12310 = vmatpush3.bf16.msra.mxu1 %v13498_v27 }
 0x308   :  { %12311 = vmatprep.subr.bf16.mxu1 %v13236_v0 }
 0x309   :  { %2094 = vrot.lane.b32.xlu1 %v93_v48, %s13235_s16 }
 0x373   :  { %v1582_v18 = vpop.permute.xlu1 %1581 }
 0x374   :  { %v1584_v34 = vmul.f32 %v1582_v18, %v1579_v28  ;;  %v2660_v28 = vsub.f32 %v2561_v23, %v2576_v24 }
 0x377   :  { %v1586_v30 = vpop.permute.xlu1 %1585 }
 0x378   :  { %v1588_v35 = vmul.f32 %v12967_v62, %v1586_v30  ;;  %v2103_v62 = vld [vmem:[#allocation8 + $0x90] sm:$0xff]  ;;  %v2563_v30 = vld [vmem:[#allocation8 + $0xb8] sm:$0xff] }
 0x379   :  { %v2114_v3 = vand.u32 4294901760, %v2103_v62  ;;  %v2582_v32 = vand.u32 4294901760, %v2563_v30 }
 0x37a   :  { %v1589_v39 = vadd.f32 %v1588_v35, %v1584_v34  ;;  %v2661_v34 = vand.u32 4294901760, %v2660_v28 }
 0x37b   :  { %v2095_v2 = vpop.permute.xlu1 %2094  ;;  %11310 = vmatpush3.msra.mxu0 %v2114_v3  ;;  %v2191_v6 = vsub.f32 %v2103_v62, %v2114_v3  ;;  %v12345_v35 = vpack.c.bf16 %v2582_v32, %v2579_v31  ;;  %v2674_v37 = vsub.f32 %v2563_v30, %v2582_v32 }
 0x37c   :  { %1600 = vrot.lane.b32.xlu0 %v1589_v39, %s13240_s22  ;;  %11314 = vmatprep.subr.mxu0 %v13238_v1  ;;  %v2662_v39 = vsub.f32 %v2660_v28, %v2661_v34 }
 0x37d   :  { %v2675_v42 = vand.u32 4294901760, %v2674_v37 }
 0x3ee   :  { %v1601_v49 = vpop.permute.xlu0 %1600 }
 0x3ef   :  { %v1602_v50 = vsel %vm580_vm2, %v1601_v49, 0  ;;  %10440 = vst.msk [vmem:[#allocation14] sm:$0x3f] %vm10439_vm3, %v1601_v49 }
 0x3f0   :  { %v1673_v51 = vand.u32 4294901760, %v1602_v50 }
 0x3f2   :  { %v1674_v52 = vsub.f32 %v1602_v50, %v1673_v51 }
 0x3f4   :  { %v1675_v53 = vand.u32 4294901760, %v1674_v52 }
 0x3f6   :  { %v1676_v54 = vsub.f32 %v1674_v52, %v1675_v53 }
 0x3f8   :  { %v1677_v55 = vand.u32 4294901760, %v1676_v54  ;;  %v10535_v54 = vld [vmem:[#allocation8 + $0x98] ss:$0 sm:$0xff] }
 0x3fa   :  { %11252 = vmatmul.mubr.f32.vlgmr.msra.gmra.mrb[2].mxu1 %v1677_v55 }
 0x3fb   :  { %12313 = vmatpush3.bf16.msra.mxu1 %v12312_v40  ;;  %11262 = vmatprep.mubr.msk.f32.mxu1 %vm13237_vm0, %v13238_v1 }
 0x3fc   :  { %12314 = vmatprep.subr.bf16.mxu1 %v13236_v0 }
 0x3ff   :  { %12316 = vmatpush3.bf16.msra.mxu1 %v12315_v43  ;;  %v2663_v43 = vand.u32 4294901760, %v2662_v39 }
 0x400   :  { %12317 = vmatprep.subr.bf16.mxu1 %v13236_v0 }
 0x402   :  { %11263 = vmatmul.mubr.f32.vlgmr.msra.gmra.mrb[2].mxu1 %v1673_v51 }
 0x403   :  { %12319 = vmatpush3.bf16.msra.mxu1 %v12318_v44  ;;  %11273 = vmatprep.mubr.msk.f32.mxu1 %vm13237_vm0, %v13238_v1  ;;  %v2669_v44 = vsub.f32 %v2667_v36, %v2668_v41 }
 0x404   :  { %12320 = vmatprep.subr.bf16.mxu1 %v13236_v0 }
 0x407   :  { %12322 = vmatpush3.bf16.msra.mxu1 %v12321_v45  ;;  %v2676_v45 = vsub.f32 %v2674_v37, %v2675_v42 }
 0x408   :  { %12323 = vmatprep.subr.bf16.mxu1 %v13236_v0 }
 0x409   :  { %v2677_v48 = vand.u32 4294901760, %v2676_v45 }
 0x40a   :  { %11274 = vmatmul.mubr.f32.vlgmr.msra.gmra.mrb[2].mxu1 %v1674_v52 }
 0x40b   :  { %12325 = vmatpush3.bf16.msra.mxu1 %v13494_v11  ;;  %11284 = vmatprep.mubr.msk.f32.mxu1 %vm13237_vm0, %v13238_v1 }
 0x40c   :  { %12326 = vmatprep.subr.bf16.mxu1 %v13236_v0 }
 0x40f   :  { %12328 = vmatpush3.bf16.msra.mxu1 %v13498_v27 }
 0x410   :  { %12329 = vmatprep.subr.bf16.mxu1 %v13236_v0 }
 0x412   :  { %11285 = vmatmul.mubr.f32.vlgmr.msra.gmra.mrb[2].mxu1 %v1675_v53  ;;  %v12369_v53 = vpack.c.bf16 %v2675_v42, %v2668_v41 }
 0x413   :  { %12331 = vmatpush3.bf16.msra.mxu1 %v12330_v46  ;;  %11295 = vmatprep.mubr.msk.f32.mxu1 %vm13237_vm0, %v13238_v1 }
 0x414   :  { %12332 = vmatprep.subr.bf16.mxu1 %v13236_v0 }
 0x417   :  { %12334 = vmatpush3.bf16.msra.mxu1 %v12333_v47  ;;  %v2670_v47 = vand.u32 4294901760, %v2669_v44 }
 0x418   :  { %12335 = vmatprep.subr.bf16.mxu1 %v13236_v0 }
 0x419   :  { %v12351_v49 = vpack.c.bf16 %v2677_v48, %v2670_v47 }
 0x41a   :  { %11296 = vmatmul.mubr.f32.vlgmr.msra.gmra.mrb[2].mxu1 %v1673_v51 }
 0x41b   :  { %12337 = vmatpush3.bf16.msra.mxu1 %v13494_v11  ;;  %11306 = vmatprep.mubr.msk.f32.mxu1 %vm13237_vm0, %v13238_v1  ;;  %v2192_v11 = vand.u32 4294901760, %v2191_v6 }
 0x41c   :  { %12338 = vmatprep.subr.bf16.mxu1 %v13236_v0 }
 0x41d   :  { %v2193_v16 = vsub.f32 %v2191_v6, %v2192_v11 }
 0x41f   :  { %12340 = vmatpush3.bf16.msra.mxu1 %v13498_v27  ;;  %v2194_v19 = vand.u32 4294901760, %v2193_v16  ;;  %v2573_v27 = vand.u32 4294901760, %v2560_v22 }
 0x420   :  { %12377 = vmatprep.subr.bf16.mxu1 %v13236_v0 }
 0x421   :  { %v13559_v25 = vpack.c.bf16 %v2576_v24, %v2573_v27  ;;  %v2653_v26 = vsub.f32 %v2560_v22, %v2573_v27 }
 0x422   :  { %11307 = vmatmul.mubr.f32.vlgmr.msra.gmra.mrb[2].mxu1 %v1673_v51  ;;  %v12357_v51 = vpack.c.bf16 %v2674_v37, %v2667_v36 }
 0x423   :  { %11413 = vmatprep.mubr.msk.f32.mxu1 %vm13237_vm0, %v13238_v1  ;;  %v2654_v33 = vand.u32 4294901760, %v2653_v26  ;;  %v12354_v50 = vpack.c.bf16 %v2660_v28, %v2653_v26 }
 0x425   :  { %v2655_v38 = vsub.f32 %v2653_v26, %v2654_v33  ;;  %v12366_v52 = vpack.c.bf16 %v2661_v34, %v2654_v33 }
 0x427   :  { %v2656_v40 = vand.u32 4294901760, %v2655_v38 }
 0x429   :  { %v12348_v46 = vpack.c.bf16 %v2663_v43, %v2656_v40  ;;  %v10536_v40 = vld [vmem:[#allocation8 + $0xc0] ss:$0 sm:$0xff] }
 0x4f5   :  { %v2085_v57 = vpop.f32.mrb[2].mxu1 }
 0x4f6   :  { %v13535_v58 = vadd.f32 %v10534_v56, %v2085_v57  ;;  %v11308_v59 = vpop.f32.mrb[3].mxu1 }
 0x4f8   :  { %v2089_v60 = vmul.f32 0.5, %v13535_v58 }
 0x4fa   :  { %v2090_v61 = vmul.f32 1.442695, %v2089_v60 }
 0x4fc   :  { %12970 = vpow2.f32 %v2090_v61 }
 0x506   :  { %v12971_v63 = vpop.eup %12970 }
 0x507   :  { %v2092_v4 = vmax.f32 %v12971_v63, 0.04472136 }
 0x509   :  { %v2097_v5 = vmul.f32 %v2095_v2, %v2092_v4  ;;  %v3058_v4 = vld [vmem:[#allocation8 + $0xc8] sm:$0xff] }
 0x50b   :  { %2099 = vrot.lane.b32.xlu0 %v2097_v5, %s13242_s5  ;;  %v3059_v5 = vld [vmem:[#allocation8 + $0xd0] sm:$0xff] }
 0x57d   :  { %v2100_v7 = vpop.permute.xlu0 %2099 }
 0x57e   :  { %v2102_v9 = vadd.f32 %v13535_v58, %v2100_v7  ;;  %v3074_v7 = vand.u32 4294901760, %v3059_v5 }
 0x580   :  { %v2111_v10 = vsel %vm2109_vm4, %v2102_v9, 0 }
 0x581   :  { %v2179_v13 = vand.u32 4294901760, %v2111_v10 }
 0x583   :  { %v2180_v14 = vsub.f32 %v2111_v10, %v2179_v13 }
 0x585   :  { %v2181_v17 = vand.u32 4294901760, %v2180_v14 }
 0x587   :  { %v2182_v18 = vsub.f32 %v2180_v14, %v2181_v17 }
 0x589   :  { %v2183_v20 = vand.u32 4294901760, %v2182_v18 }
 0x58b   :  { %11312 = vmatmul.mubr.f32.vlgmr.msra.gmra.mrb[4].mxu0 %v2183_v20 }
 0x58c   :  { %11315 = vmatpush3.msra.mxu0 %v2194_v19  ;;  %11316 = vmatprep.mubr.msk.f32.mxu0 %vm13237_vm0, %v13238_v1 }
 0x58d   :  { %11319 = vmatprep.subr.mxu0 %v13238_v1 }
 0x593   :  { %11317 = vmatmul.mubr.f32.vlgmr.msra.gmra.mrb[4].mxu0 %v2179_v13 }
 0x594   :  { %11320 = vmatpush3.msra.mxu0 %v2191_v6  ;;  %11321 = vmatprep.mubr.msk.f32.mxu0 %vm13237_vm0, %v13238_v1  ;;  %v3071_v6 = vand.u32 4294901760, %v3058_v4 }
 0x595   :  { %11324 = vmatprep.subr.mxu0 %v13238_v1 }
 0x596   :  { %v13589_v9 = vpack.c.bf16 %v3074_v7, %v3071_v6  ;;  %v3151_v10 = vsub.f32 %v3058_v4, %v3071_v6 }
 0x598   :  { %12379 = vmatpush3.bf16.msra.mxu1 %v13589_v9  ;;  %v3152_v18 = vand.u32 4294901760, %v3151_v10 }
 0x599   :  { %12380 = vmatprep.subr.bf16.mxu1 %v13236_v0 }
 0x59a   :  { %v3153_v27 = vsub.f32 %v3151_v10, %v3152_v18 }
 0x59b   :  { %11322 = vmatmul.mubr.f32.vlgmr.msra.gmra.mrb[4].mxu0 %v2180_v14  ;;  %v3061_v14 = vld [vmem:[#allocation8 + $0xe0] sm:$0xff] }
 0x59c   :  { %11325 = vmatpush3.msra.mxu0 %v2114_v3  ;;  %11326 = vmatprep.mubr.msk.f32.mxu0 %vm13237_vm0, %v13238_v1 }
 0x59d   :  { %11329 = vmatprep.subr.mxu0 %v13238_v1 }
 0x5a3   :  { %11327 = vmatmul.mubr.f32.vlgmr.msra.gmra.mrb[4].mxu0 %v2181_v17  ;;  %v3080_v17 = vand.u32 4294901760, %v3061_v14 }
 0x5a4   :  { %11330 = vmatpush3.msra.mxu0 %v2192_v11  ;;  %11331 = vmatprep.mubr.msk.f32.mxu0 %vm13237_vm0, %v13238_v1  ;;  %v3158_v11 = vsub.f32 %v3059_v5, %v3074_v7 }
 0x5a5   :  { %11334 = vmatprep.subr.mxu0 %v13238_v1  ;;  %v3172_v23 = vsub.f32 %v3061_v14, %v3080_v17 }
 0x5a6   :  { %v3159_v19 = vand.u32 4294901760, %v3158_v11  ;;  %v12390_v36 = vpack.c.bf16 %v3158_v11, %v3151_v10 }
 0x5a7   :  { %v3173_v28 = vand.u32 4294901760, %v3172_v23 }
 0x5a8   :  { %v3160_v24 = vsub.f32 %v3158_v11, %v3159_v19  ;;  %v12402_v38 = vpack.c.bf16 %v3159_v19, %v3152_v18 }
 0x5a9   :  { %v3174_v31 = vsub.f32 %v3172_v23, %v3173_v28 }
 0x5aa   :  { %v3161_v29 = vand.u32 4294901760, %v3160_v24 }
 0x5ab   :  { %11332 = vmatmul.mubr.f32.vlgmr.msra.gmra.mrb[4].mxu0 %v2179_v13  ;;  %v3175_v34 = vand.u32 4294901760, %v3174_v31 }
 0x5ac   :  { %11335 = vmatpush3.msra.mxu0 %v2114_v3  ;;  %11336 = vmatprep.mubr.msk.f32.mxu0 %vm13237_vm0, %v13238_v1 }
 0x5ad   :  { %12341 = vmatprep.subr.bf16.mxu0 %v13236_v0 }
 0x5b3   :  { %11337 = vmatmul.mubr.f32.vlgmr.msra.gmra.mrb[4].mxu0 %v2179_v13  ;;  %v3060_v13 = vld [vmem:[#allocation8 + $0xd8] sm:$0xff] }
 0x5b4   :  { %11347 = vmatprep.mubr.msk.f32.mxu0 %vm13237_vm0, %v13238_v1  ;;  %12343 = vmatpush3.bf16.msra.mxu0 %v13559_v25  ;;  %v3077_v16 = vand.u32 4294901760, %v3060_v13 }
 0x5b5   :  { %12344 = vmatprep.subr.bf16.mxu0 %v13236_v0 }
 0x5b6   :  { %v12381_v20 = vpack.c.bf16 %v3080_v17, %v3077_v16  ;;  %v3165_v22 = vsub.f32 %v3060_v13, %v3077_v16 }
 0x5b8   :  { %12346 = vmatpush3.bf16.msra.mxu0 %v12345_v35  ;;  %12382 = vmatpush3.bf16.msra.mxu1 %v12381_v20  ;;  %v3166_v26 = vand.u32 4294901760, %v3165_v22  ;;  %v12393_v37 = vpack.c.bf16 %v3172_v23, %v3165_v22  ;;  %v13637_v23 = vld [vmem:[#allocation7] sm:$0x3f] }
 0x5b9   :  { %12347 = vmatprep.subr.bf16.mxu0 %v13236_v0  ;;  %12383 = vmatprep.subr.bf16.mxu1 %v13236_v0 }
 0x5ba   :  { %v3167_v30 = vsub.f32 %v3165_v22, %v3166_v26  ;;  %v12405_v39 = vpack.c.bf16 %v3173_v28, %v3166_v26  ;;  %v4479_v22 = vld [vmem:[#allocation8 + $0x140] sm:$0xff]  ;;  %v4980_v28 = vsel %vm580_vm2, %v13637_v23, 0 }
 0x5bb   :  { %v4986_v26 = vand.u32 4294901760, %v4479_v22  ;;  %v13647_v31 = vand.u32 4294901760, %v4980_v28 }
 0x5bc   :  { %v3168_v33 = vand.u32 4294901760, %v3167_v30  ;;  %v4481_v30 = vld [vmem:[#allocation8 + $0x150] sm:$0xff] }
 0x686   :  { %v2555_v55 = vpop.f32.mrb[4].mxu0 }
 0x687   :  { %v12741_v56 = vadd.f32 %v10535_v54, %v2555_v55  ;;  %v11338_v57 = vpop.f32.mrb[5].mxu0 }
 0x688   :  { %v3555_v57 = vld [vmem:[#allocation8 + $0xf0] sm:$0xff] }
 0x689   :  { %v2559_v59 = vmax.f32 %v12741_v56, 0.0 }
 0x68b   :  { %v2570_v60 = vsel %vm580_vm2, %v2559_v59, 0  ;;  %v3556_v59 = vld [vmem:[#allocation8 + $0xf8] sm:$0xff] }
 0x68c   :  { %v2641_v61 = vand.u32 4294901760, %v2570_v60 }
 0x68e   :  { %v2642_v62 = vsub.f32 %v2570_v60, %v2641_v61  ;;  %v4008_v60 = vand.u32 4294901760, %v3555_v57 }
 0x690   :  { %v2643_v63 = vand.u32 4294901760, %v2642_v62 }
 0x692   :  { %v2644_v2 = vsub.f32 %v2642_v62, %v2643_v63 }
 0x694   :  { %v2645_v3 = vand.u32 4294901760, %v2644_v2  ;;  %v10537_v2 = vld [vmem:[#allocation8 + $0xe8] ss:$0 sm:$0xff] }
 0x696   :  { %11348 = vmatmul.mubr.f32.vlgmr.msra.gmra.mrb[6].mxu0 %v2645_v3 }
 0x697   :  { %12349 = vmatpush3.bf16.msra.mxu0 %v12348_v46  ;;  %11358 = vmatprep.mubr.msk.f32.mxu0 %vm13237_vm0, %v13238_v1 }
 0x698   :  { %12350 = vmatprep.subr.bf16.mxu0 %v13236_v0 }
 0x69b   :  { %12352 = vmatpush3.bf16.msra.mxu0 %v12351_v49 }
 0x69c   :  { %12353 = vmatprep.subr.bf16.mxu0 %v13236_v0 }
 0x69e   :  { %11359 = vmatmul.mubr.f32.vlgmr.msra.gmra.mrb[6].mxu0 %v2641_v61 }
 0x69f   :  { %12355 = vmatpush3.bf16.msra.mxu0 %v12354_v50  ;;  %11369 = vmatprep.mubr.msk.f32.mxu0 %vm13237_vm0, %v13238_v1 }
 0x6a0   :  { %12356 = vmatprep.subr.bf16.mxu0 %v13236_v0 }
 0x6a3   :  { %12358 = vmatpush3.bf16.msra.mxu0 %v12357_v51  ;;  %v3557_v51 = vld [vmem:[#allocation8 + $0x100] sm:$0xff] }
 0x6a4   :  { %12359 = vmatprep.subr.bf16.mxu0 %v13236_v0 }
 0x6a6   :  { %11370 = vmatmul.mubr.f32.vlgmr.msra.gmra.mrb[6].mxu0 %v2642_v62  ;;  %v13621_v62 = vsub.f32 %v3555_v57, %v4008_v60 }
 0x6a7   :  { %12361 = vmatpush3.bf16.msra.mxu0 %v13559_v25  ;;  %11380 = vmatprep.mubr.msk.f32.mxu0 %vm13237_vm0, %v13238_v1 }
 0x6a8   :  { %12362 = vmatprep.subr.bf16.mxu0 %v13236_v0  ;;  %v4087_v4 = vand.u32 4294901760, %v13621_v62 }
 0x6aa   :  { %v4088_v11 = vsub.f32 %v13621_v62, %v4087_v4 }
 0x6ab   :  { %12364 = vmatpush3.bf16.msra.mxu0 %v12345_v35 }
 0x6ac   :  { %12365 = vmatprep.subr.bf16.mxu0 %v13236_v0  ;;  %v4089_v17 = vand.u32 4294901760, %v4088_v11 }
 0x6ae   :  { %11381 = vmatmul.mubr.f32.vlgmr.msra.gmra.mrb[6].mxu0 %v2643_v63 }
 0x6af   :  { %12367 = vmatpush3.bf16.msra.mxu0 %v12366_v52  ;;  %11391 = vmatprep.mubr.msk.f32.mxu0 %vm13237_vm0, %v13238_v1  ;;  %v3562_v52 = vand.u32 4294901760, %v3557_v51 }
 0x6b0   :  { %12368 = vmatprep.subr.bf16.mxu0 %v13236_v0 }
 0x6b3   :  { %12370 = vmatpush3.bf16.msra.mxu0 %v12369_v53  ;;  %v3639_v53 = vsub.f32 %v3557_v51, %v3562_v52 }
 0x6b4   :  { %12371 = vmatprep.subr.bf16.mxu0 %v13236_v0 }
 0x6b5   :  { %v3640_v54 = vand.u32 4294901760, %v3639_v53 }
 0x6b6   :  { %11392 = vmatmul.mubr.f32.vlgmr.msra.gmra.mrb[6].mxu0 %v2641_v61 }
 0x6b7   :  { %12373 = vmatpush3.bf16.msra.mxu0 %v13559_v25  ;;  %11402 = vmatprep.mubr.msk.f32.mxu0 %vm13237_vm0, %v13238_v1  ;;  %v3154_v25 = vand.u32 4294901760, %v3153_v27  ;;  %v3641_v55 = vsub.f32 %v3639_v53, %v3640_v54 }
 0x6b8   :  { %12374 = vmatprep.subr.bf16.mxu0 %v13236_v0 }
 0x6b9   :  { %v12384_v32 = vpack.c.bf16 %v3161_v29, %v3154_v25  ;;  %v3642_v56 = vand.u32 4294901760, %v3641_v55  ;;  %v4480_v29 = vld [vmem:[#allocation8 + $0x148] sm:$0xff] }
 0x6bb   :  { %12376 = vmatpush3.bf16.msra.mxu0 %v12345_v35  ;;  %v12387_v35 = vpack.c.bf16 %v3175_v34, %v3168_v33  ;;  %v13654_v33 = vsub.f32 %v4479_v22, %v4986_v26  ;;  %v4989_v34 = vand.u32 4294901760, %v4480_v29 }
 0x6bc   :  { %11471 = vmatprep.subr.mxu0 %v13238_v1 }
 0x6be   :  { %11403 = vmatmul.mubr.f32.vlgmr.msra.gmra.mrb[6].mxu0 %v2641_v61  ;;  %v4011_v61 = vand.u32 4294901760, %v3556_v59 }
 0x6bf   :  { %11473 = vmatprep.mubr.msk.f32.mxu0 %vm13237_vm0, %v13238_v1  ;;  %11472 = vmatpush3.msra.mxu0 %v3562_v52 }
 0x6c0   :  { %11481 = vmatprep.subr.mxu0 %v13238_v1  ;;  %v13623_v63 = vsub.f32 %v3556_v59, %v4011_v61 }
 0x6c2   :  { %v4094_v5 = vand.u32 4294901760, %v13623_v63 }
 0x6c4   :  { %v4095_v13 = vsub.f32 %v13623_v63, %v4094_v5 }
 0x6c6   :  { %v4096_v18 = vand.u32 4294901760, %v4095_v13 }
 0x6c8   :  { %v12417_v24 = vpack.c.bf16 %v4096_v18, %v4089_v17 }
 0x791   :  { %v3053_v41 = vpop.f32.mrb[6].mxu0 }
 0x792   :  { %v12742_v42 = vadd.f32 %v10536_v40, %v3053_v41  ;;  %v11404_v43 = vpop.f32.mrb[7].mxu0  ;;  %v5071_v41 = vand.u32 4294901760, %v13654_v33 }
 0x794   :  { %v3057_v44 = vmax.f32 %v12742_v42, 0.0  ;;  %v12420_v42 = vpack.c.bf16 %v13623_v63, %v13621_v62  ;;  %v4473_v62 = vld [vmem:[#allocation8 + $0x110] sm:$0xff]  ;;  %v4474_v63 = vld [vmem:[#allocation8 + $0x118] sm:$0xff] }
 0x796   :  { %v3068_v45 = vsel %vm580_vm2, %v3057_v44, 0 }
 0x797   :  { %v3139_v46 = vand.u32 4294901760, %v3068_v45 }
 0x799   :  { %v3140_v47 = vsub.f32 %v3068_v45, %v3139_v46 }
 0x79b   :  { %v3141_v48 = vand.u32 4294901760, %v3140_v47 }
 0x79d   :  { %v3142_v49 = vsub.f32 %v3140_v47, %v3141_v48 }
 0x79f   :  { %v3143_v50 = vand.u32 4294901760, %v3142_v49 }
 0x7a1   :  { %11414 = vmatmul.mubr.f32.vlgmr.msra.gmra.mrb[4].mxu1 %v3143_v50 }
 0x7a2   :  { %12385 = vmatpush3.bf16.msra.mxu1 %v12384_v32  ;;  %11424 = vmatprep.mubr.msk.f32.mxu1 %vm13237_vm0, %v13238_v1 }
 0x7a3   :  { %12386 = vmatprep.subr.bf16.mxu1 %v13236_v0 }
 0x7a6   :  { %12388 = vmatpush3.bf16.msra.mxu1 %v12387_v35  ;;  %v4992_v35 = vand.u32 4294901760, %v4481_v30 }
 0x7a7   :  { %12389 = vmatprep.subr.bf16.mxu1 %v13236_v0 }
 0x7a8   :  { %v12471_v49 = vpack.c.bf16 %v4992_v35, %v4989_v34 }
 0x7a9   :  { %11425 = vmatmul.mubr.f32.vlgmr.msra.gmra.mrb[4].mxu1 %v3139_v46 }
 0x7aa   :  { %12391 = vmatpush3.bf16.msra.mxu1 %v12390_v36  ;;  %11435 = vmatprep.mubr.msk.f32.mxu1 %vm13237_vm0, %v13238_v1  ;;  %v12414_v36 = vpack.c.bf16 %v4011_v61, %v4008_v60 }
 0x7ab   :  { %12392 = vmatprep.subr.bf16.mxu1 %v13236_v0 }
 0x7ae   :  { %12394 = vmatpush3.bf16.msra.mxu1 %v12393_v37  ;;  %v13661_v37 = vsub.f32 %v4980_v28, %v13647_v31 }
 0x7af   :  { %12395 = vmatprep.subr.bf16.mxu1 %v13236_v0 }
 0x7b0   :  { %v5053_v44 = vand.u32 4294901760, %v13661_v37 }
 0x7b1   :  { %11436 = vmatmul.mubr.f32.vlgmr.msra.gmra.mrb[4].mxu1 %v3140_v47 }
 0x7b2   :  { %12397 = vmatpush3.bf16.msra.mxu1 %v13589_v9  ;;  %11446 = vmatprep.mubr.msk.f32.mxu1 %vm13237_vm0, %v13238_v1  ;;  %v5054_v50 = vsub.f32 %v13661_v37, %v5053_v44 }
 0x7b3   :  { %12398 = vmatprep.subr.bf16.mxu1 %v13236_v0 }
 0x7b6   :  { %12400 = vmatpush3.bf16.msra.mxu1 %v12381_v20 }
 0x7b7   :  { %12401 = vmatprep.subr.bf16.mxu1 %v13236_v0 }
 0x7b9   :  { %11447 = vmatmul.mubr.f32.vlgmr.msra.gmra.mrb[4].mxu1 %v3141_v48  ;;  %v12426_v48 = vpack.c.bf16 %v4094_v5, %v4087_v4 }
 0x7ba   :  { %12403 = vmatpush3.bf16.msra.mxu1 %v12402_v38  ;;  %11457 = vmatprep.mubr.msk.f32.mxu1 %vm13237_vm0, %v13238_v1  ;;  %v13665_v38 = vsub.f32 %v4480_v29, %v4989_v34 }
 0x7bb   :  { %12404 = vmatprep.subr.bf16.mxu1 %v13236_v0 }
 0x7bc   :  { %v5078_v47 = vand.u32 4294901760, %v13665_v38 }
 0x7be   :  { %12406 = vmatpush3.bf16.msra.mxu1 %v12405_v39  ;;  %v13667_v39 = vsub.f32 %v4481_v30, %v4992_v35 }
 0x7bf   :  { %12407 = vmatprep.subr.bf16.mxu1 %v13236_v0 }
 0x7c1   :  { %11458 = vmatmul.mubr.f32.vlgmr.msra.gmra.mrb[4].mxu1 %v3139_v46 }
 0x7c2   :  { %12409 = vmatpush3.bf16.msra.mxu1 %v13589_v9  ;;  %11468 = vmatprep.mubr.msk.f32.mxu1 %vm13237_vm0, %v13238_v1 }
 0x7c3   :  { %12410 = vmatprep.subr.bf16.mxu1 %v13236_v0 }
 0x7c6   :  { %12412 = vmatpush3.bf16.msra.mxu1 %v12381_v20  ;;  %v4478_v20 = vld [vmem:[#allocation8 + $0x138] sm:$0xff] }
 0x7c7   :  { %11476 = vmatprep.subr.mxu1 %v13238_v1  ;;  %v4983_v25 = vand.u32 4294901760, %v4478_v20 }
 0x7c9   :  { %11469 = vmatmul.mubr.f32.vlgmr.msra.gmra.mrb[4].mxu1 %v3139_v46  ;;  %v13652_v32 = vsub.f32 %v4478_v20, %v4983_v25  ;;  %v13678_v43 = vpack.c.bf16 %v4986_v26, %v4983_v25  ;;  %v5072_v46 = vsub.f32 %v13654_v33, %v5071_v41 }
 0x7ca   :  { %11478 = vmatprep.mubr.msk.f32.mxu1 %vm13237_vm0, %v13238_v1  ;;  %11477 = vmatpush3.msra.mxu1 %v3642_v56 }
 0x7cb   :  { %11486 = vmatprep.subr.mxu1 %v13238_v1  ;;  %v5064_v40 = vand.u32 4294901760, %v13652_v32  ;;  %v5073_v51 = vand.u32 4294901760, %v5072_v46  ;;  %v12480_v59 = vpack.c.bf16 %v13654_v33, %v13652_v32 }
 0x7cd   :  { %v5065_v45 = vsub.f32 %v13652_v32, %v5064_v40  ;;  %v12492_v60 = vpack.c.bf16 %v5071_v41, %v5064_v40 }
 0x89c   :  { %v3551_v3 = vpop.f32.mrb[4].mxu1 }
 0x89d   :  { %v12743_v6 = vadd.f32 %v10537_v2, %v3551_v3  ;;  %v11470_v7 = vpop.f32.mrb[5].mxu1  ;;  %v4491_v2 = vand.u32 4294901760, %v4473_v62  ;;  %v4494_v3 = vand.u32 4294901760, %v4474_v63 }
 0x89e   :  { %v4475_v7 = vld [vmem:[#allocation8 + $0x120] sm:$0xff] }
 0x89f   :  { %v3559_v9 = vsel %vm2109_vm4, %v12743_v6, 0  ;;  %v13752_v4 = vpack.c.bf16 %v4494_v3, %v4491_v2  ;;  %v13754_v5 = vsub.f32 %v4473_v62, %v4491_v2  ;;  %v13756_v6 = vsub.f32 %v4474_v63, %v4494_v3 }
 0x8a0   :  { %v3627_v10 = vand.u32 4294901760, %v3559_v9 }
 0x8a1   :  { %v4572_v13 = vand.u32 4294901760, %v13754_v5  ;;  %v12444_v33 = vpack.c.bf16 %v13756_v6, %v13754_v5 }
 0x8a2   :  { %v3628_v14 = vsub.f32 %v3559_v9, %v3627_v10  ;;  %11479 = vmatmul.mubr.f32.vlgmr.msra.gmra.mrb[6].mxu1 %v3627_v10  ;;  %v4476_v9 = vld [vmem:[#allocation8 + $0x128] sm:$0xff] }
 0x8a3   :  { %11487 = vmatpush3.msra.mxu1 %v3562_v52  ;;  %11488 = vmatprep.mubr.msk.f32.mxu1 %vm13237_vm0, %v13238_v1  ;;  %v4500_v11 = vand.u32 4294901760, %v4476_v9 }
 0x8a4   :  { %v3629_v16 = vand.u32 4294901760, %v3628_v14  ;;  %11496 = vmatprep.subr.mxu1 %v13238_v1 }
 0x8a5   :  { %v13766_v18 = vsub.f32 %v4476_v9, %v4500_v11 }
 0x8a6   :  { %11489 = vmatmul.mubr.f32.vlgmr.msra.gmra.mrb[8].mxu1 %v3629_v16  ;;  %v3630_v19 = vsub.f32 %v3628_v14, %v3629_v16 }
 0x8a7   :  { %11497 = vmatpush3.msra.mxu1 %v3562_v52  ;;  %11498 = vmatprep.mubr.msk.f32.mxu1 %vm13237_vm0, %v13238_v1  ;;  %v5079_v52 = vsub.f32 %v13665_v38, %v5078_v47 }
 0x8a8   :  { %v3631_v27 = vand.u32 4294901760, %v3630_v19  ;;  %12416 = vmatprep.subr.bf16.mxu1 %v13236_v0  ;;  %v4573_v19 = vsub.f32 %v13754_v5, %v4572_v13 }
 0x8a9   :  { %v5080_v56 = vand.u32 4294901760, %v5079_v52 }
 0x8aa   :  { %11474 = vmatmul.mubr.f32.vlgmr.msra.gmra.mrb[8].mxu0 %v3631_v27  ;;  %11499 = vmatmul.mubr.f32.vlgmr.msra.gmra.mrb[10].mxu1 %v3627_v10  ;;  %v4574_v22 = vand.u32 4294901760, %v4573_v19 }
 0x8ab   :  { %11482 = vmatpush3.msra.mxu0 %v3639_v53  ;;  %11483 = vmatprep.mubr.msk.f32.mxu0 %vm13237_vm0, %v13238_v1 }
 0x8ac   :  { %11491 = vmatprep.subr.mxu0 %v13238_v1  ;;  %12418 = vmatpush3.bf16.msra.mxu1 %v12417_v24  ;;  %v4593_v24 = vand.u32 4294901760, %v13766_v18 }
 0x8ad   :  { %11512 = vmatprep.mubr.msk.f32.mxu1 %vm13237_vm0, %v13238_v1  ;;  %12422 = vmatprep.subr.bf16.mxu1 %v13236_v0 }
 0x8ae   :  { %11484 = vmatmul.mubr.f32.vlgmr.msra.gmra.mrb[10].mxu0 %v3628_v14  ;;  %v4579_v14 = vand.u32 4294901760, %v13756_v6  ;;  %v4594_v28 = vsub.f32 %v13766_v18, %v4593_v24 }
 0x8af   :  { %11492 = vmatpush3.msra.mxu0 %v3640_v54  ;;  %11493 = vmatprep.mubr.msk.f32.mxu0 %vm13237_vm0, %v13238_v1  ;;  %v5055_v54 = vand.u32 4294901760, %v5054_v50 }
 0x8b0   :  { %12413 = vmatprep.subr.bf16.mxu0 %v13236_v0  ;;  %11513 = vmatmul.mubr.f32.vlgmr.msra.gmra.mrb[12].mxu1 %v13381_v8  ;;  %v4580_v20 = vsub.f32 %v13756_v6, %v4579_v14  ;;  %v13780_v35 = vpack.c.bf16 %v4579_v14, %v4572_v13 }
 0x8b1   :  { %12424 = vmatpush3.bf16.msra.mxu1 %v12414_v36  ;;  %11526 = vmatprep.mubr.msk.f32.mxu1 %vm13237_vm0, %v13238_v1 }
 0x8b2   :  { %11494 = vmatmul.mubr.f32.vlgmr.msra.gmra.mrb[12].mxu0 %v3627_v10  ;;  %12428 = vmatprep.subr.bf16.mxu1 %v13236_v0  ;;  %v4497_v10 = vand.u32 4294901760, %v4475_v7  ;;  %v4581_v25 = vand.u32 4294901760, %v4580_v20 }
 0x8b3   :  { %12415 = vmatpush3.bf16.msra.mxu0 %v12414_v36  ;;  %11505 = vmatprep.mubr.msk.f32.mxu0 %vm13237_vm0, %v13238_v1 }
 0x8b4   :  { %12419 = vmatprep.subr.bf16.mxu0 %v13236_v0  ;;  %11527 = vmatmul.mubr.f32.vlgmr.msra.gmra.mrb[14].mxu1 %v13387_v15  ;;  %v5085_v15 = vand.u32 4294901760, %v13667_v39  ;;  %v13762_v16 = vpack.c.bf16 %v4500_v11, %v4497_v10  ;;  %v13764_v17 = vsub.f32 %v4475_v7, %v4497_v10  ;;  %v12438_v29 = vpack.c.bf16 %v4581_v25, %v4574_v22  ;;  %v10538_v7 = vld [vmem:[#allocation8 + $0x108] ss:$0 sm:$0xff]  ;;  %v10540_v22 = vld [vmem:[#allocation8 + $0x158] ss:$0 sm:$0xff] }
 0x8b5   :  { %12430 = vmatpush3.bf16.msra.mxu1 %v12414_v36  ;;  %11540 = vmatprep.mubr.msk.f32.mxu1 %vm13237_vm0, %v13238_v1 }
 0x8b6   :  { %11506 = vmatmul.mubr.f32.vlgmr.msra.gmra.mrb[14].mxu0 %v13392_v21  ;;  %12467 = vmatprep.subr.bf16.mxu1 %v13236_v0  ;;  %v5066_v21 = vand.u32 4294901760, %v5065_v45  ;;  %v5086_v53 = vsub.f32 %v13667_v39, %v5085_v15  ;;  %v12495_v61 = vpack.c.bf16 %v5085_v15, %v5078_v47  ;;  %v4586_v27 = vand.u32 4294901760, %v13764_v17 }
 0x8b7   :  { %12421 = vmatpush3.bf16.msra.mxu0 %v12420_v42  ;;  %11519 = vmatprep.mubr.msk.f32.mxu0 %vm13237_vm0, %v13238_v1  ;;  %v12447_v34 = vpack.c.bf16 %v13766_v18, %v13764_v17 }
 0x8b8   :  { %12425 = vmatprep.subr.bf16.mxu0 %v13236_v0  ;;  %11541 = vmatmul.mubr.f32.vlgmr.msra.gmra.mrb[16].mxu1 %v13381_v8  ;;  %v12474_v55 = vpack.c.bf16 %v5073_v51, %v5066_v21  ;;  %v5087_v57 = vand.u32 4294901760, %v5086_v53  ;;  %v4587_v26 = vsub.f32 %v13764_v17, %v4586_v27  ;;  %v13782_v36 = vpack.c.bf16 %v4593_v24, %v4586_v27 }
 0x8b9   :  { %12469 = vmatpush3.bf16.msra.mxu1 %v13678_v43  ;;  %11617 = vmatprep.mubr.msk.f32.mxu1 %vm13237_vm0, %v13238_v1 }
 0x8ba   :  { %11520 = vmatmul.mubr.f32.vlgmr.msra.gmra.mrb[16].mxu0 %v13384_v12  ;;  %12470 = vmatprep.subr.bf16.mxu1 %v13236_v0  ;;  %v12477_v12 = vpack.c.bf16 %v5087_v57, %v5080_v56  ;;  %v4588_v30 = vand.u32 4294901760, %v4587_v26  ;;  %v10539_v26 = vld [vmem:[#allocation8 + $0x130] ss:$0 sm:$0xff] }
 0x8bb   :  { %12427 = vmatpush3.bf16.msra.mxu0 %v12426_v48  ;;  %11533 = vmatprep.mubr.msk.f32.mxu0 %vm13237_vm0, %v13238_v1 }
 0x8bc   :  { %12431 = vmatprep.subr.bf16.mxu0 %v13236_v0 }
 0x8bd   :  { %12472 = vmatpush3.bf16.msra.mxu1 %v12471_v49 }
 0x8be   :  { %11534 = vmatmul.mubr.f32.vlgmr.msra.gmra.mrb[18].mxu0 %v13381_v8  ;;  %12473 = vmatprep.subr.bf16.mxu1 %v13236_v0  ;;  %v12483_v8 = vpack.c.bf16 %v13667_v39, %v13665_v38 }
 0x8bf   :  { %11551 = vmatprep.mubr.msk.f32.mxu0 %vm13237_vm0, %v13238_v1  ;;  %12433 = vmatpush3.bf16.msra.mxu0 %v13752_v4 }
 0x8c0   :  { %11618 = vmatmul.mubr.f32.vlgmr.msra.gmra.mrb[18].mxu1 %v5055_v54  ;;  %12434 = vmatprep.subr.bf16.mxu0 %v13236_v0 }
 0x8c1   :  { %12475 = vmatpush3.bf16.msra.mxu1 %v12474_v55  ;;  %11628 = vmatprep.mubr.msk.f32.mxu1 %vm13237_vm0, %v13238_v1 }
 0x8c2   :  { %12476 = vmatprep.subr.bf16.mxu1 %v13236_v0 }
 0x8c3   :  { %12436 = vmatpush3.bf16.msra.mxu0 %v13762_v16 }
 0x8c4   :  { %12437 = vmatprep.subr.bf16.mxu0 %v13236_v0 }
 0x8c5   :  { %12478 = vmatpush3.bf16.msra.mxu1 %v12477_v12 }
 0x8c6   :  { %12479 = vmatprep.subr.bf16.mxu1 %v13236_v0 }
 0x8c8   :  { %11629 = vmatmul.mubr.f32.vlgmr.msra.gmra.mrb[18].mxu1 %v13647_v31 }
 0x8c9   :  { %12481 = vmatpush3.bf16.msra.mxu1 %v12480_v59  ;;  %11639 = vmatprep.mubr.msk.f32.mxu1 %vm13237_vm0, %v13238_v1 }
 0x8ca   :  { %12482 = vmatprep.subr.bf16.mxu1 %v13236_v0 }
 0x8cd   :  { %12484 = vmatpush3.bf16.msra.mxu1 %v12483_v8 }
 0x8ce   :  { %12485 = vmatprep.subr.bf16.mxu1 %v13236_v0 }
 0x8d0   :  { %11640 = vmatmul.mubr.f32.vlgmr.msra.gmra.mrb[18].mxu1 %v13661_v37 }
 0x8d1   :  { %12487 = vmatpush3.bf16.msra.mxu1 %v13678_v43  ;;  %11650 = vmatprep.mubr.msk.f32.mxu1 %vm13237_vm0, %v13238_v1 }
 0x8d2   :  { %12488 = vmatprep.subr.bf16.mxu1 %v13236_v0 }
 0x8d5   :  { %12490 = vmatpush3.bf16.msra.mxu1 %v12471_v49 }
 0x8d6   :  { %12491 = vmatprep.subr.bf16.mxu1 %v13236_v0 }
 0x8d8   :  { %11651 = vmatmul.mubr.f32.vlgmr.msra.gmra.mrb[18].mxu1 %v5053_v44 }
 0x8d9   :  { %12493 = vmatpush3.bf16.msra.mxu1 %v12492_v60  ;;  %11661 = vmatprep.mubr.msk.f32.mxu1 %vm13237_vm0, %v13238_v1 }
 0x8da   :  { %12494 = vmatprep.subr.bf16.mxu1 %v13236_v0 }
 0x8dd   :  { %12496 = vmatpush3.bf16.msra.mxu1 %v12495_v61 }
 0x8de   :  { %12497 = vmatprep.subr.bf16.mxu1 %v13236_v0 }
 0x8e0   :  { %11662 = vmatmul.mubr.f32.vlgmr.msra.gmra.mrb[18].mxu1 %v13647_v31 }
 0x8e1   :  { %12499 = vmatpush3.bf16.msra.mxu1 %v13678_v43  ;;  %11672 = vmatprep.mubr.msk.f32.mxu1 %vm13237_vm0, %v13238_v1 }
 0x8e2   :  { %12500 = vmatprep.subr.bf16.mxu1 %v13236_v0 }
 0x8e5   :  { %12502 = vmatpush3.bf16.msra.mxu1 %v12471_v49 }
 0x8e6   :  { %12542 = vmatprep.subr.bf16.mxu1 %v13236_v0 }
 0x8e8   :  { %11673 = vmatmul.mubr.f32.vlgmr.msra.gmra.mrb[18].mxu1 %v13647_v31  ;;  %v4595_v31 = vand.u32 4294901760, %v4594_v28 }
 0x8e9   :  { %11756 = vmatprep.mubr.msk.f32.mxu1 %vm13237_vm0, %v13238_v1 }
 0x8ea   :  { %v12441_v32 = vpack.c.bf16 %v4595_v31, %v4588_v30 }
 0x975   :  { %v3709_v37 = vpop.f32.mrb[6].mxu1 }
 0x976   :  { %v11480_v38 = vpop.f32.mrb[7].mxu1 }
 0x977   :  { %v5995_v38 = vld [vmem:[#allocation8 + $0x188] sm:$0xff] }
 0x979   :  { %v3857_v39 = vpop.f32.mrb[8].mxu1 }
 0x97a   :  { %v11490_v40 = vpop.f32.mrb[9].mxu1 }
 0x97b   :  { %v5997_v40 = vld [vmem:[#allocation8 + $0x198] sm:$0xff] }
 0x97d   :  { %v3633_v41 = vpop.f32.mrb[8].mxu0  ;;  %v4003_v42 = vpop.f32.mrb[10].mxu1 }
 0x97e   :  { %v3710_v43 = vadd.f32 %v3709_v37, %v3633_v41  ;;  %v11475_v44 = vpop.f32.mrb[9].mxu0  ;;  %v11500_v45 = vpop.f32.mrb[11].mxu1  ;;  %v6008_v41 = vand.u32 4294901760, %v5995_v38 }
 0x980   :  { %v13822_v44 = vsub.f32 %v5995_v38, %v6008_v41 }
 0x981   :  { %v3783_v46 = vpop.f32.mrb[10].mxu0 }
 0x982   :  { %v3784_v47 = vadd.f32 %v3783_v46, %v3710_v43  ;;  %v11485_v15 = vpop.f32.mrb[11].mxu0  ;;  %v13820_v43 = vand.u32 4294901760, %v5997_v40 }
 0x983   :  { %v4161_v48 = vpop.f32.mrb[12].mxu1 }
 0x984   :  { %v3858_v49 = vadd.f32 %v3857_v39, %v3784_v47  ;;  %v11514_v50 = vpop.f32.mrb[13].mxu1  ;;  %v5996_v39 = vld [vmem:[#allocation8 + $0x190] sm:$0xff]  ;;  %v13827_v46 = vsub.f32 %v5997_v40, %v13820_v43  ;;  %v6088_v47 = vand.u32 4294901760, %v13822_v44 }
 0x985   :  { %v3931_v21 = vpop.f32.mrb[12].mxu0 }
 0x986   :  { %v3932_v51 = vadd.f32 %v3931_v21, %v3858_v49  ;;  %v11495_v52 = vpop.f32.mrb[13].mxu0  ;;  %v6102_v15 = vand.u32 4294901760, %v13827_v46  ;;  %v89_v21 = vld [vmem:[%s14313_s1] sm:$0x3] }
 0x987   :  { %v4312_v53 = vpop.f32.mrb[14].mxu1 }
 0x988   :  { %v4004_v54 = vadd.f32 %v4003_v42, %v3932_v51  ;;  %v11528_v55 = vpop.f32.mrb[15].mxu1  ;;  %v6011_v42 = vand.u32 4294901760, %v5996_v39 }
 0x989   :  { %v4080_v56 = vpop.f32.mrb[14].mxu0  ;;  %v6005_v55 = vsel %vm6003_vm5, %v89_v21, 0  ;;  %v6486_v21 = vld [vmem:[#allocation8 + $0x1d8] sm:$0xff] }
 0x98a   :  { %v4081_v57 = vadd.f32 %v4080_v56, %v4004_v54  ;;  %v11507_v12 = vpop.f32.mrb[15].mxu0  ;;  %v13824_v45 = vsub.f32 %v5996_v39, %v6011_v42 }
 0x98b   :  { %v4462_v59 = vpop.f32.mrb[16].mxu1 }
 0x98c   :  { %v4162_v8 = vadd.f32 %v4161_v48, %v4081_v57  ;;  %v11542_v60 = vpop.f32.mrb[17].mxu1  ;;  %v6089_v48 = vsub.f32 %v13822_v44, %v6088_v47  ;;  %v13846_v57 = vand.u32 4294901760, %v6005_v55  ;;  %v12546_v12 = vpack.c.bf16 %v13824_v45, %v13822_v44 }
 0x98d   :  { %v4237_v61 = vpop.f32.mrb[16].mxu0 }
 0x98e   :  { %v4238_v62 = vadd.f32 %v4237_v61, %v4162_v8  ;;  %v11521_v63 = vpop.f32.mrb[17].mxu0  ;;  %v6090_v51 = vand.u32 4294901760, %v6089_v48  ;;  %v5497_v8 = vld [vmem:[#allocation8 + $0x168] sm:$0xff]  ;;  %v13858_v60 = vsub.f32 %v6005_v55, %v13846_v57  ;;  %v6487_v55 = vld [vmem:[#allocation8 + $0x1e0] sm:$0xff] }
 0x990   :  { %v4313_v2 = vadd.f32 %v4312_v53, %v4238_v62  ;;  %v6103_v53 = vsub.f32 %v13827_v46, %v6102_v15  ;;  %v5514_v62 = vand.u32 4294901760, %v5497_v8 }
 0x991   :  { %v4389_v3 = vpop.f32.mrb[18].mxu0 }
 0x992   :  { %v4390_v5 = vadd.f32 %v4389_v3, %v4313_v2  ;;  %v11535_v6 = vpop.f32.mrb[19].mxu0  ;;  %v6104_v56 = vand.u32 4294901760, %v6103_v53  ;;  %v13865_v3 = vsub.f32 %v5497_v8, %v5514_v62  ;;  %v6993_v53 = vand.u32 4294901760, %v6486_v21 }
 0x993   :  { %v5498_v6 = vld [vmem:[#allocation8 + $0x170] sm:$0xff]  ;;  %v6996_v8 = vand.u32 4294901760, %v6487_v55 }
 0x994   :  { %v4463_v9 = vadd.f32 %v4462_v59, %v4390_v5  ;;  %v5496_v59 = vld [vmem:[#allocation8 + $0x160] sm:$0xff]  ;;  %v13867_v5 = vpack.c.bf16 %v6011_v42, %v6008_v41 }
 0x995   :  { %v5511_v61 = vand.u32 4294901760, %v5496_v59 }
 0x996   :  { %v4471_v10 = vadd.f32 %v10538_v7, %v4463_v9  ;;  %v5499_v7 = vld [vmem:[#allocation8 + $0x178] sm:$0xff]  ;;  %v5517_v9 = vand.u32 4294901760, %v5498_v6 }
 0x997   :  { %v13861_v63 = vpack.c.bf16 %v5514_v62, %v5511_v61  ;;  %v13863_v2 = vsub.f32 %v5496_v59, %v5511_v61  ;;  %v7077_v59 = vsub.f32 %v6486_v21, %v6993_v53  ;;  %v7084_v62 = vsub.f32 %v6487_v55, %v6996_v8 }
 0x998   :  { %v4472_v11 = vmax.f32 %v4471_v10, 0.0  ;;  %v5520_v10 = vand.u32 4294901760, %v5499_v7 }
 0x999   :  { %v12516_v39 = vpack.c.bf16 %v13865_v3, %v13863_v2 }
 0x99a   :  { %v4488_v13 = vsel %vm580_vm2, %v4472_v11, 0  ;;  %v5592_v11 = vand.u32 4294901760, %v13863_v2 }
 0x99b   :  { %v4559_v14 = vand.u32 4294901760, %v4488_v13 }
 0x99d   :  { %v4560_v17 = vsub.f32 %v4488_v13, %v4559_v14  ;;  %v5599_v13 = vand.u32 4294901760, %v13865_v3 }
 0x99f   :  { %v4561_v18 = vand.u32 4294901760, %v4560_v17  ;;  %v12528_v41 = vpack.c.bf16 %v5599_v13, %v5592_v11 }
 0x9a1   :  { %v4562_v19 = vsub.f32 %v4560_v17, %v4561_v18 }
 0x9a3   :  { %v4563_v20 = vand.u32 4294901760, %v4562_v19  ;;  %v5593_v19 = vsub.f32 %v13863_v2, %v5592_v11 }
 0x9a5   :  { %11552 = vmatmul.mubr.f32.vlgmr.msra.gmra.mrb[20].mxu0 %v4563_v20 }
 0x9a6   :  { %12439 = vmatpush3.bf16.msra.mxu0 %v12438_v29  ;;  %11562 = vmatprep.mubr.msk.f32.mxu0 %vm13237_vm0, %v13238_v1 }
 0x9a7   :  { %12440 = vmatprep.subr.bf16.mxu0 %v13236_v0 }
 0x9aa   :  { %12442 = vmatpush3.bf16.msra.mxu0 %v12441_v32 }
 0x9ab   :  { %12443 = vmatprep.subr.bf16.mxu0 %v13236_v0 }
 0x9ad   :  { %11563 = vmatmul.mubr.f32.vlgmr.msra.gmra.mrb[20].mxu0 %v4559_v14 }
 0x9ae   :  { %12445 = vmatpush3.bf16.msra.mxu0 %v12444_v33  ;;  %11573 = vmatprep.mubr.msk.f32.mxu0 %vm13237_vm0, %v13238_v1 }
 0x9af   :  { %12446 = vmatprep.subr.bf16.mxu0 %v13236_v0 }
 0x9b2   :  { %12448 = vmatpush3.bf16.msra.mxu0 %v12447_v34 }
 0x9b3   :  { %12449 = vmatprep.subr.bf16.mxu0 %v13236_v0 }
 0x9b5   :  { %11574 = vmatmul.mubr.f32.vlgmr.msra.gmra.mrb[20].mxu0 %v4560_v17  ;;  %v13878_v17 = vsub.f32 %v5498_v6, %v5517_v9 }
 0x9b6   :  { %12451 = vmatpush3.bf16.msra.mxu0 %v13752_v4  ;;  %11584 = vmatprep.mubr.msk.f32.mxu0 %vm13237_vm0, %v13238_v1 }
 0x9b7   :  { %12452 = vmatprep.subr.bf16.mxu0 %v13236_v0 }
 0x9ba   :  { %12454 = vmatpush3.bf16.msra.mxu0 %v13762_v16 }
 0x9bb   :  { %12455 = vmatprep.subr.bf16.mxu0 %v13236_v0  ;;  %v5463_v27 = vpop.f32.mrb[18].mxu1 }
 0x9bc   :  { %v12745_v24 = vadd.f32 %v10540_v22, %v5463_v27  ;;  %v11674_v25 = vpop.f32.mrb[19].mxu1  ;;  %v5600_v22 = vsub.f32 %v13865_v3, %v5599_v13  ;;  %v7078_v3 = vand.u32 4294901760, %v7077_v59  ;;  %v7085_v13 = vand.u32 4294901760, %v7084_v62 }
 0x9bd   :  { %11585 = vmatmul.mubr.f32.vlgmr.msra.gmra.mrb[20].mxu0 %v4561_v18  ;;  %v13880_v18 = vsub.f32 %v5499_v7, %v5520_v10  ;;  %v5594_v25 = vand.u32 4294901760, %v5593_v19 }
 0x9be   :  { %12457 = vmatpush3.bf16.msra.mxu0 %v13780_v35  ;;  %11595 = vmatprep.mubr.msk.f32.mxu0 %vm13237_vm0, %v13238_v1  ;;  %v7079_v11 = vsub.f32 %v7077_v59, %v7078_v3 }
 0x9bf   :  { %12458 = vmatprep.subr.bf16.mxu0 %v13236_v0  ;;  %5475 = vrot.lane.b32.xlu1 %v12745_v24, %s13239_s3  ;;  %v12519_v40 = vpack.c.bf16 %v13880_v18, %v13878_v17 }
 0x9c0   :  { %v7080_v19 = vand.u32 4294901760, %v7079_v11 }
 0x9c2   :  { %12460 = vmatpush3.bf16.msra.mxu0 %v13782_v36 }
 0x9c3   :  { %12461 = vmatprep.subr.bf16.mxu0 %v13236_v0 }
 0x9c5   :  { %11596 = vmatmul.mubr.f32.vlgmr.msra.gmra.mrb[20].mxu0 %v4559_v14 }
 0x9c6   :  { %12463 = vmatpush3.bf16.msra.mxu0 %v13752_v4  ;;  %11606 = vmatprep.mubr.msk.f32.mxu0 %vm13237_vm0, %v13238_v1 }
 0x9c7   :  { %12464 = vmatprep.subr.bf16.mxu0 %v13236_v0 }
 0x9ca   :  { %12466 = vmatpush3.bf16.msra.mxu0 %v13762_v16 }
 0x9cb   :  { %12503 = vmatprep.subr.bf16.mxu0 %v13236_v0 }
 0x9cd   :  { %11607 = vmatmul.mubr.f32.vlgmr.msra.gmra.mrb[20].mxu0 %v4559_v14  ;;  %v13876_v14 = vpack.c.bf16 %v5520_v10, %v5517_v9 }
 0x9ce   :  { %11683 = vmatprep.mubr.msk.f32.mxu0 %vm13237_vm0, %v13238_v1  ;;  %12505 = vmatpush3.bf16.msra.mxu0 %v13861_v63 }
 0x9cf   :  { %12506 = vmatprep.subr.bf16.mxu0 %v13236_v0 }
 0x9d2   :  { %12508 = vmatpush3.bf16.msra.mxu0 %v13876_v14 }
 0x9d3   :  { %12509 = vmatprep.subr.bf16.mxu0 %v13236_v0 }
 0xa31   :  { %v5476_v35 = vpop.permute.xlu1 %5475 }
 0xaa0   :  { %v4971_v28 = vpop.f32.mrb[20].mxu0 }
 0xaa1   :  { %v12744_v29 = vadd.f32 %v10539_v26, %v4971_v28  ;;  %v11608_v30 = vpop.f32.mrb[21].mxu0  ;;  %v5601_v28 = vand.u32 4294901760, %v5600_v22 }
 0xaa2   :  { %v5613_v30 = vand.u32 4294901760, %v13880_v18 }
 0xaa3   :  { %v5467_v31 = vadd.f32 %v12745_v24, %v12744_v29  ;;  %v6077_v24 = vand.u32 4294901760, %v13858_v60 }
 0xaa5   :  { %v10541_v32 = vmul.f32 -1.442695, %v5467_v31  ;;  %v13922_v44 = vsub.f32 %v13858_v60, %v6077_v24 }
 0xaa7   :  { %12972 = vpow2.f32 %v10541_v32  ;;  %v6079_v6 = vand.u32 4294901760, %v13922_v44 }
 0xab1   :  { %v12973_v4 = vpop.eup %12972 }
 0xab2   :  { %v5471_v33 = vadd.f32 1.0, %v12973_v4  ;;  %v12510_v4 = vpack.c.bf16 %v5601_v28, %v5594_v25 }
 0xab4   :  { %12974 = vrcp.f32 %v5471_v33 }
 0xabe   :  { %v13814_v34 = vpop.eup %12974 }
 0xabf   :  { %v5478_v16 = vmul.f32 %v13814_v34, %v5476_v35  ;;  %v5485_v27 = vsub.f32 1.0, %v13814_v34  ;;  %v5614_v35 = vsub.f32 %v13880_v18, %v5613_v30 }
 0xac1   :  { %5480 = vrot.lane.b32.xlu0 %v5478_v16, %s13239_s3 }
 0xac5   :  { %5491 = vrot.lane.b32.xlu0 %v13637_v23, %s13241_s23  ;;  %v6095_v23 = vand.u32 4294901760, %v13824_v45 }
 0xac7   :  { %v6096_v49 = vsub.f32 %v13824_v45, %v6095_v23 }
 0xac9   :  { %v6097_v52 = vand.u32 4294901760, %v6096_v49 }
 0xacb   :  { %v12543_v54 = vpack.c.bf16 %v6097_v52, %v6090_v51  ;;  %v13943_v51 = vld [vmem:[#allocation5] sm:$0x3] }
 0xacd   :  { %12544 = vmatpush3.bf16.msra.mxu1 %v12543_v54  ;;  %v6987_v54 = vsel %vm580_vm2, %v13943_v51, 0 }
 0xace   :  { %11754 = vmatprep.subr.mxu1 %v13238_v1 }
 0xad1   :  { %11755 = vmatpush3.msra.mxu1 %v6104_v56  ;;  %v6488_v56 = vld [vmem:[#allocation8 + $0x1e8] sm:$0xff] }
 0xad2   :  { %11757 = vmatmul.mubr.f32.vlgmr.msra.gmra.mrb[20].mxu1 %v13846_v57  ;;  %12545 = vmatprep.subr.bf16.mxu1 %v13236_v0 }
 0xad3   :  { %12547 = vmatpush3.bf16.msra.mxu1 %v12546_v12  ;;  %11765 = vmatprep.mubr.msk.f32.mxu1 %vm13237_vm0, %v13238_v1 }
 0xad4   :  { %11763 = vmatprep.subr.mxu1 %v13238_v1 }
 0xad7   :  { %11764 = vmatpush3.msra.mxu1 %v13827_v46 }
 0xad8   :  { %12548 = vmatprep.subr.bf16.mxu1 %v13236_v0 }
 0xada   :  { %11766 = vmatmul.mubr.f32.vlgmr.msra.gmra.mrb[20].mxu1 %v13858_v60  ;;  %v6999_v60 = vand.u32 4294901760, %v6488_v56 }
 0xadb   :  { %11774 = vmatprep.mubr.msk.f32.mxu1 %vm13237_vm0, %v13238_v1  ;;  %12550 = vmatpush3.bf16.msra.mxu1 %v13867_v5 }
 0xadc   :  { %11772 = vmatprep.subr.mxu1 %v13238_v1  ;;  %v7091_v2 = vsub.f32 %v6488_v56, %v6999_v60 }
 0xadf   :  { %11773 = vmatpush3.msra.mxu1 %v13820_v43 }
 0xae0   :  { %12551 = vmatprep.subr.bf16.mxu1 %v13236_v0 }
 0xae2   :  { %11775 = vmatmul.mubr.f32.vlgmr.msra.gmra.mrb[20].mxu1 %v6077_v24 }
 0xae3   :  { %11783 = vmatprep.mubr.msk.f32.mxu1 %vm13237_vm0, %v13238_v1 }
 0xb33   :  { %v5481_v36 = vpop.permute.xlu0 %5480 }
 0xb34   :  { %v5483_v37 = vadd.f32 %v12744_v29, %v5481_v36  ;;  %v5606_v29 = vand.u32 4294901760, %v13878_v17  ;;  %v12552_v36 = vpack.c.bf16 %v6095_v23, %v6088_v47 }
 0xb36   :  { %12976 = vtanh.f32 %v5483_v37  ;;  %v5607_v33 = vsub.f32 %v13878_v17, %v5606_v29  ;;  %12553 = vmatpush3.bf16.msra.mxu1 %v12552_v36  ;;  %v12531_v42 = vpack.c.bf16 %v5613_v30, %v5606_v29  ;;  %v12597_v17 = vpack.c.bf16 %v6999_v60, %v6996_v8 }
 0xb37   :  { %v5492_v20 = vpop.permute.xlu0 %5491  ;;  %11781 = vmatprep.subr.mxu1 %v13238_v1  ;;  %v12609_v29 = vpack.c.bf16 %v7091_v2, %v7084_v62 }
 0xb38   :  { %v5494_v31 = vmul.f32 %v13814_v34, %v5492_v20  ;;  %v5608_v37 = vand.u32 4294901760, %v5607_v33  ;;  %v5615_v34 = vand.u32 4294901760, %v5614_v35  ;;  %v7086_v20 = vsub.f32 %v7084_v62, %v7085_v13  ;;  %v6480_v33 = vld [vmem:[#allocation8 + $0x1a8] sm:$0xff]  ;;  %v6481_v35 = vld [vmem:[#allocation8 + $0x1b0] sm:$0xff]  ;;  %v10542_v62 = vld [vmem:[#allocation8 + $0x180] ss:$0 sm:$0xff] }
 0xb39   :  { %v6501_v36 = vand.u32 4294901760, %v6481_v35 }
 0xb3a   :  { %v12513_v38 = vpack.c.bf16 %v5615_v34, %v5608_v37  ;;  %11782 = vmatpush3.msra.mxu1 %v6102_v15  ;;  %v7087_v25 = vand.u32 4294901760, %v7086_v20 }
 0xb3b   :  { %11784 = vmatmul.mubr.f32.vlgmr.msra.gmra.mrb[20].mxu1 %v13846_v57  ;;  %12554 = vmatprep.subr.bf16.mxu1 %v13236_v0 }
 0xb3c   :  { %12556 = vmatpush3.bf16.msra.mxu1 %v13867_v5  ;;  %11792 = vmatprep.mubr.msk.f32.mxu1 %vm13237_vm0, %v13238_v1 }
 0xb3d   :  { %11790 = vmatprep.subr.mxu1 %v13238_v1 }
 0xb40   :  { %v12977_v50 = vpop.eup %12976  ;;  %11791 = vmatpush3.msra.mxu1 %v13820_v43 }
 0xb41   :  { %5487 = vrot.lane.b32.xlu1 %v12977_v50, %s13240_s22  ;;  %12557 = vmatprep.subr.bf16.mxu1 %v13236_v0  ;;  %v6485_v50 = vld [vmem:[#allocation8 + $0x1d0] sm:$0xff] }
 0xb42   :  { %v6990_v52 = vand.u32 4294901760, %v6485_v50 }
 0xb43   :  { %11793 = vmatmul.mubr.f32.vlgmr.msra.gmra.mrb[20].mxu1 %v13846_v57  ;;  %v13952_v57 = vand.u32 4294901760, %v6987_v54 }
 0xb44   :  { %11803 = vmatprep.mubr.msk.f32.mxu1 %vm13237_vm0, %v13238_v1  ;;  %v7070_v12 = vsub.f32 %v6485_v50, %v6990_v52  ;;  %v12594_v7 = vpack.c.bf16 %v6993_v53, %v6990_v52 }
 0xb45   :  { %v7059_v61 = vsub.f32 %v6987_v54, %v13952_v57 }
 0xb46   :  { %v12606_v28 = vpack.c.bf16 %v7077_v59, %v7070_v12 }
 0xb47   :  { %v7060_v9 = vand.u32 4294901760, %v7059_v61 }
 0xbb3   :  { %v5488_v26 = vpop.permute.xlu1 %5487 }
 0xbb4   :  { %v5490_v32 = vmul.f32 %v5488_v26, %v5485_v27 }
 0xbb6   :  { %v5495_v16 = vadd.f32 %v5494_v31, %v5490_v32 }
 0xbb8   :  { %5506 = vrot.lane.b32.xlu1 %v5495_v16, %s13240_s22  ;;  %v6498_v16 = vand.u32 4294901760, %v6480_v33 }
 0xbba   :  { %v13993_v37 = vpack.c.bf16 %v6501_v36, %v6498_v16  ;;  %v6578_v34 = vsub.f32 %v6480_v33, %v6498_v16 }
 0xbbc   :  { %12559 = vmatpush3.bf16.msra.mxu1 %v13993_v37  ;;  %v6579_v44 = vand.u32 4294901760, %v6578_v34 }
 0xbbd   :  { %12560 = vmatprep.subr.bf16.mxu1 %v13236_v0 }
 0xc16   :  { %v6475_v32 = vpop.f32.mrb[20].mxu1 }
 0xc2a   :  { %v5507_v45 = vpop.permute.xlu1 %5506 }
 0xc2b   :  { %v5508_v46 = vsel %vm580_vm2, %v5507_v45, 0  ;;  %10442 = vst.msk [vmem:[#allocation16] sm:$0x3f] %vm10439_vm3, %v5507_v45 }
 0xc2c   :  { %v5579_v47 = vand.u32 4294901760, %v5508_v46 }
 0xc2e   :  { %v5580_v23 = vsub.f32 %v5508_v46, %v5579_v47 }
 0xc30   :  { %v5581_v15 = vand.u32 4294901760, %v5580_v23 }
 0xc32   :  { %v5582_v48 = vsub.f32 %v5580_v23, %v5581_v15 }
 0xc34   :  { %v5583_v49 = vand.u32 4294901760, %v5582_v48 }
 0xc36   :  { %11684 = vmatmul.mubr.f32.vlgmr.msra.gmra.mrb[22].mxu0 %v5583_v49 }
 0xc37   :  { %12511 = vmatpush3.bf16.msra.mxu0 %v12510_v4  ;;  %11694 = vmatprep.mubr.msk.f32.mxu0 %vm13237_vm0, %v13238_v1  ;;  %v11794_v4 = vpop.f32.mrb[21].mxu1 }
 0xc38   :  { %12512 = vmatprep.subr.bf16.mxu0 %v13236_v0 }
 0xc3b   :  { %12514 = vmatpush3.bf16.msra.mxu0 %v12513_v38  ;;  %v6585_v38 = vsub.f32 %v6481_v35, %v6501_v36 }
 0xc3c   :  { %12515 = vmatprep.subr.bf16.mxu0 %v13236_v0 }
 0xc3d   :  { %v6586_v45 = vand.u32 4294901760, %v6585_v38  ;;  %v12570_v59 = vpack.c.bf16 %v6585_v38, %v6578_v34 }
 0xc3e   :  { %11695 = vmatmul.mubr.f32.vlgmr.msra.gmra.mrb[22].mxu0 %v5579_v47 }
 0xc3f   :  { %12517 = vmatpush3.bf16.msra.mxu0 %v12516_v39  ;;  %11705 = vmatprep.mubr.msk.f32.mxu0 %vm13237_vm0, %v13238_v1  ;;  %v6482_v39 = vld [vmem:[#allocation8 + $0x1b8] sm:$0xff]  ;;  %v6587_v48 = vsub.f32 %v6585_v38, %v6586_v45  ;;  %v12582_v60 = vpack.c.bf16 %v6586_v45, %v6579_v44 }
 0xc40   :  { %12518 = vmatprep.subr.bf16.mxu0 %v13236_v0  ;;  %v7503_v38 = vld [vmem:[#allocation8 + $0x1f8] sm:$0xff] }
 0xc41   :  { %v6588_v52 = vand.u32 4294901760, %v6587_v48 }
 0xc43   :  { %12520 = vmatpush3.bf16.msra.mxu0 %v12519_v40  ;;  %v6483_v40 = vld [vmem:[#allocation8 + $0x1c0] sm:$0xff] }
 0xc44   :  { %12521 = vmatprep.subr.bf16.mxu0 %v13236_v0 }
 0xc46   :  { %11706 = vmatmul.mubr.f32.vlgmr.msra.gmra.mrb[22].mxu0 %v5580_v23 }
 0xc47   :  { %12523 = vmatpush3.bf16.msra.mxu0 %v13861_v63  ;;  %11716 = vmatprep.mubr.msk.f32.mxu0 %vm13237_vm0, %v13238_v1 }
 0xc48   :  { %12524 = vmatprep.subr.bf16.mxu0 %v13236_v0 }
 0xc4b   :  { %12526 = vmatpush3.bf16.msra.mxu0 %v13876_v14 }
 0xc4c   :  { %12527 = vmatprep.subr.bf16.mxu0 %v13236_v0 }
 0xc4e   :  { %11717 = vmatmul.mubr.f32.vlgmr.msra.gmra.mrb[22].mxu0 %v5581_v15  ;;  %v6580_v15 = vsub.f32 %v6578_v34, %v6579_v44 }
 0xc4f   :  { %12529 = vmatpush3.bf16.msra.mxu0 %v12528_v41  ;;  %11727 = vmatprep.mubr.msk.f32.mxu0 %vm13237_vm0, %v13238_v1  ;;  %v6504_v41 = vand.u32 4294901760, %v6482_v39 }
 0xc50   :  { %12530 = vmatprep.subr.bf16.mxu0 %v13236_v0  ;;  %v6581_v49 = vand.u32 4294901760, %v6580_v15 }
 0xc52   :  { %v12564_v55 = vpack.c.bf16 %v6588_v52, %v6581_v49 }
 0xc53   :  { %12532 = vmatpush3.bf16.msra.mxu0 %v12531_v42  ;;  %v6507_v42 = vand.u32 4294901760, %v6483_v40 }
 0xc54   :  { %12533 = vmatprep.subr.bf16.mxu0 %v13236_v0 }
 0xc55   :  { %v13997_v46 = vpack.c.bf16 %v6507_v42, %v6504_v41  ;;  %v6599_v23 = vsub.f32 %v6483_v40, %v6507_v42  ;;  %v7518_v40 = vand.u32 4294901760, %v7503_v38 }
 0xc56   :  { %11728 = vmatmul.mubr.f32.vlgmr.msra.gmra.mrb[22].mxu0 %v5579_v47 }
 0xc57   :  { %12535 = vmatpush3.bf16.msra.mxu0 %v13861_v63  ;;  %11738 = vmatprep.mubr.msk.f32.mxu0 %vm13237_vm0, %v13238_v1  ;;  %v7071_v63 = vand.u32 4294901760, %v7070_v12  ;;  %v6600_v21 = vand.u32 4294901760, %v6599_v23  ;;  %v7598_v44 = vsub.f32 %v7503_v38, %v7518_v40 }
 0xc58   :  { %12536 = vmatprep.subr.bf16.mxu0 %v13236_v0  ;;  %12562 = vmatpush3.bf16.msra.mxu1 %v13997_v46 }
 0xc59   :  { %v7072_v10 = vsub.f32 %v7070_v12, %v7071_v63  ;;  %v12618_v30 = vpack.c.bf16 %v7078_v3, %v7071_v63  ;;  %12563 = vmatprep.subr.bf16.mxu1 %v13236_v0  ;;  %v6601_v54 = vsub.f32 %v6599_v23, %v6600_v21  ;;  %v7599_v15 = vand.u32 4294901760, %v7598_v44 }
 0xc5b   :  { %12538 = vmatpush3.bf16.msra.mxu0 %v13876_v14  ;;  %v7092_v14 = vand.u32 4294901760, %v7091_v2  ;;  %v7073_v18 = vand.u32 4294901760, %v7072_v10 }
 0xc5c   :  { %12539 = vmatprep.subr.bf16.mxu0 %v13236_v0 }
 0xc5d   :  { %v7093_v22 = vsub.f32 %v7091_v2, %v7092_v14  ;;  %v12600_v24 = vpack.c.bf16 %v7080_v19, %v7073_v18  ;;  %v12621_v31 = vpack.c.bf16 %v7092_v14, %v7085_v13 }
 0xc5e   :  { %11739 = vmatmul.mubr.f32.vlgmr.msra.gmra.mrb[22].mxu0 %v5579_v47  ;;  %v6592_v47 = vsub.f32 %v6482_v39, %v6504_v41  ;;  %v7504_v39 = vld [vmem:[#allocation8 + $0x200] sm:$0xff] }
 0xc5f   :  { %12541 = vmatpush3.bf16.msra.mxu0 %v13867_v5  ;;  %11747 = vmatprep.mubr.msk.f32.mxu0 %vm13237_vm0, %v13238_v1  ;;  %v7061_v5 = vsub.f32 %v7059_v61, %v7060_v9  ;;  %v7521_v41 = vand.u32 4294901760, %v7504_v39 }
 0xc60   :  { %11745 = vmatprep.subr.mxu0 %v13238_v1  ;;  %v6593_v50 = vand.u32 4294901760, %v6592_v47  ;;  %v12573_v8 = vpack.c.bf16 %v6599_v23, %v6592_v47 }
 0xc61   :  { %v7062_v27 = vand.u32 4294901760, %v7061_v5  ;;  %v14033_v42 = vpack.c.bf16 %v7521_v41, %v7518_v40  ;;  %v7605_v45 = vsub.f32 %v7504_v39, %v7521_v41 }
 0xc62   :  { %v6594_v53 = vsub.f32 %v6592_v47, %v6593_v50  ;;  %v7506_v47 = vld [vmem:[#allocation8 + $0x210] sm:$0xff] }
 0xc63   :  { %11746 = vmatpush3.msra.mxu0 %v13820_v43  ;;  %v7094_v43 = vand.u32 4294901760, %v7093_v22  ;;  %v10545_v22 = vld [vmem:[#allocation8 + $0x1f0] ss:$0 sm:$0xff]  ;;  %v7606_v48 = vand.u32 4294901760, %v7605_v45 }
 0xc64   :  { %11748 = vmatmul.mubr.f32.vlgmr.msra.gmra.mrb[24].mxu0 %v6079_v6  ;;  %12593 = vmatprep.subr.bf16.mxu0 %v13236_v0  ;;  %v6595_v56 = vand.u32 4294901760, %v6594_v53  ;;  %v10543_v6 = vld [vmem:[#allocation8 + $0x1a0] ss:$0 sm:$0xff]  ;;  %v7600_v53 = vsub.f32 %v7598_v44, %v7599_v15 }
 0xc65   :  { %12595 = vmatpush3.bf16.msra.mxu0 %v12594_v7  ;;  %11869 = vmatprep.mubr.msk.f32.mxu0 %vm13237_vm0, %v13238_v1  ;;  %v12603_v26 = vpack.c.bf16 %v7094_v43, %v7087_v25  ;;  %v10544_v43 = vld [vmem:[#allocation8 + $0x1c8] ss:$0 sm:$0xff] }
 0xc66   :  { %12596 = vmatprep.subr.bf16.mxu0 %v13236_v0 }
 0xc69   :  { %12598 = vmatpush3.bf16.msra.mxu0 %v12597_v17 }
 0xc6a   :  { %12599 = vmatprep.subr.bf16.mxu0 %v13236_v0 }
 0xc6c   :  { %11870 = vmatmul.mubr.f32.vlgmr.msra.gmra.mrb[26].mxu0 %v7062_v27 }
 0xc6d   :  { %12601 = vmatpush3.bf16.msra.mxu0 %v12600_v24  ;;  %11880 = vmatprep.mubr.msk.f32.mxu0 %vm13237_vm0, %v13238_v1 }
 0xc6e   :  { %12602 = vmatprep.subr.bf16.mxu0 %v13236_v0 }
 0xc71   :  { %12604 = vmatpush3.bf16.msra.mxu0 %v12603_v26 }
 0xc72   :  { %12605 = vmatprep.subr.bf16.mxu0 %v13236_v0 }
 0xc74   :  { %11881 = vmatmul.mubr.f32.vlgmr.msra.gmra.mrb[26].mxu0 %v13952_v57 }
 0xc75   :  { %12607 = vmatpush3.bf16.msra.mxu0 %v12606_v28  ;;  %11891 = vmatprep.mubr.msk.f32.mxu0 %vm13237_vm0, %v13238_v1 }
 0xc76   :  { %12608 = vmatprep.subr.bf16.mxu0 %v13236_v0 }
 0xc79   :  { %12610 = vmatpush3.bf16.msra.mxu0 %v12609_v29 }
 0xc7a   :  { %12611 = vmatprep.subr.bf16.mxu0 %v13236_v0 }
 0xc7c   :  { %11892 = vmatmul.mubr.f32.vlgmr.msra.gmra.mrb[26].mxu0 %v7059_v61  ;;  %v12585_v61 = vpack.c.bf16 %v6600_v21, %v6593_v50 }
 0xc7d   :  { %12613 = vmatpush3.bf16.msra.mxu0 %v12594_v7  ;;  %11902 = vmatprep.mubr.msk.f32.mxu0 %vm13237_vm0, %v13238_v1 }
 0xc7e   :  { %12614 = vmatprep.subr.bf16.mxu0 %v13236_v0 }
 0xc81   :  { %12616 = vmatpush3.bf16.msra.mxu0 %v12597_v17 }
 0xc82   :  { %12617 = vmatprep.subr.bf16.mxu0 %v13236_v0 }
 0xc84   :  { %11903 = vmatmul.mubr.f32.vlgmr.msra.gmra.mrb[26].mxu0 %v7060_v9 }
 0xc85   :  { %12619 = vmatpush3.bf16.msra.mxu0 %v12618_v30  ;;  %11913 = vmatprep.mubr.msk.f32.mxu0 %vm13237_vm0, %v13238_v1 }
 0xc86   :  { %12620 = vmatprep.subr.bf16.mxu0 %v13236_v0 }
 0xc89   :  { %12622 = vmatpush3.bf16.msra.mxu0 %v12621_v31 }
 0xc8a   :  { %12623 = vmatprep.subr.bf16.mxu0 %v13236_v0 }
 0xc8c   :  { %11914 = vmatmul.mubr.f32.vlgmr.msra.gmra.mrb[26].mxu0 %v13952_v57 }
 0xc8d   :  { %12625 = vmatpush3.bf16.msra.mxu0 %v12594_v7  ;;  %11924 = vmatprep.mubr.msk.f32.mxu0 %vm13237_vm0, %v13238_v1 }
 0xc8e   :  { %12626 = vmatprep.subr.bf16.mxu0 %v13236_v0 }
 0xc91   :  { %12628 = vmatpush3.bf16.msra.mxu0 %v12597_v17 }
 0xc92   :  { %11993 = vmatprep.subr.mxu0 %v13238_v1 }
 0xc94   :  { %11925 = vmatmul.mubr.f32.vlgmr.msra.gmra.mrb[26].mxu0 %v13952_v57  ;;  %v6602_v57 = vand.u32 4294901760, %v6601_v54 }
 0xc95   :  { %11995 = vmatprep.mubr.msk.f32.mxu0 %vm13237_vm0, %v13238_v1 }
 0xc96   :  { %v12567_v12 = vpack.c.bf16 %v6602_v57, %v6595_v56  ;;  %v7601_v57 = vand.u32 4294901760, %v7600_v53 }
 0xd31   :  { %v5991_v2 = vpop.f32.mrb[22].mxu0 }
 0xd32   :  { %v12746_v63 = vadd.f32 %v10542_v62, %v5991_v2  ;;  %v11740_v3 = vpop.f32.mrb[23].mxu0 }
 0xd34   :  { %10432 = vst.msk [vmem:[#allocation10] sm:$0x3f] %vm10431_vm6, %v12746_v63 }
 0xd37   :  { %v6081_v7 = vpop.f32.mrb[24].mxu0 }
 0xd38   :  { %v6082_v9 = vadd.f32 %v10543_v6, %v6081_v7  ;;  %v11749_v10 = vpop.f32.mrb[25].mxu0 }
 0xd39   :  { %v12642_v10 = vpack.c.bf16 %v7605_v45, %v7598_v44 }
 0xd3a   :  { %v12748_v11 = vadd.f32 %v6475_v32, %v6082_v9 }
 0xd3c   :  { %v6479_v13 = vmax.f32 %v12748_v11, 0.0 }
 0xd3e   :  { %v6495_v14 = vsel %vm580_vm2, %v6479_v13, 0  ;;  %v12654_v13 = vpack.c.bf16 %v7606_v48, %v7599_v15 }
 0xd3f   :  { %v6566_v17 = vand.u32 4294901760, %v6495_v14 }
 0xd41   :  { %v6567_v5 = vsub.f32 %v6495_v14, %v6566_v17 }
 0xd43   :  { %v6568_v18 = vand.u32 4294901760, %v6567_v5 }
 0xd45   :  { %v6569_v19 = vsub.f32 %v6567_v5, %v6568_v18 }
 0xd47   :  { %v6570_v20 = vand.u32 4294901760, %v6569_v19 }
 0xd49   :  { %11804 = vmatmul.mubr.f32.vlgmr.msra.gmra.mrb[22].mxu1 %v6570_v20 }
 0xd4a   :  { %12565 = vmatpush3.bf16.msra.mxu1 %v12564_v55  ;;  %11814 = vmatprep.mubr.msk.f32.mxu1 %vm13237_vm0, %v13238_v1  ;;  %v7607_v55 = vsub.f32 %v7605_v45, %v7606_v48  ;;  %v8472_v48 = vld [vmem:[#allocation8 + $0x230] sm:$0xff] }
 0xd4b   :  { %12566 = vmatprep.subr.bf16.mxu1 %v13236_v0 }
 0xd4e   :  { %12568 = vmatpush3.bf16.msra.mxu1 %v12567_v12 }
 0xd4f   :  { %12569 = vmatprep.subr.bf16.mxu1 %v13236_v0 }
 0xd51   :  { %11815 = vmatmul.mubr.f32.vlgmr.msra.gmra.mrb[22].mxu1 %v6566_v17 }
 0xd52   :  { %12571 = vmatpush3.bf16.msra.mxu1 %v12570_v59  ;;  %11825 = vmatprep.mubr.msk.f32.mxu1 %vm13237_vm0, %v13238_v1 }
 0xd53   :  { %12572 = vmatprep.subr.bf16.mxu1 %v13236_v0 }
 0xd56   :  { %12574 = vmatpush3.bf16.msra.mxu1 %v12573_v8 }
 0xd57   :  { %12575 = vmatprep.subr.bf16.mxu1 %v13236_v0 }
 0xd59   :  { %11826 = vmatmul.mubr.f32.vlgmr.msra.gmra.mrb[22].mxu1 %v6567_v5 }
 0xd5a   :  { %12577 = vmatpush3.bf16.msra.mxu1 %v13993_v37  ;;  %11836 = vmatprep.mubr.msk.f32.mxu1 %vm13237_vm0, %v13238_v1 }
 0xd5b   :  { %12578 = vmatprep.subr.bf16.mxu1 %v13236_v0 }
 0xd5e   :  { %12580 = vmatpush3.bf16.msra.mxu1 %v13997_v46 }
 0xd5f   :  { %12581 = vmatprep.subr.bf16.mxu1 %v13236_v0 }
 0xd61   :  { %11837 = vmatmul.mubr.f32.vlgmr.msra.gmra.mrb[22].mxu1 %v6568_v18 }
 0xd62   :  { %12583 = vmatpush3.bf16.msra.mxu1 %v12582_v60  ;;  %11847 = vmatprep.mubr.msk.f32.mxu1 %vm13237_vm0, %v13238_v1 }
 0xd63   :  { %12584 = vmatprep.subr.bf16.mxu1 %v13236_v0 }
 0xd66   :  { %12586 = vmatpush3.bf16.msra.mxu1 %v12585_v61  ;;  %v7608_v61 = vand.u32 4294901760, %v7607_v55  ;;  %v8474_v55 = vld [vmem:[#allocation8 + $0x240] sm:$0xff] }
 0xd67   :  { %12587 = vmatprep.subr.bf16.mxu1 %v13236_v0  ;;  %v7470_v27 = vpop.f32.mrb[26].mxu0 }
 0xd68   :  { %v12750_v24 = vadd.f32 %v10545_v22, %v7470_v27  ;;  %v11926_v25 = vpop.f32.mrb[27].mxu0  ;;  %v12636_v3 = vpack.c.bf16 %v7608_v61, %v7601_v57  ;;  %v8491_v57 = vand.u32 4294901760, %v8474_v55 }
 0xd69   :  { %11848 = vmatmul.mubr.f32.vlgmr.msra.gmra.mrb[22].mxu1 %v6566_v17  ;;  %v10547_v25 = vld [vmem:[#allocation8 + $0x218] ss:$0 sm:$0xff] }
 0xd6a   :  { %12589 = vmatpush3.bf16.msra.mxu1 %v13993_v37  ;;  %11858 = vmatprep.mubr.msk.f32.mxu1 %vm13237_vm0, %v13238_v1  ;;  %v8579_v61 = vsub.f32 %v8474_v55, %v8491_v57  ;;  %v8973_v55 = vld [vmem:[#allocation8 + $0x270] sm:$0xff] }
 0xd6b   :  { %12590 = vmatprep.subr.bf16.mxu1 %v13236_v0  ;;  %7482 = vrot.lane.b32.xlu0 %v12750_v24, %s13239_s3 }
 0xd6e   :  { %12592 = vmatpush3.bf16.msra.mxu1 %v13997_v46  ;;  %v7505_v46 = vld [vmem:[#allocation8 + $0x208] sm:$0xff] }
 0xd6f   :  { %12629 = vmatprep.subr.bf16.mxu1 %v13236_v0  ;;  %v7524_v23 = vand.u32 4294901760, %v7505_v46 }
 0xd71   :  { %11859 = vmatmul.mubr.f32.vlgmr.msra.gmra.mrb[22].mxu1 %v6566_v17  ;;  %v7612_v21 = vsub.f32 %v7505_v46, %v7524_v23  ;;  %v94_v17 = vld [vmem:[%s14318_s6] sm:$0x3]  ;;  %s13243_s6 = smov [#allocation11]  }
 0xd72   :  { %11935 = vmatprep.mubr.msk.f32.mxu1 %vm13237_vm0, %v13238_v1  ;;  %12631 = vmatpush3.bf16.msra.mxu1 %v14033_v42  ;;  %s10461_s29 = sshll.u32 %s13243_s6, 4  ;;  %s10462_s29 = int_to_ptr.vmem [resolvable:$true] %s10461_s29 }
 0xd73   :  { %12632 = vmatprep.subr.bf16.mxu1 %v13236_v0  ;;  %v7613_v12 = vand.u32 4294901760, %v7612_v21  ;;  %s13084_s2 = scalar_lea.vmem %s10462_s29, 32  ;;  %p13089_p5 = scmp.lt.s32.totalorder %s10462_s29, %s10462_s29 }
 0xd74   :  { %p13085_p4 = scmp.ne.s32.totalorder %s10462_s29, %s13084_s2  ;;  %p13090_p6 = scmp.lt.s32.totalorder %s13084_s2, %s13084_s2 }
 0xd75   :  { %v7614_v62 = vsub.f32 %v7612_v21, %v7613_v12 }
 0xd76   :  { %p13091_p7 = por %p13090_p6, %p13089_p5 }
 0xd77   :  { %v7615_v6 = vand.u32 4294901760, %v7614_v62 }
 0xd78   :  { %p13092_p8 = pnand %p13091_p7, %p13085_p4 }
 0xddd   :  { %v7483_v35 = vpop.permute.xlu0 %7482 }
 0xe44   :  { %v6978_v26 = vpop.f32.mrb[22].mxu1 }
 0xe45   :  { %v12749_v28 = vadd.f32 %v10544_v43, %v6978_v26  ;;  %v11860_v29 = vpop.f32.mrb[23].mxu1 }
 0xe47   :  { %v7474_v30 = vadd.f32 %v12750_v24, %v12749_v28 }
 0xe49   :  { %v10546_v31 = vmul.f32 -1.442695, %v7474_v30 }
 0xe4b   :  { %12978 = vpow2.f32 %v10546_v31 }
 0xe55   :  { %v12979_v32 = vpop.eup %12978 }
 0xe56   :  { %v7478_v4 = vadd.f32 1.0, %v12979_v32 }
 0xe58   :  { %12980 = vrcp.f32 %v7478_v4 }
 0xe62   :  { %v12981_v33 = vpop.eup %12980 }
 0xe63   :  { %v7485_v16 = vmul.f32 %v12981_v33, %v7483_v35  ;;  %v7492_v54 = vsub.f32 1.0, %v12981_v33 }
 0xe65   :  { %7487 = vrot.lane.b32.xlu1 %v7485_v16, %s13239_s3 }
 0xe69   :  { %7498 = vrot.lane.b32.xlu1 %v13943_v51, %s13241_s23  ;;  %v7527_v51 = vand.u32 4294901760, %v7506_v47 }
 0xe6b   :  { %v14037_v50 = vpack.c.bf16 %v7527_v51, %v7524_v23  ;;  %v7619_v52 = vsub.f32 %v7506_v47, %v7527_v51 }
 0xe6d   :  { %12634 = vmatpush3.bf16.msra.mxu1 %v14037_v50  ;;  %v7620_v59 = vand.u32 4294901760, %v7619_v52  ;;  %v12645_v11 = vpack.c.bf16 %v7619_v52, %v7612_v21  ;;  %8007 = vrot.lane.b32.xlu1 %v94_v17, %s13235_s16 }
 0xe6e   :  { %12635 = vmatprep.subr.bf16.mxu1 %v13236_v0 }
 0xe6f   :  { %v7621_v2 = vsub.f32 %v7619_v52, %v7620_v59  ;;  %v12657_v14 = vpack.c.bf16 %v7620_v59, %v7613_v12 }
 0xe71   :  { %v7622_v7 = vand.u32 4294901760, %v7621_v2 }
 0xe73   :  { %v12639_v9 = vpack.c.bf16 %v7622_v7, %v7615_v6  ;;  %v8580_v7 = vand.u32 4294901760, %v8579_v61 }
 0xed7   :  { %v7488_v36 = vpop.permute.xlu1 %7487 }
 0xed8   :  { %v7490_v37 = vadd.f32 %v12749_v28, %v7488_v36 }
 0xeda   :  { %12982 = vtanh.f32 %v7490_v37 }
 0xedb   :  { %v7499_v49 = vpop.permute.xlu1 %7498 }
 0xedc   :  { %v7501_v8 = vmul.f32 %v12981_v33, %v7499_v49  ;;  %v8016_v33 = vld [vmem:[#allocation8 + $0x220] sm:$0xff]  ;;  %v8473_v49 = vld [vmem:[#allocation8 + $0x238] sm:$0xff] }
 0xedd   :  { %v8026_v36 = vand.u32 4294901760, %v8016_v33  ;;  %v8488_v21 = vand.u32 4294901760, %v8473_v49 }
 0xedf   :  { %v8008_v16 = vpop.permute.xlu1 %8007  ;;  %11994 = vmatpush3.msra.mxu0 %v8026_v36  ;;  %v8103_v38 = vsub.f32 %v8016_v33, %v8026_v36 }
 0xee0   :  { %11998 = vmatprep.subr.mxu0 %v13238_v1 }
 0xee4   :  { %v12983_v34 = vpop.eup %12982 }
 0xee5   :  { %7494 = vrot.lane.b32.xlu0 %v12983_v34, %s13240_s22 }
 0xf57   :  { %v7495_v56 = vpop.permute.xlu0 %7494 }
 0xf58   :  { %v7497_v60 = vmul.f32 %v7495_v56, %v7492_v54  ;;  %v8572_v54 = vsub.f32 %v8473_v49, %v8488_v21  ;;  %v8475_v56 = vld [vmem:[#allocation8 + $0x248] sm:$0xff] }
 0xf59   :  { %v8494_v12 = vand.u32 4294901760, %v8475_v56 }
 0xf5a   :  { %v7502_v63 = vadd.f32 %v7501_v8, %v7497_v60  ;;  %v8573_v8 = vand.u32 4294901760, %v8572_v54 }
 0xf5b   :  { %v14103_v60 = vpack.c.bf16 %v8494_v12, %v8491_v57  ;;  %v8586_v62 = vsub.f32 %v8475_v56, %v8494_v12  ;;  %v8992_v57 = vand.u32 4294901760, %v8973_v55 }
 0xf5c   :  { %7513 = vrot.lane.b32.xlu0 %v7502_v63, %s13240_s22  ;;  %v8574_v63 = vsub.f32 %v8572_v54, %v8573_v8 }
 0xf5e   :  { %v8575_v6 = vand.u32 4294901760, %v8574_v63 }
 0xfce   :  { %v7514_v5 = vpop.permute.xlu0 %7513 }
 0xfcf   :  { %v7515_v18 = vsel %vm580_vm2, %v7514_v5, 0  ;;  %10437 = vst.msk [vmem:[#allocation13] sm:$0x3] %vm10436_vm7, %v7514_v5 }
 0xfd0   :  { %v7586_v19 = vand.u32 4294901760, %v7515_v18 }
 0xfd2   :  { %v7587_v20 = vsub.f32 %v7515_v18, %v7586_v19 }
 0xfd4   :  { %v7588_v22 = vand.u32 4294901760, %v7587_v20 }
 0xfd6   :  { %v7589_v27 = vsub.f32 %v7587_v20, %v7588_v22 }
 0xfd8   :  { %v7590_v24 = vand.u32 4294901760, %v7589_v27  ;;  %v10548_v27 = vld [vmem:[#allocation8 + $0x228] ss:$0 sm:$0xff] }
 0xfda   :  { %11936 = vmatmul.mubr.f32.vlgmr.msra.gmra.mrb[24].mxu1 %v7590_v24 }
 0xfdb   :  { %12637 = vmatpush3.bf16.msra.mxu1 %v12636_v3  ;;  %11946 = vmatprep.mubr.msk.f32.mxu1 %vm13237_vm0, %v13238_v1 }
 0xfdc   :  { %12638 = vmatprep.subr.bf16.mxu1 %v13236_v0 }
 0xfdf   :  { %12640 = vmatpush3.bf16.msra.mxu1 %v12639_v9  ;;  %v8587_v9 = vand.u32 4294901760, %v8586_v62 }
 0xfe0   :  { %12641 = vmatprep.subr.bf16.mxu1 %v13236_v0 }
 0xfe2   :  { %11947 = vmatmul.mubr.f32.vlgmr.msra.gmra.mrb[24].mxu1 %v7586_v19 }
 0xfe3   :  { %12643 = vmatpush3.bf16.msra.mxu1 %v12642_v10  ;;  %11957 = vmatprep.mubr.msk.f32.mxu1 %vm13237_vm0, %v13238_v1 }
 0xfe4   :  { %12644 = vmatprep.subr.bf16.mxu1 %v13236_v0 }
 0xfe7   :  { %12646 = vmatpush3.bf16.msra.mxu1 %v12645_v11  ;;  %v8581_v11 = vsub.f32 %v8579_v61, %v8580_v7 }
 0xfe8   :  { %12647 = vmatprep.subr.bf16.mxu1 %v13236_v0 }
 0xfea   :  { %11958 = vmatmul.mubr.f32.vlgmr.msra.gmra.mrb[24].mxu1 %v7587_v20 }
 0xfeb   :  { %12649 = vmatpush3.bf16.msra.mxu1 %v14033_v42  ;;  %11968 = vmatprep.mubr.msk.f32.mxu1 %vm13237_vm0, %v13238_v1 }
 0xfec   :  { %12650 = vmatprep.subr.bf16.mxu1 %v13236_v0 }
 0xfef   :  { %12652 = vmatpush3.bf16.msra.mxu1 %v14037_v50 }
 0xff0   :  { %12653 = vmatprep.subr.bf16.mxu1 %v13236_v0 }
 0xff2   :  { %11969 = vmatmul.mubr.f32.vlgmr.msra.gmra.mrb[24].mxu1 %v7588_v22  ;;  %v12693_v22 = vpack.c.bf16 %v8587_v9, %v8580_v7 }
 0xff3   :  { %12655 = vmatpush3.bf16.msra.mxu1 %v12654_v13  ;;  %11979 = vmatprep.mubr.msk.f32.mxu1 %vm13237_vm0, %v13238_v1  ;;  %v8588_v13 = vsub.f32 %v8586_v62, %v8587_v9 }
 0xff4   :  { %12656 = vmatprep.subr.bf16.mxu1 %v13236_v0 }
 0xff5   :  { %v8589_v17 = vand.u32 4294901760, %v8588_v13 }
 0xff7   :  { %12658 = vmatpush3.bf16.msra.mxu1 %v12657_v14  ;;  %v8582_v14 = vand.u32 4294901760, %v8581_v11 }
 0xff8   :  { %12659 = vmatprep.subr.bf16.mxu1 %v13236_v0 }
 0xff9   :  { %v12675_v5 = vpack.c.bf16 %v8589_v17, %v8582_v14 }
 0xffa   :  { %11980 = vmatmul.mubr.f32.vlgmr.msra.gmra.mrb[24].mxu1 %v7586_v19 }
 0xffb   :  { %12661 = vmatpush3.bf16.msra.mxu1 %v14033_v42  ;;  %11990 = vmatprep.mubr.msk.f32.mxu1 %vm13237_vm0, %v13238_v1  ;;  %v8104_v42 = vand.u32 4294901760, %v8103_v38 }
 0xffc   :  { %12662 = vmatprep.subr.bf16.mxu1 %v13236_v0 }
 0xffd   :  { %v8105_v46 = vsub.f32 %v8103_v38, %v8104_v42 }
 0xfff   :  { %12664 = vmatpush3.bf16.msra.mxu1 %v14037_v50  ;;  %v8106_v51 = vand.u32 4294901760, %v8105_v46  ;;  %v8485_v50 = vand.u32 4294901760, %v8472_v48 }
0x1000   :  { %12701 = vmatprep.subr.bf16.mxu1 %v13236_v0 }
0x1001   :  { %v14099_v52 = vpack.c.bf16 %v8488_v21, %v8485_v50  ;;  %v8565_v53 = vsub.f32 %v8472_v48, %v8485_v50  ;;  %v8971_v48 = vld [vmem:[#allocation8 + $0x260] sm:$0xff] }
0x1002   :  { %11991 = vmatmul.mubr.f32.vlgmr.msra.gmra.mrb[24].mxu1 %v7586_v19  ;;  %v12681_v19 = vpack.c.bf16 %v8586_v62, %v8579_v61  ;;  %v8986_v50 = vand.u32 4294901760, %v8971_v48  ;;  %v9084_v61 = vsub.f32 %v8973_v55, %v8992_v57 }
0x1003   :  { %12097 = vmatprep.mubr.msk.f32.mxu1 %vm13237_vm0, %v13238_v1  ;;  %v8566_v59 = vand.u32 4294901760, %v8565_v53  ;;  %v12678_v18 = vpack.c.bf16 %v8572_v54, %v8565_v53  ;;  %v8972_v54 = vld [vmem:[#allocation8 + $0x268] sm:$0xff] }
0x1004   :  { %v8989_v56 = vand.u32 4294901760, %v8972_v54 }
0x1005   :  { %v8567_v2 = vsub.f32 %v8565_v53, %v8566_v59  ;;  %v12690_v20 = vpack.c.bf16 %v8573_v8, %v8566_v59  ;;  %v9070_v53 = vsub.f32 %v8971_v48, %v8986_v50 }
0x1006   :  { %v14178_v8 = vpack.c.bf16 %v8992_v57, %v8989_v56 }
0x1007   :  { %v8568_v3 = vand.u32 4294901760, %v8567_v2  ;;  %v9071_v59 = vand.u32 4294901760, %v9070_v53 }
0x1009   :  { %v12672_v10 = vpack.c.bf16 %v8575_v6, %v8568_v3  ;;  %v9072_v2 = vsub.f32 %v9070_v53, %v9071_v59  ;;  %v9085_v6 = vand.u32 4294901760, %v9084_v61 }
0x100b   :  { %v9073_v7 = vand.u32 4294901760, %v9072_v2 }
0x10d5   :  { %v7998_v43 = vpop.f32.mrb[24].mxu1 }
0x10d6   :  { %v14073_v26 = vadd.f32 %v10547_v25, %v7998_v43  ;;  %v11992_v28 = vpop.f32.mrb[25].mxu1 }
0x10d8   :  { %v9470_v29 = vmul.f32 1.442695, %v14073_v26  ;;  %v8002_v30 = vmul.f32 0.5, %v14073_v26 }
0x10da   :  { %12984 = vpow2.f32 %v9470_v29  ;;  %v8003_v31 = vmul.f32 1.442695, %v8002_v30 }
0x10dc   :  { %12986 = vpow2.f32 %v8003_v31 }
0x10e4   :  { %v12985_v32 = vpop.eup %12984 }
0x10e5   :  { %v9472_v4 = vmax.f32 %v12985_v32, 0.002 }
0x10e6   :  { %v12987_v35 = vpop.eup %12986 }
0x10e7   :  { %9939 = vrot.lane.b32.xlu1 %v9472_v4, %s13242_s5  ;;  %v8005_v37 = vmax.f32 %v12987_v35, 0.04472136  ;;  %v9473_v35 = vlaneseq }
0x10e9   :  { %v8010_v34 = vmul.f32 %v8008_v16, %v8005_v37  ;;  %v9476_v16 = vand.u32 127, %v9473_v35  ;;  %v9474_v37 = vshrl.u32 %v9473_v35, 7 }
0x10eb   :  { %8012 = vrot.lane.b32.xlu0 %v8010_v34, %s13242_s5 }
0x115d   :  { %v8013_v39 = vpop.permute.xlu0 %8012 }
0x115e   :  { %v8015_v40 = vadd.f32 %v14073_v26, %v8013_v39  ;;  %v9490_v39 = vsel %vm9488_vm11, %v14073_v26, 0 }
0x1160   :  { %v8023_v41 = vsel %vm2109_vm4, %v8015_v40, 0 }
0x1161   :  { %v8091_v44 = vand.u32 4294901760, %v8023_v41 }
0x1163   :  { %v8092_v45 = vsub.f32 %v8023_v41, %v8091_v44  ;;  %v9493_v41 = vand.u32 4294901760, %v9490_v39 }
0x1165   :  { %v8093_v47 = vand.u32 4294901760, %v8092_v45 }
0x1167   :  { %v8094_v23 = vsub.f32 %v8092_v45, %v8093_v47 }
0x1169   :  { %v8095_v15 = vand.u32 4294901760, %v8094_v23 }
0x116b   :  { %11996 = vmatmul.mubr.f32.vlgmr.msra.gmra.mrb[28].mxu0 %v8095_v15  ;;  %v8970_v15 = vld [vmem:[#allocation8 + $0x258] sm:$0xff] }
0x116c   :  { %11999 = vmatpush3.msra.mxu0 %v8106_v51  ;;  %12000 = vmatprep.mubr.msk.f32.mxu0 %vm13237_vm0, %v13238_v1  ;;  %v8983_v49 = vand.u32 4294901760, %v8970_v15 }
0x116d   :  { %12003 = vmatprep.subr.mxu0 %v13238_v1 }
0x116e   :  { %v14174_v21 = vpack.c.bf16 %v8986_v50, %v8983_v49 }
0x1170   :  { %12703 = vmatpush3.bf16.msra.mxu1 %v14174_v21 }
0x1171   :  { %12704 = vmatprep.subr.bf16.mxu1 %v13236_v0 }
0x1173   :  { %12001 = vmatmul.mubr.f32.vlgmr.msra.gmra.mrb[28].mxu0 %v8091_v44 }
0x1174   :  { %12004 = vmatpush3.msra.mxu0 %v8103_v38  ;;  %12005 = vmatprep.mubr.msk.f32.mxu0 %vm13237_vm0, %v13238_v1 }
0x1175   :  { %12008 = vmatprep.subr.mxu0 %v13238_v1  ;;  %12706 = vmatpush3.bf16.msra.mxu1 %v14178_v8 }
0x1176   :  { %12707 = vmatprep.subr.bf16.mxu1 %v13236_v0 }
0x117b   :  { %12006 = vmatmul.mubr.f32.vlgmr.msra.gmra.mrb[28].mxu0 %v8092_v45 }
0x117c   :  { %12009 = vmatpush3.msra.mxu0 %v8026_v36  ;;  %12010 = vmatprep.mubr.msk.f32.mxu0 %vm13237_vm0, %v13238_v1 }
0x117d   :  { %12013 = vmatprep.subr.mxu0 %v13238_v1 }
0x1183   :  { %12011 = vmatmul.mubr.f32.vlgmr.msra.gmra.mrb[28].mxu0 %v8093_v47 }
0x1184   :  { %12014 = vmatpush3.msra.mxu0 %v8104_v42  ;;  %12015 = vmatprep.mubr.msk.f32.mxu0 %vm13237_vm0, %v13238_v1 }
0x1185   :  { %12018 = vmatprep.subr.mxu0 %v13238_v1 }
0x118b   :  { %12016 = vmatmul.mubr.f32.vlgmr.msra.gmra.mrb[28].mxu0 %v8091_v44 }
0x118c   :  { %12019 = vmatpush3.msra.mxu0 %v8026_v36  ;;  %12020 = vmatprep.mubr.msk.f32.mxu0 %vm13237_vm0, %v13238_v1  ;;  %v9477_v36 = vmul.u32 3, %v9476_v16 }
0x118d   :  { %12665 = vmatprep.subr.bf16.mxu0 %v13236_v0 }
0x118e   :  { %v9479_v34 = vadd.s32 3, %v9477_v36  ;;  %vm9478_vm8 = vcmp.ge.s32.totalorder %v9474_v37, %v9477_v36 }
0x1190   :  { %vm9480_vm9 = vcmp.lt.s32.totalorder %v9474_v37, %v9479_v34 }
0x1191   :  { %vm9481_vm10 = vmand %vm9478_vm8, %vm9480_vm9 }
0x1192   :  { %v14123_v38 = vsel %vm9481_vm10, 1.0, %v13238_v1 }
0x1193   :  { %12021 = vmatmul.mubr.f32.vlgmr.msra.gmra.mrb[28].mxu0 %v8091_v44  ;;  %v9486_v40 = vsel %vm9484_vm12, %v14123_v38, 0  ;;  %v9570_v44 = vsub.f32 %v9490_v39, %v9493_v41 }
0x1194   :  { %12031 = vmatprep.mubr.msk.f32.mxu0 %vm13237_vm0, %v13238_v1  ;;  %12667 = vmatpush3.bf16.msra.mxu0 %v14099_v52  ;;  %v14132_v42 = vsub.f32 %v9486_v40, %v9486_v40 }
0x1195   :  { %12668 = vmatprep.subr.bf16.mxu0 %v13236_v0  ;;  %v9571_v45 = vand.u32 4294901760, %v9570_v44 }
0x1196   :  { %v14136_v26 = vand.u32 4294901760, %v14132_v42 }
0x1197   :  { %v9572_v47 = vsub.f32 %v9570_v44, %v9571_v45 }
0x1198   :  { %12670 = vmatpush3.bf16.msra.mxu0 %v14103_v60  ;;  %v9561_v46 = vsub.f32 %v14132_v42, %v14136_v26 }
0x1199   :  { %12671 = vmatprep.subr.bf16.mxu0 %v13236_v0  ;;  %v9573_v51 = vand.u32 4294901760, %v9572_v47  ;;  %v9467_v47 = vmul.f32 1.442695, %v13535_v58 }
0x119a   :  { %v14146_v23 = vand.u32 4294901760, %v9561_v46 }
0x119b   :  { %12988 = vpow2.f32 %v9467_v47 }
0x11a5   :  { %v12989_v48 = vpop.eup %12988 }
0x1266   :  { %v8467_v24 = vpop.f32.mrb[28].mxu0 }
0x1267   :  { %v12752_v25 = vadd.f32 %v10548_v27, %v8467_v24  ;;  %v12022_v43 = vpop.f32.mrb[29].mxu0 }
0x1269   :  { %v8471_v28 = vmax.f32 %v12752_v25, 0.0 }
0x126b   :  { %v8482_v29 = vsel %vm580_vm2, %v8471_v28, 0 }
0x126c   :  { %v8553_v30 = vand.u32 4294901760, %v8482_v29 }
0x126e   :  { %v8554_v31 = vsub.f32 %v8482_v29, %v8553_v30 }
0x1270   :  { %v8555_v32 = vand.u32 4294901760, %v8554_v31 }
0x1272   :  { %v8556_v4 = vsub.f32 %v8554_v31, %v8555_v32 }
0x1274   :  { %v8557_v33 = vand.u32 4294901760, %v8556_v4 }
0x1276   :  { %12032 = vmatmul.mubr.f32.vlgmr.msra.gmra.mrb[30].mxu0 %v8557_v33  ;;  %v9940_v33 = vpop.permute.xlu1 %9939 }
0x1277   :  { %12673 = vmatpush3.bf16.msra.mxu0 %v12672_v10  ;;  %12042 = vmatprep.mubr.msk.f32.mxu0 %vm13237_vm0, %v13238_v1  ;;  %v9086_v10 = vsub.f32 %v9084_v61, %v9085_v6  ;;  %v9941_v35 = vsel %vm9488_vm11, %v9940_v33, 0 }
0x1278   :  { %12674 = vmatprep.subr.bf16.mxu0 %v13236_v0  ;;  %v9944_v16 = vand.u32 4294901760, %v9941_v35 }
0x1279   :  { %v9087_v14 = vand.u32 4294901760, %v9086_v10 }
0x127a   :  { %v10021_v39 = vsub.f32 %v9941_v35, %v9944_v16 }
0x127b   :  { %12676 = vmatpush3.bf16.msra.mxu0 %v12675_v5 }
0x127c   :  { %12677 = vmatprep.subr.bf16.mxu0 %v13236_v0 }
0x127e   :  { %12043 = vmatmul.mubr.f32.vlgmr.msra.gmra.mrb[30].mxu0 %v8553_v30 }
0x127f   :  { %12679 = vmatpush3.bf16.msra.mxu0 %v12678_v18  ;;  %12053 = vmatprep.mubr.msk.f32.mxu0 %vm13237_vm0, %v13238_v1 }
0x1280   :  { %12680 = vmatprep.subr.bf16.mxu0 %v13236_v0 }
0x1283   :  { %12682 = vmatpush3.bf16.msra.mxu0 %v12681_v19 }
0x1284   :  { %12683 = vmatprep.subr.bf16.mxu0 %v13236_v0 }
0x1286   :  { %12054 = vmatmul.mubr.f32.vlgmr.msra.gmra.mrb[30].mxu0 %v8554_v31 }
0x1287   :  { %12685 = vmatpush3.bf16.msra.mxu0 %v14099_v52  ;;  %12064 = vmatprep.mubr.msk.f32.mxu0 %vm13237_vm0, %v13238_v1 }
0x1288   :  { %12686 = vmatprep.subr.bf16.mxu0 %v13236_v0 }
0x128b   :  { %12688 = vmatpush3.bf16.msra.mxu0 %v14103_v60 }
0x128c   :  { %12689 = vmatprep.subr.bf16.mxu0 %v13236_v0 }
0x128e   :  { %12065 = vmatmul.mubr.f32.vlgmr.msra.gmra.mrb[30].mxu0 %v8555_v32 }
0x128f   :  { %12691 = vmatpush3.bf16.msra.mxu0 %v12690_v20  ;;  %12075 = vmatprep.mubr.msk.f32.mxu0 %vm13237_vm0, %v13238_v1 }
0x1290   :  { %12692 = vmatprep.subr.bf16.mxu0 %v13236_v0 }
0x1293   :  { %12694 = vmatpush3.bf16.msra.mxu0 %v12693_v22  ;;  %v10549_v22 = vld [vmem:[#allocation8 + $0x250] ss:$0 sm:$0xff] }
0x1294   :  { %12695 = vmatprep.subr.bf16.mxu0 %v13236_v0 }
0x1296   :  { %12076 = vmatmul.mubr.f32.vlgmr.msra.gmra.mrb[30].mxu0 %v8553_v30 }
0x1297   :  { %12697 = vmatpush3.bf16.msra.mxu0 %v14099_v52  ;;  %12086 = vmatprep.mubr.msk.f32.mxu0 %vm13237_vm0, %v13238_v1  ;;  %v9063_v52 = vsub.f32 %v8970_v15, %v8983_v49  ;;  %v9469_v49 = vmax.f32 %v12989_v48, 0.002 }
0x1298   :  { %12698 = vmatprep.subr.bf16.mxu0 %v13236_v0 }
0x1299   :  { %v9064_v12 = vand.u32 4294901760, %v9063_v52  ;;  %v12714_v5 = vpack.c.bf16 %v9070_v53, %v9063_v52 }
0x129b   :  { %12700 = vmatpush3.bf16.msra.mxu0 %v14103_v60  ;;  %v9077_v60 = vsub.f32 %v8972_v54, %v8989_v56  ;;  %v9065_v62 = vsub.f32 %v9063_v52, %v9064_v12  ;;  %v12726_v19 = vpack.c.bf16 %v9071_v59, %v9064_v12 }
0x129c   :  { %12155 = vmatprep.subr.mxu0 %v13238_v1 }
0x129d   :  { %v9066_v63 = vand.u32 4294901760, %v9065_v62  ;;  %v9078_v3 = vand.u32 4294901760, %v9077_v60  ;;  %v12717_v18 = vpack.c.bf16 %v9084_v61, %v9077_v60 }
0x129e   :  { %12087 = vmatmul.mubr.f32.vlgmr.msra.gmra.mrb[30].mxu0 %v8553_v30 }
0x129f   :  { %12156 = vmatpush3.msra.mxu0 %v9493_v41  ;;  %12157 = vmatprep.mubr.msk.f32.mxu0 %vm13237_vm0, %v13238_v1  ;;  %v9079_v9 = vsub.f32 %v9077_v60, %v9078_v3  ;;  %v12708_v11 = vpack.c.bf16 %v9073_v7, %v9066_v63  ;;  %v12729_v20 = vpack.c.bf16 %v9085_v6, %v9078_v3 }
0x12a0   :  { %12160 = vmatprep.subr.mxu0 %v13238_v1 }
0x12a1   :  { %v9080_v13 = vand.u32 4294901760, %v9079_v9 }
0x12a2   :  { %12158 = vmatmul.mubr.f32.vlgmr.msra.gmra.mrb[32].mxu0 %v14146_v23 }
0x12a3   :  { %12161 = vmatpush3.msra.mxu0 %v9573_v51  ;;  %12162 = vmatprep.mubr.msk.f32.mxu0 %vm13237_vm0, %v13238_v1  ;;  %v12711_v17 = vpack.c.bf16 %v9087_v14, %v9080_v13 }
0x12a4   :  { %12165 = vmatprep.subr.mxu0 %v13238_v1 }
0x12aa   :  { %12163 = vmatmul.mubr.msk.f32.vlgmr.msra.gmra.mrb[32].mxu0 %vm9484_vm12, %v14123_v38 }
0x12ab   :  { %12166 = vmatpush3.msra.mxu0 %v9570_v44  ;;  %12167 = vmatprep.mubr.msk.f32.mxu0 %vm13237_vm0, %v13238_v1 }
0x12ac   :  { %12170 = vmatprep.subr.mxu0 %v13238_v1 }
0x12b2   :  { %12168 = vmatmul.mubr.f32.vlgmr.msra.gmra.mrb[32].mxu0 %v14132_v42 }
0x12b3   :  { %12171 = vmatpush3.msra.mxu0 %v9493_v41  ;;  %12172 = vmatprep.mubr.msk.f32.mxu0 %vm13237_vm0, %v13238_v1 }
0x12b4   :  { %12175 = vmatprep.subr.mxu0 %v13238_v1 }
0x12ba   :  { %12173 = vmatmul.mubr.f32.vlgmr.msra.gmra.mrb[32].mxu0 %v14136_v26 }
0x12bb   :  { %12176 = vmatpush3.msra.mxu0 %v9571_v45  ;;  %12177 = vmatprep.mubr.msk.f32.mxu0 %vm13237_vm0, %v13238_v1 }
0x12bc   :  { %12180 = vmatprep.subr.mxu0 %v13238_v1 }
0x12c2   :  { %12178 = vmatmul.mubr.msk.f32.vlgmr.msra.gmra.mrb[32].mxu0 %vm9484_vm12, %v14123_v38 }
0x12c3   :  { %12181 = vmatpush3.msra.mxu0 %v9493_v41  ;;  %12182 = vmatprep.mubr.msk.f32.mxu0 %vm13237_vm0, %v13238_v1  ;;  %v10022_v41 = vand.u32 4294901760, %v10021_v39 }
0x12c5   :  { %v10023_v44 = vsub.f32 %v10021_v39, %v10022_v41 }
0x12c7   :  { %v10024_v45 = vand.u32 4294901760, %v10023_v44 }
0x12ca   :  { %12183 = vmatmul.mubr.msk.f32.vlgmr.msra.gmra.mrb[32].mxu0 %vm9484_vm12, %v14123_v38 }
0x1371   :  { %v8965_v27 = vpop.f32.mrb[30].mxu0 }
0x1372   :  { %v12753_v24 = vadd.f32 %v10549_v22, %v8965_v27  ;;  %v12088_v25 = vpop.f32.mrb[31].mxu0 }
0x1374   :  { %v8969_v43 = vmax.f32 %v12753_v24, 0.0 }
0x1376   :  { %v8980_v28 = vsel %vm580_vm2, %v8969_v43, 0 }
0x1377   :  { %v9051_v29 = vand.u32 4294901760, %v8980_v28 }
0x1379   :  { %v9052_v30 = vsub.f32 %v8980_v28, %v9051_v29 }
0x137b   :  { %v9053_v31 = vand.u32 4294901760, %v9052_v30 }
0x137d   :  { %v9054_v32 = vsub.f32 %v9052_v30, %v9053_v31 }
0x137f   :  { %v9055_v4 = vand.u32 4294901760, %v9054_v32 }
0x1381   :  { %12098 = vmatmul.mubr.f32.vlgmr.msra.gmra.mrb[26].mxu1 %v9055_v4 }
0x1382   :  { %12709 = vmatpush3.bf16.msra.mxu1 %v12708_v11  ;;  %12108 = vmatprep.mubr.msk.f32.mxu1 %vm13237_vm0, %v13238_v1 }
0x1383   :  { %12710 = vmatprep.subr.bf16.mxu1 %v13236_v0 }
0x1386   :  { %12712 = vmatpush3.bf16.msra.mxu1 %v12711_v17 }
0x1387   :  { %12713 = vmatprep.subr.bf16.mxu1 %v13236_v0 }
0x1389   :  { %12109 = vmatmul.mubr.f32.vlgmr.msra.gmra.mrb[26].mxu1 %v9051_v29 }
0x138a   :  { %12715 = vmatpush3.bf16.msra.mxu1 %v12714_v5  ;;  %12119 = vmatprep.mubr.msk.f32.mxu1 %vm13237_vm0, %v13238_v1 }
0x138b   :  { %12716 = vmatprep.subr.bf16.mxu1 %v13236_v0 }
0x138e   :  { %12718 = vmatpush3.bf16.msra.mxu1 %v12717_v18 }
0x138f   :  { %12719 = vmatprep.subr.bf16.mxu1 %v13236_v0 }
0x1391   :  { %12120 = vmatmul.mubr.f32.vlgmr.msra.gmra.mrb[26].mxu1 %v9052_v30 }
0x1392   :  { %12721 = vmatpush3.bf16.msra.mxu1 %v14174_v21  ;;  %12130 = vmatprep.mubr.msk.f32.mxu1 %vm13237_vm0, %v13238_v1 }
0x1393   :  { %12722 = vmatprep.subr.bf16.mxu1 %v13236_v0 }
0x1396   :  { %12724 = vmatpush3.bf16.msra.mxu1 %v14178_v8 }
0x1397   :  { %12725 = vmatprep.subr.bf16.mxu1 %v13236_v0 }
0x1399   :  { %12131 = vmatmul.mubr.f32.vlgmr.msra.gmra.mrb[26].mxu1 %v9053_v31 }
0x139a   :  { %12727 = vmatpush3.bf16.msra.mxu1 %v12726_v19  ;;  %12141 = vmatprep.mubr.msk.f32.mxu1 %vm13237_vm0, %v13238_v1 }
0x139b   :  { %12728 = vmatprep.subr.bf16.mxu1 %v13236_v0 }
0x139d   :  { %v9934_v36 = vpop.f32.mrb[32].mxu0 }
0x139e   :  { %12730 = vmatpush3.bf16.msra.mxu1 %v12729_v20  ;;  %v10398_v37 = vsub.f32 %v13535_v58, %v9934_v36  ;;  %v12184_v34 = vpop.f32.mrb[33].mxu0 }
0x139f   :  { %12731 = vmatprep.subr.bf16.mxu1 %v13236_v0 }
0x13a0   :  { %v10399_v40 = vmul.f32 %v10398_v37, %v10398_v37 }
0x13a1   :  { %12142 = vmatmul.mubr.f32.vlgmr.msra.gmra.mrb[26].mxu1 %v9051_v29 }
0x13a2   :  { %12733 = vmatpush3.bf16.msra.mxu1 %v14174_v21  ;;  %10401 = vrot.lane.b32.xlu1 %v10399_v40, %s13235_s16 }
0x13a3   :  { %12734 = vmatprep.subr.bf16.mxu1 %v13236_v0  ;;  %12152 = vmatprep.mubr.msk.f32.mxu1 %vm13237_vm0, %v13238_v1  ;;  %v10550_v0 = vld [vmem:[#allocation8 + $0x278] ss:$0 sm:$0xff] }
0x13a6   :  { %12736 = vmatpush3.bf16.msra.mxu1 %v14178_v8 }
0x13a7   :  { %12185 = vmatprep.subr.mxu1 %v13238_v1 }
0x13a9   :  { %12153 = vmatmul.mubr.f32.vlgmr.msra.gmra.mrb[26].mxu1 %v9051_v29 }
0x13aa   :  { %12186 = vmatpush3.msra.mxu1 %v9944_v16  ;;  %12187 = vmatprep.mubr.msk.f32.mxu1 %vm13237_vm0, %v13238_v1 }
0x13ab   :  { %12190 = vmatprep.subr.mxu1 %v13238_v1 }
0x13ad   :  { %12188 = vmatmul.mubr.f32.vlgmr.msra.gmra.mrb[28].mxu1 %v14146_v23 }
0x13ae   :  { %12191 = vmatpush3.msra.mxu1 %v10024_v45  ;;  %12192 = vmatprep.mubr.msk.f32.mxu1 %vm13237_vm0, %v13238_v1 }
0x13af   :  { %12195 = vmatprep.subr.mxu1 %v13238_v1 }
0x13b5   :  { %12193 = vmatmul.mubr.msk.f32.vlgmr.msra.gmra.mrb[28].mxu1 %vm9484_vm12, %v14123_v38 }
0x13b6   :  { %12196 = vmatpush3.msra.mxu1 %v10021_v39  ;;  %12197 = vmatprep.mubr.msk.f32.mxu1 %vm13237_vm0, %v13238_v1 }
0x13b7   :  { %12200 = vmatprep.subr.mxu1 %v13238_v1 }
0x13bd   :  { %12198 = vmatmul.mubr.f32.vlgmr.msra.gmra.mrb[28].mxu1 %v14132_v42 }
0x13be   :  { %12201 = vmatpush3.msra.mxu1 %v9944_v16  ;;  %12202 = vmatprep.mubr.msk.f32.mxu1 %vm13237_vm0, %v13238_v1 }
0x13bf   :  { %12205 = vmatprep.subr.mxu1 %v13238_v1 }
0x13c5   :  { %12203 = vmatmul.mubr.f32.vlgmr.msra.gmra.mrb[28].mxu1 %v14136_v26 }
0x13c6   :  { %12206 = vmatpush3.msra.mxu1 %v10022_v41  ;;  %12207 = vmatprep.mubr.msk.f32.mxu1 %vm13237_vm0, %v13238_v1 }
0x13c7   :  { %12210 = vmatprep.subr.mxu1 %v13238_v1 }
0x13cd   :  { %12208 = vmatmul.mubr.msk.f32.vlgmr.msra.gmra.mrb[28].mxu1 %vm9484_vm12, %v14123_v38 }
0x13ce   :  { %12211 = vmatpush3.msra.mxu1 %v9944_v16  ;;  %12212 = vmatprep.mubr.msk.f32.mxu1 %vm13237_vm0, %v13238_v1 }
0x13d5   :  { %12213 = vmatmul.mubr.msk.f32.vlgmr.msra.gmra.mrb[28].mxu1 %vm9484_vm12, %v14123_v38 }
0x1414   :  { %v10402_v38 = vpop.permute.xlu1 %10401 }
0x1415   :  { %v10404_v50 = vadd.f32 %v10402_v38, %v9469_v49 }
0x147c   :  { %v9463_v42 = vpop.f32.mrb[26].mxu1 }
0x147d   :  { %v12754_v26 = vadd.f32 %v10550_v0, %v9463_v42  ;;  %v12154_v46 = vpop.f32.mrb[27].mxu1 }
0x147f   :  { %10434 = vst.msk [vmem:[#allocation11] sm:$0x3] %vm10433_vm13, %v12754_v26 }
0x14a8   :  { %v10385_v23 = vpop.f32.mrb[28].mxu1 }
0x14a9   :  { %v12214_v51 = vpop.f32.mrb[29].mxu1  ;;  %v10405_v15 = vmul.f32 2.0, %v10385_v23 }
0x14ab   :  { %10407 = vrot.lane.b32.xlu0 %v10405_v15, %s13235_s16 }
0x14af   :  { %10390 = vrot.lane.b32.xlu0 %v9469_v49, %s13242_s5 }
0x151d   :  { %v10408_v1 = vpop.permute.xlu0 %10407 }
0x151e   :  { %12990 = vrcp.f32 %v10408_v1 }
0x1521   :  { %v10391_v53 = vpop.permute.xlu0 %10390 }
0x1522   :  { %12992 = vrcp.f32 %v10391_v53 }
0x1528   :  { %v12991_v21 = vpop.eup %12990 }
0x1529   :  { %v10411_v52 = vmul.f32 %v12991_v21, %v10404_v50 }
0x152b   :  { %10413 = vrot.lane.b32.xlu1 %v10411_v52, %s13242_s5 }
0x152c   :  { %v12993_v58 = vpop.eup %12992 }
0x152d   :  { %v10394_v54 = vmul.f32 %v12993_v58, %v10385_v23 }
0x152f   :  { %12994 = vlog2.f32 %v10394_v54 }
0x1539   :  { %v12995_v55 = vpop.eup %12994 }
0x153a   :  { %v10396_v56 = vmul.f32 0.6931472, %v12995_v55 }
0x153c   :  { %v10397_v57 = vmul.f32 0.5, %v10396_v56 }
0x159d   :  { %v10414_v12 = vpop.permute.xlu1 %10413 }
0x159e   :  { %v10416_v59 = vadd.f32 %v10414_v12, %v10397_v57 }
0x15a0   :  { %v10558_v8 = vadd.f32 -0.5, %v10416_v59 }
0x15a2   :  { %v10419_v60 = vsel %vm10418_vm14, %v10558_v8, 0.0 }
0x15a3   :  { %10420 = vadd.xlane.f32.xlu0 %v10419_v60 }
0x15a4   :  { %13095 = shalt.err (!%p13092_p8)
}
0x15a5   :  { %s13096_s17 = scalar_lea.hbm %s14321_s9, 32 }
0x15a6   :  { %p13097_p9 = scmp.ne.s32.totalorder %s14321_s9, %s13096_s17  ;;  %p13100_p10 = scmp.lt.u32.totalorder %s13096_s17, %s14321_s9 }
0x15a8   :  { %p13102_p11 = pnand %p13100_p10, %p13097_p9 }
0x15aa   :  { %13105 = shalt.err (!%p13102_p11)
}
0x15ab   :  { %10464 = dma.vmem_to_hbm [thread:$0]  %s10462_s29, 32, %s14321_s9, [#allocation12]  }
0x15ac   :  { %s13106_s18 = scalar_lea.vmem %s10482_s14, 128  ;;  %p13111_p13 = scmp.lt.s32.totalorder %s10482_s14, %s10482_s14 }
0x15ad   :  { %p13107_p12 = scmp.ne.s32.totalorder %s10482_s14, %s13106_s18  ;;  %p13112_p0 = scmp.lt.s32.totalorder %s13106_s18, %s13106_s18 }
0x15af   :  { %p13113_p1 = por %p13112_p0, %p13111_p13 }
0x15b1   :  { %p13114_p2 = pnand %p13113_p1, %p13107_p12 }
0x15b3   :  { %13117 = shalt.err (!%p13114_p2)
}
0x15b4   :  { %s13118_s23 = scalar_lea.hbm %s14323_s11, 128 }
0x15b5   :  { %p13119_p3 = scmp.ne.s32.totalorder %s14323_s11, %s13118_s23  ;;  %p13122_p4 = scmp.lt.u32.totalorder %s13118_s23, %s14323_s11 }
0x15b7   :  { %p13124_p5 = pnand %p13122_p4, %p13119_p3 }
0x15b9   :  { %13127 = shalt.err (!%p13124_p5)
}
0x15ba   :  { %10484 = dma.vmem_to_hbm [thread:$0]  %s10482_s14, 128, %s14323_s11, [#allocation15]  }
0x15bb   :  { %s13245_s1 = smov [#allocation10]   ;;  %s13246_s6 = smov [#allocation13]  }
0x15bc   :  { %s10451_s27 = sshll.u32 %s13245_s1, 4  ;;  %s10471_s29 = sshll.u32 %s13246_s6, 4  ;;  %s10452_s27 = int_to_ptr.vmem [resolvable:$true] %s10451_s27  ;;  %s10472_s29 = int_to_ptr.vmem [resolvable:$true] %s10471_s29 }
0x15bd   :  { %s13128_s30 = scalar_lea.vmem %s10452_s27, 128  ;;  %p13133_p7 = scmp.lt.s32.totalorder %s10452_s27, %s10452_s27 }
0x15be   :  { %p13129_p6 = scmp.ne.s32.totalorder %s10452_s27, %s13128_s30  ;;  %p13134_p8 = scmp.lt.s32.totalorder %s13128_s30, %s13128_s30 }
0x15c0   :  { %p13135_p9 = por %p13134_p8, %p13133_p7 }
0x15c2   :  { %p13136_p10 = pnand %p13135_p9, %p13129_p6 }
0x15c4   :  { %13139 = shalt.err (!%p13136_p10)
}
0x15c5   :  { %s13140_s15 = scalar_lea.hbm %s14320_s8, 128 }
0x15c6   :  { %p13141_p11 = scmp.ne.s32.totalorder %s14320_s8, %s13140_s15  ;;  %p13144_p12 = scmp.lt.u32.totalorder %s13140_s15, %s14320_s8 }
0x15c8   :  { %p13146_p13 = pnand %p13144_p12, %p13141_p11 }
0x15ca   :  { %13149 = shalt.err (!%p13146_p13)
}
0x15cb   :  { %10454 = dma.vmem_to_hbm [thread:$0]  %s10452_s27, 128, %s14320_s8, [#allocation4]  }
0x15cc   :  { %s13150_s20 = scalar_lea.vmem %s10472_s29, 32  ;;  %p13155_p1 = scmp.lt.s32.totalorder %s10472_s29, %s10472_s29 }
0x15cd   :  { %p13151_p0 = scmp.ne.s32.totalorder %s10472_s29, %s13150_s20  ;;  %p13156_p2 = scmp.lt.s32.totalorder %s13150_s20, %s13150_s20 }
0x15cf   :  { %p13157_p3 = por %p13156_p2, %p13155_p1 }
0x15d1   :  { %p13158_p4 = pnand %p13157_p3, %p13151_p0 }
0x15d3   :  { %13161 = shalt.err (!%p13158_p4)
}
0x15d4   :  { %s13162_s18 = scalar_lea.hbm %s14322_s10, 32 }
0x15d5   :  { %p13163_p5 = scmp.ne.s32.totalorder %s14322_s10, %s13162_s18  ;;  %p13166_p6 = scmp.lt.u32.totalorder %s13162_s18, %s14322_s10 }
0x15d7   :  { %p13168_p7 = pnand %p13166_p6, %p13163_p5 }
0x15d9   :  { %13171 = shalt.err (!%p13168_p7)
}
0x15da   :  { %10474 = dma.vmem_to_hbm [thread:$0]  %s10472_s29, 32, %s14322_s10, [#allocation12]  }
0x15db   :  { %s13247_s5 = smov [#allocation16]  }
0x15dc   :  { %s10491_s0 = sshll.u32 %s13247_s5, 4  ;;  %s10492_s0 = int_to_ptr.vmem [resolvable:$true] %s10491_s0 }
0x15dd   :  { %s13172_s9 = scalar_lea.vmem %s10492_s0, 128  ;;  %p13177_p9 = scmp.lt.s32.totalorder %s10492_s0, %s10492_s0 }
0x15de   :  { %p13173_p8 = scmp.ne.s32.totalorder %s10492_s0, %s13172_s9  ;;  %p13178_p10 = scmp.lt.s32.totalorder %s13172_s9, %s13172_s9 }
0x15e0   :  { %p13179_p11 = por %p13178_p10, %p13177_p9 }
0x15e2   :  { %p13180_p12 = pnand %p13179_p11, %p13173_p8 }
0x15e4   :  { %13183 = shalt.err (!%p13180_p12)
}
0x15e5   :  { %s13184_s27 = scalar_lea.hbm %s14324_s12, 128 }
0x15e6   :  { %p13185_p13 = scmp.ne.s32.totalorder %s14324_s12, %s13184_s27  ;;  %p13188_p0 = scmp.lt.u32.totalorder %s13184_s27, %s14324_s12 }
0x15e8   :  { %p13190_p1 = pnand %p13188_p0, %p13185_p13 }
0x15ea   :  { %13193 = shalt.err (!%p13190_p1)
}
0x15eb   :  { %10494 = dma.vmem_to_hbm [thread:$0]  %s10492_s0, 128, %s14324_s12, [#allocation15]   ;;  %vm10443_vm15 = vcmask 0  }
0x15ec   :  { %s13248_s15 = smov [#allocation17]  }
0x15ed   :  { %s10501_s17 = sshll.u32 %s13248_s15, 4  ;;  %s10502_s17 = int_to_ptr.vmem [resolvable:$true] %s10501_s17 }
0x15ee   :  { %s13194_s11 = scalar_lea.vmem %s10502_s17, 16  ;;  %s13198_s14 = scalar_lea.vmem %s10502_s17, 32 }
0x15ef   :  { %p13195_p2 = scmp.ne.s32.totalorder %s10502_s17, %s13194_s11  ;;  %p13199_p3 = scmp.lt.s32.totalorder %s10502_s17, %s10502_s17 }
0x15f0   :  { %p13200_p4 = scmp.lt.s32.totalorder %s13198_s14, %s13194_s11 }
0x15f2   :  { %p13201_p5 = por %p13200_p4, %p13199_p3 }
0x15f4   :  { %p13202_p6 = pnand %p13201_p5, %p13195_p2 }
0x1630   :  { %v10421_v61 = vpop.xlane.xlu0 %10420 }
0x1631   :  { %v10422_v62 = vrot.slane %v10421_v61, 4 }
0x1633   :  { %v10423_v2 = vadd.f32 %v10422_v62, %v10421_v61 }
0x1635   :  { %v10424_v63 = vrot.slane %v10423_v2, 2 }
0x1637   :  { %v10425_v3 = vadd.f32 %v10424_v63, %v10423_v2 }
0x1639   :  { %v10426_v6 = vrot.slane %v10425_v3, 1 }
0x163b   :  { %v10427_v7 = vadd.f32 %v10426_v6, %v10425_v3 }
0x163d   :  { %12943 = vpush %v10427_v7 }
0x166e   :  { %s12944_s19 = spop %12943 }
0x166f   :  { %v10429_v9 = vstv %s12944_s19 }
0x1670   :  { %v10430_v10 = vmul.f32 0.5, %v10429_v9 }
0x1672   :  { %10444 = vst.msk [vmem:[#allocation17] sm:$0x1] %vm10443_vm15, %v10430_v10 }
0x1673   :  { %13205 = shalt.err (!%p13202_p6)
}
0x1674   :  { %s13206_s16 = scalar_lea.hbm %s14325_s13, 16 }
0x1675   :  { %p13207_p7 = scmp.ne.s32.totalorder %s14325_s13, %s13206_s16  ;;  %p13210_p8 = scmp.lt.u32.totalorder %s13206_s16, %s14325_s13 }
0x1677   :  { %p13212_p9 = pnand %p13210_p8, %p13207_p7 }
0x1679   :  { %13215 = shalt.err (!%p13212_p9)
}
0x167a   :  { %10504 = dma.vmem_to_hbm [thread:$0]  %s10502_s17, 16, %s14325_s13, [#allocation18]  }
0x167b   :  { %13222 = dma.done.wait [#allocation4], 128  }
0x167c   :  { %13223 = vsyncadd [#allocation4], 4294967168 }
0x167d   :  { %13224 = dma.done.wait [#allocation12], 64  }
0x167e   :  { %13225 = vsyncadd [#allocation12], 4294967232 }
0x167f   :  { %13226 = dma.done.wait [#allocation15], 256  }
0x1680   :  { %13227 = vsyncadd [#allocation15], 4294967040 }
0x1681   :  { %13228 = dma.done.wait [#allocation18], 16  }
0x1682   :  { %13229 = vsyncadd [#allocation18], 4294967280 }
0x1683   :  { %10523 = vsyncpa [#allocation3], 1 }
0x1684   :  { %10524 = vsyncpa [#allocation6], 1 }
0x1685   :  { %10525 = vsyncpa [#allocation9], 1 }
0x1686   :  { %10526 = vsyncpa [#allocation4], 1 }
0x1687   :  { %10527 = vsyncpa [#allocation12], 1 }
0x1688   :  { %10528 = vsyncpa [#allocation15], 1 }
0x1689   :  { %10529 = vsyncpa [#allocation18], 1 }

</bundles_post_ra>
